<compile_context>
chip_gen: v7x
topology: tpu7x:2x2x1
jax: 0.10.0
libtpu: 0.0.40
codegen_flags: <defaults>
</compile_context>

<pallas_src>
import math

import numpy as np
import jax
import jax.numpy as jnp
from jax import lax
from jax.experimental import pallas as pl
from jax.experimental.pallas import tpu as pltpu

# ----------------------------- model configuration --------------------------------
INPUT_DIM  = 16
D_MODEL    = 64          # == N_HEADS * D_HEAD   (reference: 8 * 64 = 512)
D_FF       = 128
D_HEAD     = 16          # d_q = d_k = d_v
N_HEADS    = 4
INPUT_BITS = 4           # q/k/v/attn activation bits; other QuantizeLinear use 8
N_LAYERS   = 6           # Transformer.forward hard-codes 6
LN_EPS     = 1e-5
EPS_ALPHA  = 1e-5

# ----------------- packed small-parameter array layout (one DMA) -------------------
_R_EMB_B, _R_ATTN_G, _R_ATTN_B, _R_FF_G, _R_FF_B, _R_PRO_W = 0, 1, 2, 3, 4, 5
_R_MOVE_Q, _R_MOVE_K, _R_MOVE_V, _R_SCAL = 6, 7, 8, 9
_N_SMALL_ROWS = 10
_C_PRO_B, _C_MQ, _C_MK, _C_MV, _C_MATT, _C_MFC1, _C_MFC2 = 0, 1, 2, 3, 4, 5, 6


# ----------------------------- in-kernel helpers ----------------------------------
def _sum_all(v):                                  # full reduce, keepdims
    r = v
    for ax in range(v.ndim - 1, -1, -1):
        r = jnp.sum(r, axis=ax, keepdims=True)
    return r


def _min_all(v):                                  # full reduce, keepdims
    r = v
    for ax in range(v.ndim - 1, -1, -1):
        r = jnp.min(r, axis=ax, keepdims=True)
    return r


def _mean_abs(v):
    n = 1
    for d in v.shape:
        n *= d
    return _sum_all(jnp.abs(v)) / float(n)


def _signed_alpha(v, num_bits):       # AlphaInit.initialize_wrapper, symmetric=True
    qp = 2.0 ** (num_bits - 1) - 1.0
    return 2.0 * _mean_abs(v) / math.sqrt(qp)


def _unsigned_alpha(v, num_bits):     # AlphaInit.initialize_wrapper, symmetric=False
    qp = 2.0 ** num_bits - 1.0
    return 4.0 * _mean_abs(v) / math.sqrt(qp)


def _int_code(v, alpha, qn, qp):      # integer quantization codes (exact in bf16)
    return jnp.clip(jnp.round(v / alpha), qn, qp)


def _layernorm(v, g, b):
    mu = jnp.mean(v, axis=-1, keepdims=True)
    c = v - mu
    var = jnp.mean(c * c, axis=-1, keepdims=True)
    return c * lax.rsqrt(var + LN_EPS) * g + b


# ------------------------------- fused kernel -------------------------------------
def transformer_kernel(x_ref, pos_ref, emb_wt_ref, qkv_sign_ref, attn_sign_ref,
                       fc1_sign_ref, fc2_sign_ref, small_ref,
                       logits_ref, scores_ref):
    """Whole 6-layer encoder + both heads, fully VMEM-resident, grid-less."""
    M = x_ref.shape[0]
    S = scores_ref.shape[0]
    B = M // S
    H, Dh = N_HEADS, D_HEAD
    HB = H * B
    rows_per_head = (S * Dh) // D_MODEL          # 2
    cols_per_row = D_MODEL // Dh                 # 4

    qn4, qp4 = float(-(2 ** (INPUT_BITS - 1))), float(2 ** (INPUT_BITS - 1) - 1)
    qn8, qp8 = -128.0, 127.0
    qpu4 = float(2 ** INPUT_BITS - 1)
    inv_sqrt_d = 1.0 / math.sqrt(Dh)

    # ---- hoisted parameter reads (read ONCE, shared by all 6 layers) ---------------
    emb_w = emb_wt_ref[...]                       # (INPUT_DIM, D_MODEL) f32
    qkv_s = qkv_sign_ref[...]                     # (D_MODEL, 3*D_MODEL) bf16 +/-1
    attn_s = attn_sign_ref[...]                   # (D_MODEL, D_MODEL)   bf16 +/-1
    fc1_s = fc1_sign_ref[...]                     # (D_MODEL, D_FF)      bf16 +/-1
    fc2_s = fc2_sign_ref[...]                     # (D_FF, D_MODEL)      bf16 +/-1
    small = small_ref[...]                        # (10, 64) f32 packed tiny params

    emb_b = small[_R_EMB_B:_R_EMB_B + 1, :]
    g_attn = small[_R_ATTN_G:_R_ATTN_G + 1, :]
    b_attn = small[_R_ATTN_B:_R_ATTN_B + 1, :]
    g_ff = small[_R_FF_G:_R_FF_G + 1, :]
    b_ff = small[_R_FF_B:_R_FF_B + 1, :]
    pro_w = small[_R_PRO_W:_R_PRO_W + 1, :]
    move_q = small[_R_MOVE_Q:_R_MOVE_Q + 1, :]
    move_k = small[_R_MOVE_K:_R_MOVE_K + 1, :]
    move_v = small[_R_MOVE_V:_R_MOVE_V + 1, :]
    scal = small[_R_SCAL:_R_SCAL + 1, :]
    pro_b = scal[:, _C_PRO_B:_C_PRO_B + 1]
    m_q = scal[:, _C_MQ:_C_MQ + 1]
    m_k = scal[:, _C_MK:_C_MK + 1]
    m_v = scal[:, _C_MV:_C_MV + 1]
    m_attn = scal[:, _C_MATT:_C_MATT + 1]
    m_fc1 = scal[:, _C_MFC1:_C_MFC1 + 1]
    m_fc2 = scal[:, _C_MFC2:_C_MFC2 + 1]

    # ---- embedding + positional encoding -------------------------------------------
    pos_v = pos_ref[...]                                               # (S, D_MODEL)
    pos_bcast = jnp.concatenate([pos_v for _ in range(B)], axis=0)     # (M, D_MODEL)
    h0 = (jnp.dot(x_ref[...], emb_w, preferred_element_type=jnp.float32)
          + emb_b + pos_bcast)
    # TODO(synk): nn.Dropout(p=0.1) treated as eval-mode identity; get_pad_mask is
    # all-ones and the reference's masked_fill is not in-place, so masking is a no-op.

    def stack_heads(v2d):
        # (M, H*Dh) -> (H*B, S, Dh), batch-of-heads layout for one batched einsum.
        return jnp.stack([v2d[b * S:(b + 1) * S, hh * Dh:(hh + 1) * Dh]
                          for hh in range(H) for b in range(B)], axis=0)

    def reinterpret_view(ctx_st):
        # Reproduce the reference's `output.view(B, S, H*Dh)` raw reinterpretation of
        # the (B, H, S, Dh)-contiguous attention output (NO head transpose), built as
        # a value from full-width lane concats (no scratch, no masked row stores).
        rows = []
        for b in range(B):
            for hh in range(H):
                cb = ctx_st[hh * B + b]                                # (S, Dh)
                for j in range(rows_per_head):
                    rows.append(jnp.concatenate(
                        [cb[j * cols_per_row + k:j * cols_per_row + k + 1, :]
                         for k in range(cols_per_row)], axis=1))       # (1, D_MODEL)
        return jnp.concatenate(rows, axis=0)                           # (M, D_MODEL)

    # ---- one encoder layer; `alphas` is the lazily-initialized clip registry -------
    def layer_body(h2d, alphas):
        def get(name, init_fn):
            if name not in alphas:
                alphas[name] = jnp.maximum(init_fn(), EPS_ALPHA)
            return alphas[name]

        x2d = h2d

        # fused Q|K|V projection: 4-bit signed activation codes (exact bf16 ints) x
        # +/-1 sign weights on the MXU, alpha * weight-scale applied in the epilogue.
        a_in = get("qkv_in", lambda: _signed_alpha(x2d, INPUT_BITS))
        xi = _int_code(x2d, a_in, qn4, qp4).astype(jnp.bfloat16)
        qkv_raw = jnp.dot(xi, qkv_s, preferred_element_type=jnp.float32)
        q2d = qkv_raw[:, 0:D_MODEL] * (a_in * m_q) + move_q
        k2d = qkv_raw[:, D_MODEL:2 * D_MODEL] * (a_in * m_k) + move_k
        v2d = qkv_raw[:, 2 * D_MODEL:3 * D_MODEL] * (a_in * m_v) + move_v

        a_q = get("clip_query", lambda: _signed_alpha(q2d, INPUT_BITS))
        a_k = get("clip_key", lambda: _signed_alpha(k2d, INPUT_BITS))
        a_v = get("clip_value", lambda: _signed_alpha(v2d, INPUT_BITS))
        qi = stack_heads(_int_code(q2d, a_q, qn4, qp4)).astype(jnp.bfloat16)
        ki = stack_heads(_int_code(k2d, a_k, qn4, qp4)).astype(jnp.bfloat16)
        vq = stack_heads(_int_code(v2d, a_v, qn4, qp4)) * a_v          # (HB, S, Dh)

        # scores (pre-softmax, scaled) for all (batch, head) pairs in one einsum.
        s_int = jnp.einsum('bqd,bkd->bqk', qi, ki,
                           preferred_element_type=jnp.float32)
        scores = s_int * (a_q * a_k * inv_sqrt_d)                      # (HB, S, S)

        # softmax + unsigned 4-bit quant with GLOBAL min shift (all in one stack).
        mrow = jnp.max(scores, axis=-1, keepdims=True)
        e = jnp.exp(scores - mrow)
        attn = e / jnp.sum(e, axis=-1, keepdims=True)
        amin = _min_all(attn)
        a_at = get("clip_attn", lambda: _unsigned_alpha(attn, INPUT_BITS))
        attn_q = (jnp.clip(jnp.round((attn - amin) / a_at), 0.0, qpu4) * a_at + amin)

        ctx_st = jnp.einsum('bqk,bkd->bqd', attn_q, vq,
                            preferred_element_type=jnp.float32)        # (HB, S, Dh)
        ctx2d = reinterpret_view(ctx_st)                               # (M, D_MODEL)

        # attention output projection (8-bit activations) + residual + LayerNorm.
        a_lin = get("linear_in", lambda: _signed_alpha(ctx2d, 8))
        ci = _int_code(ctx2d, a_lin, qn8, qp8).astype(jnp.bfloat16)
        proj = (jnp.dot(ci, attn_s, preferred_element_type=jnp.float32)
                * (a_lin * m_attn))
        h_attn = _layernorm(x2d + proj, g_attn, b_attn)

        # position-wise FFN (8-bit activations) + residual + LayerNorm.
        a_f1 = get("fc1_in", lambda: _signed_alpha(h_attn, 8))
        hi = _int_code(h_attn, a_f1, qn8, qp8).astype(jnp.bfloat16)
        h1 = jnp.maximum(jnp.dot(hi, fc1_s, preferred_element_type=jnp.float32)
                         * (a_f1 * m_fc1), 0.0)
        a_f2 = get("fc2_in", lambda: _signed_alpha(h1, 8))
        h1i = _int_code(h1, a_f2, qn8, qp8).astype(jnp.bfloat16)
        h2 = (jnp.dot(h1i, fc2_s, preferred_element_type=jnp.float32)
              * (a_f2 * m_fc2))
        h_out = _layernorm(h_attn + h2, g_ff, b_ff)
        return h_out, scores

    # ---- layer 0 unrolled (materializes every clip alpha), layers 1..5 in a loop ---
    alphas = {}
    h1_, sc1 = layer_body(h0, alphas)

    def loop_body(_, carry):
        h_prev, _sc = carry
        return layer_body(h_prev, alphas)

    h_fin, sc_fin = lax.fori_loop(1, N_LAYERS, loop_body, (h1_, sc1))

    # lane-dense scores store: (S, H*B*S) = one wide store; wrapper reshapes.
    scores_ref[...] = jnp.concatenate([sc_fin[i] for i in range(HB)], axis=1)

    # final projection head (d_model -> 1) as a lane reduction.
    logits_ref[...] = (jnp.sum(h_fin * pro_w, axis=-1, keepdims=True) + pro_b)


# ------------------------------- forward wrapper -----------------------------------
def transformer_forward(params, x):
    B, S, _ = x.shape
    M = B * S

    vmem = pl.BlockSpec(memory_space=pltpu.MemorySpace.VMEM)
    logits, scores2d = pl.pallas_call(
        transformer_kernel,
        out_shape=(jax.ShapeDtypeStruct((M, 1), jnp.float32),
                   jax.ShapeDtypeStruct((S, N_HEADS * B * S), jnp.float32)),
        in_specs=[vmem] * 8,
        out_specs=(vmem, vmem),
    )(x.reshape(M, INPUT_DIM), params["pos_table"][:S, :],
      params["emb_wt"], params["qkv_sign"], params["attn_sign"],
      params["fc1_sign"], params["fc2_sign"], params["small"])

    # logits: (B*S, 1) like the reference's logits.view(-1, 1);
    # scores: last layer's pre-softmax scaled attention scores -> (B, H, S, S).
    attn = scores2d.reshape(S, N_HEADS, B, S).transpose(2, 1, 0, 3)
    return logits, attn


# ------------------------------ parameter creation ---------------------------------
def bwn_sign_scale(w):
    """BwnQuantizer (layerwise): weight = sign(W - mean(W)) * mean(|W|)."""
    return jnp.sign(w - jnp.mean(w)), jnp.mean(jnp.abs(w))


def make_pos_table(max_len, d_model):
    pos = np.arange(max_len, dtype=np.float64)[:, None]
    i = np.arange(d_model, dtype=np.float64)[None, :]
    table = pos / np.power(10000.0, 2.0 * i / d_model)
    table[1:, 0::2] = np.sin(table[1:, 0::2])
    table[1:, 1::2] = np.cos(table[1:, 1::2])
    return jnp.asarray(table, dtype=jnp.float32)


def init_params(key, max_len=128):
    keys = jax.random.split(key, 8)

    def lin(k, out_d, in_d):
        kw, kb = jax.random.split(k)
        bound = 1.0 / math.sqrt(in_d)
        w = jax.random.uniform(kw, (out_d, in_d), jnp.float32, -bound, bound)
        b = jax.random.uniform(kb, (out_d,), jnp.float32, -bound, bound)
        return w, b

    emb_w, emb_b = lin(keys[0], D_MODEL, INPUT_DIM)
    quary_w, _ = lin(keys[1], N_HEADS * D_HEAD, D_MODEL)
    key_w, _ = lin(keys[2], N_HEADS * D_HEAD, D_MODEL)
    value_w, _ = lin(keys[3], N_HEADS * D_HEAD, D_MODEL)
    attn_lin_w, _ = lin(keys[4], D_MODEL, N_HEADS * D_HEAD)
    fc1_w, _ = lin(keys[5], D_FF, D_MODEL)
    fc2_w, _ = lin(keys[6], D_MODEL, D_FF)
    pro_w, pro_b = lin(keys[7], 1, D_MODEL)

    # BWN: +/-1 sign matrices (bf16, exact) + scalar scales; Q|K|V concatenated and
    # transposed to (in, out) ONCE here (weights shared across all 6 layers).
    sq, mq = bwn_sign_scale(quary_w)
    sk, mk = bwn_sign_scale(key_w)
    sv, mv = bwn_sign_scale(value_w)
    sa, ma = bwn_sign_scale(attn_lin_w)
    s1, m1 = bwn_sign_scale(fc1_w)
    s2, m2 = bwn_sign_scale(fc2_w)
    qkv_sign = jnp.concatenate([sq.T, sk.T, sv.T], axis=1).astype(jnp.bfloat16)

    zeros64 = jnp.zeros((D_MODEL,), jnp.float32)
    ones64 = jnp.ones((D_MODEL,), jnp.float32)
    scal = (zeros64.at[_C_PRO_B].set(pro_b[0])
            .at[_C_MQ].set(mq).at[_C_MK].set(mk).at[_C_MV].set(mv)
            .at[_C_MATT].set(ma).at[_C_MFC1].set(m1).at[_C_MFC2].set(m2))

    # one packed array for all tiny params -> single DMA instead of ~8.
    small = jnp.stack([
        emb_b,                               # _R_EMB_B
        ones64, zeros64,                     # _R_ATTN_G, _R_ATTN_B (LayerNorm)
        ones64, zeros64,                     # _R_FF_G,   _R_FF_B   (LayerNorm)
        pro_w.reshape(D_MODEL),              # _R_PRO_W
        zeros64, zeros64, zeros64,           # move_q / move_k / move_v (init 0)
        scal,                                # _R_SCAL
    ], axis=0)
    assert small.shape == (_N_SMALL_ROWS, D_MODEL)

    return dict(
        emb_wt=emb_w.T,                                  # (INPUT_DIM, D_MODEL) f32
        pos_table=make_pos_table(max_len, D_MODEL),
        qkv_sign=qkv_sign,                               # (D_MODEL, 3*D_MODEL) bf16
        attn_sign=sa.T.astype(jnp.bfloat16),             # (D_MODEL, D_MODEL)   bf16
        fc1_sign=s1.T.astype(jnp.bfloat16),              # (D_MODEL, D_FF)      bf16
        fc2_sign=s2.T.astype(jnp.bfloat16),              # (D_FF, D_MODEL)      bf16
        small=small,                                     # (10, 64) f32
    )


if __name__ == "__main__":
    root = jax.random.PRNGKey(0)
    pkey, xkey = jax.random.split(root)
    params = init_params(pkey)

    B, S = 2, 8
    x = jax.random.normal(xkey, (B, S, INPUT_DIM), jnp.float32)

    fwd = jax.jit(transformer_forward)
    logits, attn = fwd(params, x)
    jax.block_until_ready((logits, attn))

    assert logits.shape == (B * S, 1), logits.shape
    assert attn.shape == (B, N_HEADS, S, S), attn.shape
    assert bool(jnp.all(jnp.isfinite(logits))) and bool(jnp.all(jnp.isfinite(attn)))
    print("KERNEL_OK")
</pallas_src>

<mosaic_0001>
module attributes {stable_mosaic.version = 11 : i64} {
  func.func @transformer_kernel(%arg0: memref<16x16xf32, #tpu.memory_space<vmem>>, %arg1: memref<8x64xf32, #tpu.memory_space<vmem>>, %arg2: memref<16x64xf32, #tpu.memory_space<vmem>>, %arg3: memref<64x192xbf16, #tpu.memory_space<vmem>>, %arg4: memref<64x64xbf16, #tpu.memory_space<vmem>>, %arg5: memref<64x128xbf16, #tpu.memory_space<vmem>>, %arg6: memref<128x64xbf16, #tpu.memory_space<vmem>>, %arg7: memref<10x64xf32, #tpu.memory_space<vmem>>, %arg8: memref<16x1xf32, #tpu.memory_space<vmem>>, %arg9: memref<8x64xf32, #tpu.memory_space<vmem>>) attributes {dimension_semantics = [], scalar_prefetch = 0 : i64, scratch_operands = 0 : i64, tpu.core_type = #tpu.core_type<tc>} {
    %c0 = arith.constant 0 : index
    %c0_0 = arith.constant 0 : index
    %0 = vector.load %arg2[%c0, %c0_0] : memref<16x64xf32, #tpu.memory_space<vmem>>, vector<16x64xf32>
    %c0_1 = arith.constant 0 : index
    %c0_2 = arith.constant 0 : index
    %1 = vector.load %arg3[%c0_1, %c0_2] : memref<64x192xbf16, #tpu.memory_space<vmem>>, vector<64x192xbf16>
    %c0_3 = arith.constant 0 : index
    %c0_4 = arith.constant 0 : index
    %2 = vector.load %arg4[%c0_3, %c0_4] : memref<64x64xbf16, #tpu.memory_space<vmem>>, vector<64x64xbf16>
    %c0_5 = arith.constant 0 : index
    %c0_6 = arith.constant 0 : index
    %3 = vector.load %arg5[%c0_5, %c0_6] : memref<64x128xbf16, #tpu.memory_space<vmem>>, vector<64x128xbf16>
    %c0_7 = arith.constant 0 : index
    %c0_8 = arith.constant 0 : index
    %4 = vector.load %arg6[%c0_7, %c0_8] : memref<128x64xbf16, #tpu.memory_space<vmem>>, vector<128x64xbf16>
    %c0_9 = arith.constant 0 : index
    %c0_10 = arith.constant 0 : index
    %5 = vector.load %arg7[%c0_9, %c0_10] : memref<10x64xf32, #tpu.memory_space<vmem>>, vector<10x64xf32>
    %6 = vector.extract_strided_slice %5 {offsets = [0, 0], sizes = [1, 64], strides = [1, 1]} : vector<10x64xf32> to vector<1x64xf32>
    %7 = vector.extract_strided_slice %5 {offsets = [1, 0], sizes = [1, 64], strides = [1, 1]} : vector<10x64xf32> to vector<1x64xf32>
    %8 = vector.extract_strided_slice %5 {offsets = [2, 0], sizes = [1, 64], strides = [1, 1]} : vector<10x64xf32> to vector<1x64xf32>
    %9 = vector.extract_strided_slice %5 {offsets = [3, 0], sizes = [1, 64], strides = [1, 1]} : vector<10x64xf32> to vector<1x64xf32>
    %10 = vector.extract_strided_slice %5 {offsets = [4, 0], sizes = [1, 64], strides = [1, 1]} : vector<10x64xf32> to vector<1x64xf32>
    %11 = vector.extract_strided_slice %5 {offsets = [5, 0], sizes = [1, 64], strides = [1, 1]} : vector<10x64xf32> to vector<1x64xf32>
    %12 = vector.extract_strided_slice %5 {offsets = [6, 0], sizes = [1, 64], strides = [1, 1]} : vector<10x64xf32> to vector<1x64xf32>
    %13 = vector.extract_strided_slice %5 {offsets = [7, 0], sizes = [1, 64], strides = [1, 1]} : vector<10x64xf32> to vector<1x64xf32>
    %14 = vector.extract_strided_slice %5 {offsets = [8, 0], sizes = [1, 64], strides = [1, 1]} : vector<10x64xf32> to vector<1x64xf32>
    %15 = vector.extract_strided_slice %5 {offsets = [9, 0], sizes = [1, 64], strides = [1, 1]} : vector<10x64xf32> to vector<1x64xf32>
    %16 = vector.extract_strided_slice %15 {offsets = [0, 0], sizes = [1, 1], strides = [1, 1]} : vector<1x64xf32> to vector<1x1xf32>
    %17 = vector.extract_strided_slice %15 {offsets = [0, 1], sizes = [1, 1], strides = [1, 1]} : vector<1x64xf32> to vector<1x1xf32>
    %18 = vector.extract_strided_slice %15 {offsets = [0, 2], sizes = [1, 1], strides = [1, 1]} : vector<1x64xf32> to vector<1x1xf32>
    %19 = vector.extract_strided_slice %15 {offsets = [0, 3], sizes = [1, 1], strides = [1, 1]} : vector<1x64xf32> to vector<1x1xf32>
    %20 = vector.extract_strided_slice %15 {offsets = [0, 4], sizes = [1, 1], strides = [1, 1]} : vector<1x64xf32> to vector<1x1xf32>
    %21 = vector.extract_strided_slice %15 {offsets = [0, 5], sizes = [1, 1], strides = [1, 1]} : vector<1x64xf32> to vector<1x1xf32>
    %22 = vector.extract_strided_slice %15 {offsets = [0, 6], sizes = [1, 1], strides = [1, 1]} : vector<1x64xf32> to vector<1x1xf32>
    %c0_11 = arith.constant 0 : index
    %c0_12 = arith.constant 0 : index
    %23 = vector.load %arg1[%c0_11, %c0_12] : memref<8x64xf32, #tpu.memory_space<vmem>>, vector<8x64xf32>
    %24 = tpu.concatenate %23, %23 in 0 : vector<8x64xf32>, vector<8x64xf32> -> vector<16x64xf32>
    %c0_13 = arith.constant 0 : index
    %c0_14 = arith.constant 0 : index
    %25 = vector.load %arg0[%c0_13, %c0_14] : memref<16x16xf32, #tpu.memory_space<vmem>>, vector<16x16xf32>
    %cst = arith.constant dense<0.000000e+00> : vector<16x64xf32>
    %26 = tpu.matmul %25, %0, %cst {dimension_numbers = #tpu.dot_dimension_numbers<[1], [0], [0], [1], [0, 0, 1, 1], [], []>} : vector<16x16xf32>, vector<16x64xf32>, vector<16x64xf32> -> vector<16x64xf32>
    %27 = vector.broadcast %6 : vector<1x64xf32> to vector<16x64xf32>
    %28 = arith.addf %26, %27 : vector<16x64xf32>
    %29 = arith.addf %28, %24 : vector<16x64xf32>
    %30 = math.absf %29 : vector<16x64xf32>
    %cst_15 = arith.constant dense<0.000000e+00> : vector<16xf32>
    %31 = vector.multi_reduction <add>, %30, %cst_15 [1] : vector<16x64xf32> to vector<16xf32>
    %32 = vector.shape_cast %31 : vector<16xf32> to vector<16x1xf32>
    %cst_16 = arith.constant dense<0.000000e+00> : vector<1xf32>
    %33 = vector.multi_reduction <add>, %32, %cst_16 [0] : vector<16x1xf32> to vector<1xf32>
    %34 = vector.shape_cast %33 : vector<1xf32> to vector<1x1xf32>
    %cst_17 = arith.constant 1.024000e+03 : f32
    %35 = vector.broadcast %cst_17 : f32 to vector<1x1xf32>
    %36 = arith.divf %34, %35 : vector<1x1xf32>
    %cst_18 = arith.constant 2.000000e+00 : f32
    %37 = vector.broadcast %cst_18 : f32 to vector<1x1xf32>
    %38 = arith.mulf %37, %36 : vector<1x1xf32>
    %cst_19 = arith.constant 2.64575124 : f32
    %39 = vector.broadcast %cst_19 : f32 to vector<1x1xf32>
    %40 = arith.divf %38, %39 : vector<1x1xf32>
    %cst_20 = arith.constant 9.99999974E-6 : f32
    %41 = vector.broadcast %cst_20 : f32 to vector<1x1xf32>
    %42 = arith.maximumf %40, %41 : vector<1x1xf32>
    %43 = vector.broadcast %42 : vector<1x1xf32> to vector<16x64xf32>
    %44 = arith.divf %29, %43 : vector<16x64xf32>
    %45 = math.roundeven %44 : vector<16x64xf32>
    %cst_21 = arith.constant -8.000000e+00 : f32
    %cst_22 = arith.constant 7.000000e+00 : f32
    %46 = vector.broadcast %cst_21 : f32 to vector<16x64xf32>
    %47 = arith.maximumf %46, %45 : vector<16x64xf32>
    %48 = vector.broadcast %cst_22 : f32 to vector<16x64xf32>
    %49 = arith.minimumf %48, %47 : vector<16x64xf32>
    %50 = arith.truncf %49 : vector<16x64xf32> to vector<16x64xbf16>
    %cst_23 = arith.constant dense<0.000000e+00> : vector<16x192xf32>
    %51 = tpu.matmul %50, %1, %cst_23 {dimension_numbers = #tpu.dot_dimension_numbers<[1], [0], [0], [1], [0, 0, 1, 1], [], []>} : vector<16x64xbf16>, vector<64x192xbf16>, vector<16x192xf32> -> vector<16x192xf32>
    %52 = vector.extract_strided_slice %51 {offsets = [0, 0], sizes = [16, 64], strides = [1, 1]} : vector<16x192xf32> to vector<16x64xf32>
    %53 = arith.mulf %42, %17 : vector<1x1xf32>
    %54 = vector.broadcast %53 : vector<1x1xf32> to vector<16x64xf32>
    %55 = arith.mulf %52, %54 : vector<16x64xf32>
    %56 = vector.broadcast %12 : vector<1x64xf32> to vector<16x64xf32>
    %57 = arith.addf %55, %56 : vector<16x64xf32>
    %58 = vector.extract_strided_slice %51 {offsets = [0, 64], sizes = [16, 64], strides = [1, 1]} : vector<16x192xf32> to vector<16x64xf32>
    %59 = arith.mulf %42, %18 : vector<1x1xf32>
    %60 = vector.broadcast %59 : vector<1x1xf32> to vector<16x64xf32>
    %61 = arith.mulf %58, %60 : vector<16x64xf32>
    %62 = vector.broadcast %13 : vector<1x64xf32> to vector<16x64xf32>
    %63 = arith.addf %61, %62 : vector<16x64xf32>
    %64 = vector.extract_strided_slice %51 {offsets = [0, 128], sizes = [16, 64], strides = [1, 1]} : vector<16x192xf32> to vector<16x64xf32>
    %65 = arith.mulf %42, %19 : vector<1x1xf32>
    %66 = vector.broadcast %65 : vector<1x1xf32> to vector<16x64xf32>
    %67 = arith.mulf %64, %66 : vector<16x64xf32>
    %68 = vector.broadcast %14 : vector<1x64xf32> to vector<16x64xf32>
    %69 = arith.addf %67, %68 : vector<16x64xf32>
    %70 = math.absf %57 : vector<16x64xf32>
    %cst_24 = arith.constant dense<0.000000e+00> : vector<16xf32>
    %71 = vector.multi_reduction <add>, %70, %cst_24 [1] : vector<16x64xf32> to vector<16xf32>
    %72 = vector.shape_cast %71 : vector<16xf32> to vector<16x1xf32>
    %cst_25 = arith.constant dense<0.000000e+00> : vector<1xf32>
    %73 = vector.multi_reduction <add>, %72, %cst_25 [0] : vector<16x1xf32> to vector<1xf32>
    %74 = vector.shape_cast %73 : vector<1xf32> to vector<1x1xf32>
    %cst_26 = arith.constant 1.024000e+03 : f32
    %75 = vector.broadcast %cst_26 : f32 to vector<1x1xf32>
    %76 = arith.divf %74, %75 : vector<1x1xf32>
    %cst_27 = arith.constant 2.000000e+00 : f32
    %77 = vector.broadcast %cst_27 : f32 to vector<1x1xf32>
    %78 = arith.mulf %77, %76 : vector<1x1xf32>
    %cst_28 = arith.constant 2.64575124 : f32
    %79 = vector.broadcast %cst_28 : f32 to vector<1x1xf32>
    %80 = arith.divf %78, %79 : vector<1x1xf32>
    %cst_29 = arith.constant 9.99999974E-6 : f32
    %81 = vector.broadcast %cst_29 : f32 to vector<1x1xf32>
    %82 = arith.maximumf %80, %81 : vector<1x1xf32>
    %83 = math.absf %63 : vector<16x64xf32>
    %cst_30 = arith.constant dense<0.000000e+00> : vector<16xf32>
    %84 = vector.multi_reduction <add>, %83, %cst_30 [1] : vector<16x64xf32> to vector<16xf32>
    %85 = vector.shape_cast %84 : vector<16xf32> to vector<16x1xf32>
    %cst_31 = arith.constant dense<0.000000e+00> : vector<1xf32>
    %86 = vector.multi_reduction <add>, %85, %cst_31 [0] : vector<16x1xf32> to vector<1xf32>
    %87 = vector.shape_cast %86 : vector<1xf32> to vector<1x1xf32>
    %cst_32 = arith.constant 1.024000e+03 : f32
    %88 = vector.broadcast %cst_32 : f32 to vector<1x1xf32>
    %89 = arith.divf %87, %88 : vector<1x1xf32>
    %cst_33 = arith.constant 2.000000e+00 : f32
    %90 = vector.broadcast %cst_33 : f32 to vector<1x1xf32>
    %91 = arith.mulf %90, %89 : vector<1x1xf32>
    %cst_34 = arith.constant 2.64575124 : f32
    %92 = vector.broadcast %cst_34 : f32 to vector<1x1xf32>
    %93 = arith.divf %91, %92 : vector<1x1xf32>
    %cst_35 = arith.constant 9.99999974E-6 : f32
    %94 = vector.broadcast %cst_35 : f32 to vector<1x1xf32>
    %95 = arith.maximumf %93, %94 : vector<1x1xf32>
    %96 = math.absf %69 : vector<16x64xf32>
    %cst_36 = arith.constant dense<0.000000e+00> : vector<16xf32>
    %97 = vector.multi_reduction <add>, %96, %cst_36 [1] : vector<16x64xf32> to vector<16xf32>
    %98 = vector.shape_cast %97 : vector<16xf32> to vector<16x1xf32>
    %cst_37 = arith.constant dense<0.000000e+00> : vector<1xf32>
    %99 = vector.multi_reduction <add>, %98, %cst_37 [0] : vector<16x1xf32> to vector<1xf32>
    %100 = vector.shape_cast %99 : vector<1xf32> to vector<1x1xf32>
    %cst_38 = arith.constant 1.024000e+03 : f32
    %101 = vector.broadcast %cst_38 : f32 to vector<1x1xf32>
    %102 = arith.divf %100, %101 : vector<1x1xf32>
    %cst_39 = arith.constant 2.000000e+00 : f32
    %103 = vector.broadcast %cst_39 : f32 to vector<1x1xf32>
    %104 = arith.mulf %103, %102 : vector<1x1xf32>
    %cst_40 = arith.constant 2.64575124 : f32
    %105 = vector.broadcast %cst_40 : f32 to vector<1x1xf32>
    %106 = arith.divf %104, %105 : vector<1x1xf32>
    %cst_41 = arith.constant 9.99999974E-6 : f32
    %107 = vector.broadcast %cst_41 : f32 to vector<1x1xf32>
    %108 = arith.maximumf %106, %107 : vector<1x1xf32>
    %109 = vector.broadcast %82 : vector<1x1xf32> to vector<16x64xf32>
    %110 = arith.divf %57, %109 : vector<16x64xf32>
    %111 = math.roundeven %110 : vector<16x64xf32>
    %cst_42 = arith.constant -8.000000e+00 : f32
    %cst_43 = arith.constant 7.000000e+00 : f32
    %112 = vector.broadcast %cst_42 : f32 to vector<16x64xf32>
    %113 = arith.maximumf %112, %111 : vector<16x64xf32>
    %114 = vector.broadcast %cst_43 : f32 to vector<16x64xf32>
    %115 = arith.minimumf %114, %113 : vector<16x64xf32>
    %116 = vector.extract_strided_slice %115 {offsets = [0, 0], sizes = [8, 16], strides = [1, 1]} : vector<16x64xf32> to vector<8x16xf32>
    %117 = vector.extract_strided_slice %115 {offsets = [8, 0], sizes = [8, 16], strides = [1, 1]} : vector<16x64xf32> to vector<8x16xf32>
    %118 = vector.extract_strided_slice %115 {offsets = [0, 16], sizes = [8, 16], strides = [1, 1]} : vector<16x64xf32> to vector<8x16xf32>
    %119 = vector.extract_strided_slice %115 {offsets = [8, 16], sizes = [8, 16], strides = [1, 1]} : vector<16x64xf32> to vector<8x16xf32>
    %120 = vector.extract_strided_slice %115 {offsets = [0, 32], sizes = [8, 16], strides = [1, 1]} : vector<16x64xf32> to vector<8x16xf32>
    %121 = vector.extract_strided_slice %115 {offsets = [8, 32], sizes = [8, 16], strides = [1, 1]} : vector<16x64xf32> to vector<8x16xf32>
    %122 = vector.extract_strided_slice %115 {offsets = [0, 48], sizes = [8, 16], strides = [1, 1]} : vector<16x64xf32> to vector<8x16xf32>
    %123 = vector.extract_strided_slice %115 {offsets = [8, 48], sizes = [8, 16], strides = [1, 1]} : vector<16x64xf32> to vector<8x16xf32>
    %124 = vector.shape_cast %116 : vector<8x16xf32> to vector<1x8x16xf32>
    %125 = vector.shape_cast %117 : vector<8x16xf32> to vector<1x8x16xf32>
    %126 = vector.shape_cast %118 : vector<8x16xf32> to vector<1x8x16xf32>
    %127 = vector.shape_cast %119 : vector<8x16xf32> to vector<1x8x16xf32>
    %128 = vector.shape_cast %120 : vector<8x16xf32> to vector<1x8x16xf32>
    %129 = vector.shape_cast %121 : vector<8x16xf32> to vector<1x8x16xf32>
    %130 = vector.shape_cast %122 : vector<8x16xf32> to vector<1x8x16xf32>
    %131 = vector.shape_cast %123 : vector<8x16xf32> to vector<1x8x16xf32>
    %132 = tpu.concatenate %124, %125, %126, %127, %128, %129, %130, %131 in 0 : vector<1x8x16xf32>, vector<1x8x16xf32>, vector<1x8x16xf32>, vector<1x8x16xf32>, vector<1x8x16xf32>, vector<1x8x16xf32>, vector<1x8x16xf32>, vector<1x8x16xf32> -> vector<8x8x16xf32>
    %133 = arith.truncf %132 : vector<8x8x16xf32> to vector<8x8x16xbf16>
    %134 = vector.broadcast %95 : vector<1x1xf32> to vector<16x64xf32>
    %135 = arith.divf %63, %134 : vector<16x64xf32>
    %136 = math.roundeven %135 : vector<16x64xf32>
    %cst_44 = arith.constant -8.000000e+00 : f32
    %cst_45 = arith.constant 7.000000e+00 : f32
    %137 = vector.broadcast %cst_44 : f32 to vector<16x64xf32>
    %138 = arith.maximumf %137, %136 : vector<16x64xf32>
    %139 = vector.broadcast %cst_45 : f32 to vector<16x64xf32>
    %140 = arith.minimumf %139, %138 : vector<16x64xf32>
    %141 = vector.extract_strided_slice %140 {offsets = [0, 0], sizes = [8, 16], strides = [1, 1]} : vector<16x64xf32> to vector<8x16xf32>
    %142 = vector.extract_strided_slice %140 {offsets = [8, 0], sizes = [8, 16], strides = [1, 1]} : vector<16x64xf32> to vector<8x16xf32>
    %143 = vector.extract_strided_slice %140 {offsets = [0, 16], sizes = [8, 16], strides = [1, 1]} : vector<16x64xf32> to vector<8x16xf32>
    %144 = vector.extract_strided_slice %140 {offsets = [8, 16], sizes = [8, 16], strides = [1, 1]} : vector<16x64xf32> to vector<8x16xf32>
    %145 = vector.extract_strided_slice %140 {offsets = [0, 32], sizes = [8, 16], strides = [1, 1]} : vector<16x64xf32> to vector<8x16xf32>
    %146 = vector.extract_strided_slice %140 {offsets = [8, 32], sizes = [8, 16], strides = [1, 1]} : vector<16x64xf32> to vector<8x16xf32>
    %147 = vector.extract_strided_slice %140 {offsets = [0, 48], sizes = [8, 16], strides = [1, 1]} : vector<16x64xf32> to vector<8x16xf32>
    %148 = vector.extract_strided_slice %140 {offsets = [8, 48], sizes = [8, 16], strides = [1, 1]} : vector<16x64xf32> to vector<8x16xf32>
    %149 = vector.shape_cast %141 : vector<8x16xf32> to vector<1x8x16xf32>
    %150 = vector.shape_cast %142 : vector<8x16xf32> to vector<1x8x16xf32>
    %151 = vector.shape_cast %143 : vector<8x16xf32> to vector<1x8x16xf32>
    %152 = vector.shape_cast %144 : vector<8x16xf32> to vector<1x8x16xf32>
    %153 = vector.shape_cast %145 : vector<8x16xf32> to vector<1x8x16xf32>
    %154 = vector.shape_cast %146 : vector<8x16xf32> to vector<1x8x16xf32>
    %155 = vector.shape_cast %147 : vector<8x16xf32> to vector<1x8x16xf32>
    %156 = vector.shape_cast %148 : vector<8x16xf32> to vector<1x8x16xf32>
    %157 = tpu.concatenate %149, %150, %151, %152, %153, %154, %155, %156 in 0 : vector<1x8x16xf32>, vector<1x8x16xf32>, vector<1x8x16xf32>, vector<1x8x16xf32>, vector<1x8x16xf32>, vector<1x8x16xf32>, vector<1x8x16xf32>, vector<1x8x16xf32> -> vector<8x8x16xf32>
    %158 = arith.truncf %157 : vector<8x8x16xf32> to vector<8x8x16xbf16>
    %159 = vector.broadcast %108 : vector<1x1xf32> to vector<16x64xf32>
    %160 = arith.divf %69, %159 : vector<16x64xf32>
    %161 = math.roundeven %160 : vector<16x64xf32>
    %cst_46 = arith.constant -8.000000e+00 : f32
    %cst_47 = arith.constant 7.000000e+00 : f32
    %162 = vector.broadcast %cst_46 : f32 to vector<16x64xf32>
    %163 = arith.maximumf %162, %161 : vector<16x64xf32>
    %164 = vector.broadcast %cst_47 : f32 to vector<16x64xf32>
    %165 = arith.minimumf %164, %163 : vector<16x64xf32>
    %166 = vector.extract_strided_slice %165 {offsets = [0, 0], sizes = [8, 16], strides = [1, 1]} : vector<16x64xf32> to vector<8x16xf32>
    %167 = vector.extract_strided_slice %165 {offsets = [8, 0], sizes = [8, 16], strides = [1, 1]} : vector<16x64xf32> to vector<8x16xf32>
    %168 = vector.extract_strided_slice %165 {offsets = [0, 16], sizes = [8, 16], strides = [1, 1]} : vector<16x64xf32> to vector<8x16xf32>
    %169 = vector.extract_strided_slice %165 {offsets = [8, 16], sizes = [8, 16], strides = [1, 1]} : vector<16x64xf32> to vector<8x16xf32>
    %170 = vector.extract_strided_slice %165 {offsets = [0, 32], sizes = [8, 16], strides = [1, 1]} : vector<16x64xf32> to vector<8x16xf32>
    %171 = vector.extract_strided_slice %165 {offsets = [8, 32], sizes = [8, 16], strides = [1, 1]} : vector<16x64xf32> to vector<8x16xf32>
    %172 = vector.extract_strided_slice %165 {offsets = [0, 48], sizes = [8, 16], strides = [1, 1]} : vector<16x64xf32> to vector<8x16xf32>
    %173 = vector.extract_strided_slice %165 {offsets = [8, 48], sizes = [8, 16], strides = [1, 1]} : vector<16x64xf32> to vector<8x16xf32>
    %174 = vector.shape_cast %166 : vector<8x16xf32> to vector<1x8x16xf32>
    %175 = vector.shape_cast %167 : vector<8x16xf32> to vector<1x8x16xf32>
    %176 = vector.shape_cast %168 : vector<8x16xf32> to vector<1x8x16xf32>
    %177 = vector.shape_cast %169 : vector<8x16xf32> to vector<1x8x16xf32>
    %178 = vector.shape_cast %170 : vector<8x16xf32> to vector<1x8x16xf32>
    %179 = vector.shape_cast %171 : vector<8x16xf32> to vector<1x8x16xf32>
    %180 = vector.shape_cast %172 : vector<8x16xf32> to vector<1x8x16xf32>
    %181 = vector.shape_cast %173 : vector<8x16xf32> to vector<1x8x16xf32>
    %182 = tpu.concatenate %174, %175, %176, %177, %178, %179, %180, %181 in 0 : vector<1x8x16xf32>, vector<1x8x16xf32>, vector<1x8x16xf32>, vector<1x8x16xf32>, vector<1x8x16xf32>, vector<1x8x16xf32>, vector<1x8x16xf32>, vector<1x8x16xf32> -> vector<8x8x16xf32>
    %183 = vector.shape_cast %108 : vector<1x1xf32> to vector<1x1x1xf32>
    %184 = vector.broadcast %183 : vector<1x1x1xf32> to vector<8x8x16xf32>
    %185 = arith.mulf %182, %184 : vector<8x8x16xf32>
    "tpu.trace_start"() <{level = 10 : i32, message = "bqd,bkd->bqk"}> : () -> ()
    %cst_48 = arith.constant dense<0.000000e+00> : vector<8x8x8xf32>
    %186 = tpu.matmul %133, %158, %cst_48 {dimension_numbers = #tpu.dot_dimension_numbers<[2], [2], [1], [1], [0, 0, 0, 1, 1, 1], [0], [0]>} : vector<8x8x16xbf16>, vector<8x8x16xbf16>, vector<8x8x8xf32> -> vector<8x8x8xf32>
    "tpu.trace_stop"() : () -> ()
    %187 = arith.mulf %82, %95 : vector<1x1xf32>
    %cst_49 = arith.constant 2.500000e-01 : f32
    %188 = vector.broadcast %cst_49 : f32 to vector<1x1xf32>
    %189 = arith.mulf %187, %188 : vector<1x1xf32>
    %190 = vector.shape_cast %189 : vector<1x1xf32> to vector<1x1x1xf32>
    %191 = vector.broadcast %190 : vector<1x1x1xf32> to vector<8x8x8xf32>
    %192 = arith.mulf %186, %191 : vector<8x8x8xf32>
    %cst_50 = arith.constant dense<0xFF800000> : vector<8x8xf32>
    %193 = vector.multi_reduction <maximumf>, %192, %cst_50 [2] : vector<8x8x8xf32> to vector<8x8xf32>
    %194 = vector.shape_cast %193 : vector<8x8xf32> to vector<8x8x1xf32>
    %195 = vector.broadcast %194 : vector<8x8x1xf32> to vector<8x8x8xf32>
    %196 = arith.subf %192, %195 : vector<8x8x8xf32>
    %197 = math.exp %196 : vector<8x8x8xf32>
    %cst_51 = arith.constant dense<0.000000e+00> : vector<8x8xf32>
    %198 = vector.multi_reduction <add>, %197, %cst_51 [2] : vector<8x8x8xf32> to vector<8x8xf32>
    %199 = vector.shape_cast %198 : vector<8x8xf32> to vector<8x8x1xf32>
    %200 = vector.broadcast %199 : vector<8x8x1xf32> to vector<8x8x8xf32>
    %201 = arith.divf %197, %200 : vector<8x8x8xf32>
    %cst_52 = arith.constant dense<0x7F800000> : vector<8x8xf32>
    %202 = vector.multi_reduction <minimumf>, %201, %cst_52 [2] : vector<8x8x8xf32> to vector<8x8xf32>
    %203 = vector.shape_cast %202 : vector<8x8xf32> to vector<8x8x1xf32>
    %cst_53 = arith.constant dense<0x7F800000> : vector<8x1xf32>
    %204 = vector.multi_reduction <minimumf>, %203, %cst_53 [1] : vector<8x8x1xf32> to vector<8x1xf32>
    %205 = vector.shape_cast %204 : vector<8x1xf32> to vector<8x1x1xf32>
    %cst_54 = arith.constant dense<0x7F800000> : vector<1x1xf32>
    %206 = vector.multi_reduction <minimumf>, %205, %cst_54 [0] : vector<8x1x1xf32> to vector<1x1xf32>
    %207 = vector.shape_cast %206 : vector<1x1xf32> to vector<1x1x1xf32>
    %208 = math.absf %201 : vector<8x8x8xf32>
    %cst_55 = arith.constant dense<0.000000e+00> : vector<8x8xf32>
    %209 = vector.multi_reduction <add>, %208, %cst_55 [2] : vector<8x8x8xf32> to vector<8x8xf32>
    %210 = vector.shape_cast %209 : vector<8x8xf32> to vector<8x8x1xf32>
    %cst_56 = arith.constant dense<0.000000e+00> : vector<8x1xf32>
    %211 = vector.multi_reduction <add>, %210, %cst_56 [1] : vector<8x8x1xf32> to vector<8x1xf32>
    %212 = vector.shape_cast %211 : vector<8x1xf32> to vector<8x1x1xf32>
    %cst_57 = arith.constant dense<0.000000e+00> : vector<1x1xf32>
    %213 = vector.multi_reduction <add>, %212, %cst_57 [0] : vector<8x1x1xf32> to vector<1x1xf32>
    %214 = vector.shape_cast %213 : vector<1x1xf32> to vector<1x1x1xf32>
    %cst_58 = arith.constant 5.120000e+02 : f32
    %215 = vector.broadcast %cst_58 : f32 to vector<1x1x1xf32>
    %216 = arith.divf %214, %215 : vector<1x1x1xf32>
    %cst_59 = arith.constant 4.000000e+00 : f32
    %217 = vector.broadcast %cst_59 : f32 to vector<1x1x1xf32>
    %218 = arith.mulf %217, %216 : vector<1x1x1xf32>
    %cst_60 = arith.constant 3.87298346 : f32
    %219 = vector.broadcast %cst_60 : f32 to vector<1x1x1xf32>
    %220 = arith.divf %218, %219 : vector<1x1x1xf32>
    %cst_61 = arith.constant 9.99999974E-6 : f32
    %221 = vector.broadcast %cst_61 : f32 to vector<1x1x1xf32>
    %222 = arith.maximumf %220, %221 : vector<1x1x1xf32>
    %223 = vector.broadcast %207 : vector<1x1x1xf32> to vector<8x8x8xf32>
    %224 = arith.subf %201, %223 : vector<8x8x8xf32>
    %225 = vector.broadcast %222 : vector<1x1x1xf32> to vector<8x8x8xf32>
    %226 = arith.divf %224, %225 : vector<8x8x8xf32>
    %227 = math.roundeven %226 : vector<8x8x8xf32>
    %cst_62 = arith.constant 0.000000e+00 : f32
    %cst_63 = arith.constant 1.500000e+01 : f32
    %228 = vector.broadcast %cst_62 : f32 to vector<8x8x8xf32>
    %229 = arith.maximumf %228, %227 : vector<8x8x8xf32>
    %230 = vector.broadcast %cst_63 : f32 to vector<8x8x8xf32>
    %231 = arith.minimumf %230, %229 : vector<8x8x8xf32>
    %232 = vector.broadcast %222 : vector<1x1x1xf32> to vector<8x8x8xf32>
    %233 = arith.mulf %231, %232 : vector<8x8x8xf32>
    %234 = vector.broadcast %207 : vector<1x1x1xf32> to vector<8x8x8xf32>
    %235 = arith.addf %233, %234 : vector<8x8x8xf32>
    "tpu.trace_start"() <{level = 10 : i32, message = "bqk,bkd->bqd"}> : () -> ()
    %cst_64 = arith.constant dense<0.000000e+00> : vector<8x8x16xf32>
    %236 = tpu.matmul %235, %185, %cst_64 {dimension_numbers = #tpu.dot_dimension_numbers<[2], [1], [1], [2], [0, 0, 0, 1, 1, 2], [0], [0]>} : vector<8x8x8xf32>, vector<8x8x16xf32>, vector<8x8x16xf32> -> vector<8x8x16xf32>
    "tpu.trace_stop"() : () -> ()
    %237 = vector.extract_strided_slice %236 {offsets = [0, 0, 0], sizes = [1, 8, 16], strides = [1, 1, 1]} : vector<8x8x16xf32> to vector<1x8x16xf32>
    %238 = vector.shape_cast %237 : vector<1x8x16xf32> to vector<8x16xf32>
    %239 = vector.extract_strided_slice %238 {offsets = [0, 0], sizes = [1, 16], strides = [1, 1]} : vector<8x16xf32> to vector<1x16xf32>
    %240 = vector.extract_strided_slice %238 {offsets = [1, 0], sizes = [1, 16], strides = [1, 1]} : vector<8x16xf32> to vector<1x16xf32>
    %241 = vector.extract_strided_slice %238 {offsets = [2, 0], sizes = [1, 16], strides = [1, 1]} : vector<8x16xf32> to vector<1x16xf32>
    %242 = vector.extract_strided_slice %238 {offsets = [3, 0], sizes = [1, 16], strides = [1, 1]} : vector<8x16xf32> to vector<1x16xf32>
    %243 = tpu.concatenate %239, %240, %241, %242 in 1 : vector<1x16xf32>, vector<1x16xf32>, vector<1x16xf32>, vector<1x16xf32> -> vector<1x64xf32>
    %244 = vector.extract_strided_slice %238 {offsets = [4, 0], sizes = [1, 16], strides = [1, 1]} : vector<8x16xf32> to vector<1x16xf32>
    %245 = vector.extract_strided_slice %238 {offsets = [5, 0], sizes = [1, 16], strides = [1, 1]} : vector<8x16xf32> to vector<1x16xf32>
    %246 = vector.extract_strided_slice %238 {offsets = [6, 0], sizes = [1, 16], strides = [1, 1]} : vector<8x16xf32> to vector<1x16xf32>
    %247 = vector.extract_strided_slice %238 {offsets = [7, 0], sizes = [1, 16], strides = [1, 1]} : vector<8x16xf32> to vector<1x16xf32>
    %248 = tpu.concatenate %244, %245, %246, %247 in 1 : vector<1x16xf32>, vector<1x16xf32>, vector<1x16xf32>, vector<1x16xf32> -> vector<1x64xf32>
    %249 = vector.extract_strided_slice %236 {offsets = [2, 0, 0], sizes = [1, 8, 16], strides = [1, 1, 1]} : vector<8x8x16xf32> to vector<1x8x16xf32>
    %250 = vector.shape_cast %249 : vector<1x8x16xf32> to vector<8x16xf32>
    %251 = vector.extract_strided_slice %250 {offsets = [0, 0], sizes = [1, 16], strides = [1, 1]} : vector<8x16xf32> to vector<1x16xf32>
    %252 = vector.extract_strided_slice %250 {offsets = [1, 0], sizes = [1, 16], strides = [1, 1]} : vector<8x16xf32> to vector<1x16xf32>
    %253 = vector.extract_strided_slice %250 {offsets = [2, 0], sizes = [1, 16], strides = [1, 1]} : vector<8x16xf32> to vector<1x16xf32>
    %254 = vector.extract_strided_slice %250 {offsets = [3, 0], sizes = [1, 16], strides = [1, 1]} : vector<8x16xf32> to vector<1x16xf32>
    %255 = tpu.concatenate %251, %252, %253, %254 in 1 : vector<1x16xf32>, vector<1x16xf32>, vector<1x16xf32>, vector<1x16xf32> -> vector<1x64xf32>
    %256 = vector.extract_strided_slice %250 {offsets = [4, 0], sizes = [1, 16], strides = [1, 1]} : vector<8x16xf32> to vector<1x16xf32>
    %257 = vector.extract_strided_slice %250 {offsets = [5, 0], sizes = [1, 16], strides = [1, 1]} : vector<8x16xf32> to vector<1x16xf32>
    %258 = vector.extract_strided_slice %250 {offsets = [6, 0], sizes = [1, 16], strides = [1, 1]} : vector<8x16xf32> to vector<1x16xf32>
    %259 = vector.extract_strided_slice %250 {offsets = [7, 0], sizes = [1, 16], strides = [1, 1]} : vector<8x16xf32> to vector<1x16xf32>
    %260 = tpu.concatenate %256, %257, %258, %259 in 1 : vector<1x16xf32>, vector<1x16xf32>, vector<1x16xf32>, vector<1x16xf32> -> vector<1x64xf32>
    %261 = vector.extract_strided_slice %236 {offsets = [4, 0, 0], sizes = [1, 8, 16], strides = [1, 1, 1]} : vector<8x8x16xf32> to vector<1x8x16xf32>
    %262 = vector.shape_cast %261 : vector<1x8x16xf32> to vector<8x16xf32>
    %263 = vector.extract_strided_slice %262 {offsets = [0, 0], sizes = [1, 16], strides = [1, 1]} : vector<8x16xf32> to vector<1x16xf32>
    %264 = vector.extract_strided_slice %262 {offsets = [1, 0], sizes = [1, 16], strides = [1, 1]} : vector<8x16xf32> to vector<1x16xf32>
    %265 = vector.extract_strided_slice %262 {offsets = [2, 0], sizes = [1, 16], strides = [1, 1]} : vector<8x16xf32> to vector<1x16xf32>
    %266 = vector.extract_strided_slice %262 {offsets = [3, 0], sizes = [1, 16], strides = [1, 1]} : vector<8x16xf32> to vector<1x16xf32>
    %267 = tpu.concatenate %263, %264, %265, %266 in 1 : vector<1x16xf32>, vector<1x16xf32>, vector<1x16xf32>, vector<1x16xf32> -> vector<1x64xf32>
    %268 = vector.extract_strided_slice %262 {offsets = [4, 0], sizes = [1, 16], strides = [1, 1]} : vector<8x16xf32> to vector<1x16xf32>
    %269 = vector.extract_strided_slice %262 {offsets = [5, 0], sizes = [1, 16], strides = [1, 1]} : vector<8x16xf32> to vector<1x16xf32>
    %270 = vector.extract_strided_slice %262 {offsets = [6, 0], sizes = [1, 16], strides = [1, 1]} : vector<8x16xf32> to vector<1x16xf32>
    %271 = vector.extract_strided_slice %262 {offsets = [7, 0], sizes = [1, 16], strides = [1, 1]} : vector<8x16xf32> to vector<1x16xf32>
    %272 = tpu.concatenate %268, %269, %270, %271 in 1 : vector<1x16xf32>, vector<1x16xf32>, vector<1x16xf32>, vector<1x16xf32> -> vector<1x64xf32>
    %273 = vector.extract_strided_slice %236 {offsets = [6, 0, 0], sizes = [1, 8, 16], strides = [1, 1, 1]} : vector<8x8x16xf32> to vector<1x8x16xf32>
    %274 = vector.shape_cast %273 : vector<1x8x16xf32> to vector<8x16xf32>
    %275 = vector.extract_strided_slice %274 {offsets = [0, 0], sizes = [1, 16], strides = [1, 1]} : vector<8x16xf32> to vector<1x16xf32>
    %276 = vector.extract_strided_slice %274 {offsets = [1, 0], sizes = [1, 16], strides = [1, 1]} : vector<8x16xf32> to vector<1x16xf32>
    %277 = vector.extract_strided_slice %274 {offsets = [2, 0], sizes = [1, 16], strides = [1, 1]} : vector<8x16xf32> to vector<1x16xf32>
    %278 = vector.extract_strided_slice %274 {offsets = [3, 0], sizes = [1, 16], strides = [1, 1]} : vector<8x16xf32> to vector<1x16xf32>
    %279 = tpu.concatenate %275, %276, %277, %278 in 1 : vector<1x16xf32>, vector<1x16xf32>, vector<1x16xf32>, vector<1x16xf32> -> vector<1x64xf32>
    %280 = vector.extract_strided_slice %274 {offsets = [4, 0], sizes = [1, 16], strides = [1, 1]} : vector<8x16xf32> to vector<1x16xf32>
    %281 = vector.extract_strided_slice %274 {offsets = [5, 0], sizes = [1, 16], strides = [1, 1]} : vector<8x16xf32> to vector<1x16xf32>
    %282 = vector.extract_strided_slice %274 {offsets = [6, 0], sizes = [1, 16], strides = [1, 1]} : vector<8x16xf32> to vector<1x16xf32>
    %283 = vector.extract_strided_slice %274 {offsets = [7, 0], sizes = [1, 16], strides = [1, 1]} : vector<8x16xf32> to vector<1x16xf32>
    %284 = tpu.concatenate %280, %281, %282, %283 in 1 : vector<1x16xf32>, vector<1x16xf32>, vector<1x16xf32>, vector<1x16xf32> -> vector<1x64xf32>
    %285 = vector.extract_strided_slice %236 {offsets = [1, 0, 0], sizes = [1, 8, 16], strides = [1, 1, 1]} : vector<8x8x16xf32> to vector<1x8x16xf32>
    %286 = vector.shape_cast %285 : vector<1x8x16xf32> to vector<8x16xf32>
    %287 = vector.extract_strided_slice %286 {offsets = [0, 0], sizes = [1, 16], strides = [1, 1]} : vector<8x16xf32> to vector<1x16xf32>
    %288 = vector.extract_strided_slice %286 {offsets = [1, 0], sizes = [1, 16], strides = [1, 1]} : vector<8x16xf32> to vector<1x16xf32>
    %289 = vector.extract_strided_slice %286 {offsets = [2, 0], sizes = [1, 16], strides = [1, 1]} : vector<8x16xf32> to vector<1x16xf32>
    %290 = vector.extract_strided_slice %286 {offsets = [3, 0], sizes = [1, 16], strides = [1, 1]} : vector<8x16xf32> to vector<1x16xf32>
    %291 = tpu.concatenate %287, %288, %289, %290 in 1 : vector<1x16xf32>, vector<1x16xf32>, vector<1x16xf32>, vector<1x16xf32> -> vector<1x64xf32>
    %292 = vector.extract_strided_slice %286 {offsets = [4, 0], sizes = [1, 16], strides = [1, 1]} : vector<8x16xf32> to vector<1x16xf32>
    %293 = vector.extract_strided_slice %286 {offsets = [5, 0], sizes = [1, 16], strides = [1, 1]} : vector<8x16xf32> to vector<1x16xf32>
    %294 = vector.extract_strided_slice %286 {offsets = [6, 0], sizes = [1, 16], strides = [1, 1]} : vector<8x16xf32> to vector<1x16xf32>
    %295 = vector.extract_strided_slice %286 {offsets = [7, 0], sizes = [1, 16], strides = [1, 1]} : vector<8x16xf32> to vector<1x16xf32>
    %296 = tpu.concatenate %292, %293, %294, %295 in 1 : vector<1x16xf32>, vector<1x16xf32>, vector<1x16xf32>, vector<1x16xf32> -> vector<1x64xf32>
    %297 = vector.extract_strided_slice %236 {offsets = [3, 0, 0], sizes = [1, 8, 16], strides = [1, 1, 1]} : vector<8x8x16xf32> to vector<1x8x16xf32>
    %298 = vector.shape_cast %297 : vector<1x8x16xf32> to vector<8x16xf32>
    %299 = vector.extract_strided_slice %298 {offsets = [0, 0], sizes = [1, 16], strides = [1, 1]} : vector<8x16xf32> to vector<1x16xf32>
    %300 = vector.extract_strided_slice %298 {offsets = [1, 0], sizes = [1, 16], strides = [1, 1]} : vector<8x16xf32> to vector<1x16xf32>
    %301 = vector.extract_strided_slice %298 {offsets = [2, 0], sizes = [1, 16], strides = [1, 1]} : vector<8x16xf32> to vector<1x16xf32>
    %302 = vector.extract_strided_slice %298 {offsets = [3, 0], sizes = [1, 16], strides = [1, 1]} : vector<8x16xf32> to vector<1x16xf32>
    %303 = tpu.concatenate %299, %300, %301, %302 in 1 : vector<1x16xf32>, vector<1x16xf32>, vector<1x16xf32>, vector<1x16xf32> -> vector<1x64xf32>
    %304 = vector.extract_strided_slice %298 {offsets = [4, 0], sizes = [1, 16], strides = [1, 1]} : vector<8x16xf32> to vector<1x16xf32>
    %305 = vector.extract_strided_slice %298 {offsets = [5, 0], sizes = [1, 16], strides = [1, 1]} : vector<8x16xf32> to vector<1x16xf32>
    %306 = vector.extract_strided_slice %298 {offsets = [6, 0], sizes = [1, 16], strides = [1, 1]} : vector<8x16xf32> to vector<1x16xf32>
    %307 = vector.extract_strided_slice %298 {offsets = [7, 0], sizes = [1, 16], strides = [1, 1]} : vector<8x16xf32> to vector<1x16xf32>
    %308 = tpu.concatenate %304, %305, %306, %307 in 1 : vector<1x16xf32>, vector<1x16xf32>, vector<1x16xf32>, vector<1x16xf32> -> vector<1x64xf32>
    %309 = vector.extract_strided_slice %236 {offsets = [5, 0, 0], sizes = [1, 8, 16], strides = [1, 1, 1]} : vector<8x8x16xf32> to vector<1x8x16xf32>
    %310 = vector.shape_cast %309 : vector<1x8x16xf32> to vector<8x16xf32>
    %311 = vector.extract_strided_slice %310 {offsets = [0, 0], sizes = [1, 16], strides = [1, 1]} : vector<8x16xf32> to vector<1x16xf32>
    %312 = vector.extract_strided_slice %310 {offsets = [1, 0], sizes = [1, 16], strides = [1, 1]} : vector<8x16xf32> to vector<1x16xf32>
    %313 = vector.extract_strided_slice %310 {offsets = [2, 0], sizes = [1, 16], strides = [1, 1]} : vector<8x16xf32> to vector<1x16xf32>
    %314 = vector.extract_strided_slice %310 {offsets = [3, 0], sizes = [1, 16], strides = [1, 1]} : vector<8x16xf32> to vector<1x16xf32>
    %315 = tpu.concatenate %311, %312, %313, %314 in 1 : vector<1x16xf32>, vector<1x16xf32>, vector<1x16xf32>, vector<1x16xf32> -> vector<1x64xf32>
    %316 = vector.extract_strided_slice %310 {offsets = [4, 0], sizes = [1, 16], strides = [1, 1]} : vector<8x16xf32> to vector<1x16xf32>
    %317 = vector.extract_strided_slice %310 {offsets = [5, 0], sizes = [1, 16], strides = [1, 1]} : vector<8x16xf32> to vector<1x16xf32>
    %318 = vector.extract_strided_slice %310 {offsets = [6, 0], sizes = [1, 16], strides = [1, 1]} : vector<8x16xf32> to vector<1x16xf32>
    %319 = vector.extract_strided_slice %310 {offsets = [7, 0], sizes = [1, 16], strides = [1, 1]} : vector<8x16xf32> to vector<1x16xf32>
    %320 = tpu.concatenate %316, %317, %318, %319 in 1 : vector<1x16xf32>, vector<1x16xf32>, vector<1x16xf32>, vector<1x16xf32> -> vector<1x64xf32>
    %321 = vector.extract_strided_slice %236 {offsets = [7, 0, 0], sizes = [1, 8, 16], strides = [1, 1, 1]} : vector<8x8x16xf32> to vector<1x8x16xf32>
    %322 = vector.shape_cast %321 : vector<1x8x16xf32> to vector<8x16xf32>
    %323 = vector.extract_strided_slice %322 {offsets = [0, 0], sizes = [1, 16], strides = [1, 1]} : vector<8x16xf32> to vector<1x16xf32>
    %324 = vector.extract_strided_slice %322 {offsets = [1, 0], sizes = [1, 16], strides = [1, 1]} : vector<8x16xf32> to vector<1x16xf32>
    %325 = vector.extract_strided_slice %322 {offsets = [2, 0], sizes = [1, 16], strides = [1, 1]} : vector<8x16xf32> to vector<1x16xf32>
    %326 = vector.extract_strided_slice %322 {offsets = [3, 0], sizes = [1, 16], strides = [1, 1]} : vector<8x16xf32> to vector<1x16xf32>
    %327 = tpu.concatenate %323, %324, %325, %326 in 1 : vector<1x16xf32>, vector<1x16xf32>, vector<1x16xf32>, vector<1x16xf32> -> vector<1x64xf32>
    %328 = vector.extract_strided_slice %322 {offsets = [4, 0], sizes = [1, 16], strides = [1, 1]} : vector<8x16xf32> to vector<1x16xf32>
    %329 = vector.extract_strided_slice %322 {offsets = [5, 0], sizes = [1, 16], strides = [1, 1]} : vector<8x16xf32> to vector<1x16xf32>
    %330 = vector.extract_strided_slice %322 {offsets = [6, 0], sizes = [1, 16], strides = [1, 1]} : vector<8x16xf32> to vector<1x16xf32>
    %331 = vector.extract_strided_slice %322 {offsets = [7, 0], sizes = [1, 16], strides = [1, 1]} : vector<8x16xf32> to vector<1x16xf32>
    %332 = tpu.concatenate %328, %329, %330, %331 in 1 : vector<1x16xf32>, vector<1x16xf32>, vector<1x16xf32>, vector<1x16xf32> -> vector<1x64xf32>
    %333 = tpu.concatenate %243, %248, %255, %260, %267, %272, %279, %284, %291, %296, %303, %308, %315, %320, %327, %332 in 0 : vector<1x64xf32>, vector<1x64xf32>, vector<1x64xf32>, vector<1x64xf32>, vector<1x64xf32>, vector<1x64xf32>, vector<1x64xf32>, vector<1x64xf32>, vector<1x64xf32>, vector<1x64xf32>, vector<1x64xf32>, vector<1x64xf32>, vector<1x64xf32>, vector<1x64xf32>, vector<1x64xf32>, vector<1x64xf32> -> vector<16x64xf32>
    %334 = math.absf %333 : vector<16x64xf32>
    %cst_65 = arith.constant dense<0.000000e+00> : vector<16xf32>
    %335 = vector.multi_reduction <add>, %334, %cst_65 [1] : vector<16x64xf32> to vector<16xf32>
    %336 = vector.shape_cast %335 : vector<16xf32> to vector<16x1xf32>
    %cst_66 = arith.constant dense<0.000000e+00> : vector<1xf32>
    %337 = vector.multi_reduction <add>, %336, %cst_66 [0] : vector<16x1xf32> to vector<1xf32>
    %338 = vector.shape_cast %337 : vector<1xf32> to vector<1x1xf32>
    %cst_67 = arith.constant 1.024000e+03 : f32
    %339 = vector.broadcast %cst_67 : f32 to vector<1x1xf32>
    %340 = arith.divf %338, %339 : vector<1x1xf32>
    %cst_68 = arith.constant 2.000000e+00 : f32
    %341 = vector.broadcast %cst_68 : f32 to vector<1x1xf32>
    %342 = arith.mulf %341, %340 : vector<1x1xf32>
    %cst_69 = arith.constant 11.2694273 : f32
    %343 = vector.broadcast %cst_69 : f32 to vector<1x1xf32>
    %344 = arith.divf %342, %343 : vector<1x1xf32>
    %cst_70 = arith.constant 9.99999974E-6 : f32
    %345 = vector.broadcast %cst_70 : f32 to vector<1x1xf32>
    %346 = arith.maximumf %344, %345 : vector<1x1xf32>
    %347 = vector.broadcast %346 : vector<1x1xf32> to vector<16x64xf32>
    %348 = arith.divf %333, %347 : vector<16x64xf32>
    %349 = math.roundeven %348 : vector<16x64xf32>
    %cst_71 = arith.constant -1.280000e+02 : f32
    %cst_72 = arith.constant 1.270000e+02 : f32
    %350 = vector.broadcast %cst_71 : f32 to vector<16x64xf32>
    %351 = arith.maximumf %350, %349 : vector<16x64xf32>
    %352 = vector.broadcast %cst_72 : f32 to vector<16x64xf32>
    %353 = arith.minimumf %352, %351 : vector<16x64xf32>
    %354 = arith.truncf %353 : vector<16x64xf32> to vector<16x64xbf16>
    %cst_73 = arith.constant dense<0.000000e+00> : vector<16x64xf32>
    %355 = tpu.matmul %354, %2, %cst_73 {dimension_numbers = #tpu.dot_dimension_numbers<[1], [0], [0], [1], [0, 0, 1, 1], [], []>} : vector<16x64xbf16>, vector<64x64xbf16>, vector<16x64xf32> -> vector<16x64xf32>
    %356 = arith.mulf %346, %20 : vector<1x1xf32>
    %357 = vector.broadcast %356 : vector<1x1xf32> to vector<16x64xf32>
    %358 = arith.mulf %355, %357 : vector<16x64xf32>
    %359 = arith.addf %29, %358 : vector<16x64xf32>
    %cst_74 = arith.constant dense<0.000000e+00> : vector<16xf32>
    %360 = vector.multi_reduction <add>, %359, %cst_74 [1] : vector<16x64xf32> to vector<16xf32>
    %361 = vector.shape_cast %360 : vector<16xf32> to vector<16x1xf32>
    %cst_75 = arith.constant 6.400000e+01 : f32
    %362 = vector.broadcast %cst_75 : f32 to vector<16x1xf32>
    %363 = arith.divf %361, %362 : vector<16x1xf32>
    %364 = vector.broadcast %363 : vector<16x1xf32> to vector<16x64xf32>
    %365 = arith.subf %359, %364 : vector<16x64xf32>
    %366 = arith.mulf %365, %365 : vector<16x64xf32>
    %cst_76 = arith.constant dense<0.000000e+00> : vector<16xf32>
    %367 = vector.multi_reduction <add>, %366, %cst_76 [1] : vector<16x64xf32> to vector<16xf32>
    %368 = vector.shape_cast %367 : vector<16xf32> to vector<16x1xf32>
    %cst_77 = arith.constant 6.400000e+01 : f32
    %369 = vector.broadcast %cst_77 : f32 to vector<16x1xf32>
    %370 = arith.divf %368, %369 : vector<16x1xf32>
    %cst_78 = arith.constant 9.99999974E-6 : f32
    %371 = vector.broadcast %cst_78 : f32 to vector<16x1xf32>
    %372 = arith.addf %370, %371 : vector<16x1xf32>
    %373 = math.rsqrt %372 : vector<16x1xf32>
    %374 = vector.broadcast %373 : vector<16x1xf32> to vector<16x64xf32>
    %375 = arith.mulf %365, %374 : vector<16x64xf32>
    %376 = vector.broadcast %7 : vector<1x64xf32> to vector<16x64xf32>
    %377 = arith.mulf %375, %376 : vector<16x64xf32>
    %378 = vector.broadcast %8 : vector<1x64xf32> to vector<16x64xf32>
    %379 = arith.addf %377, %378 : vector<16x64xf32>
    %380 = math.absf %379 : vector<16x64xf32>
    %cst_79 = arith.constant dense<0.000000e+00> : vector<16xf32>
    %381 = vector.multi_reduction <add>, %380, %cst_79 [1] : vector<16x64xf32> to vector<16xf32>
    %382 = vector.shape_cast %381 : vector<16xf32> to vector<16x1xf32>
    %cst_80 = arith.constant dense<0.000000e+00> : vector<1xf32>
    %383 = vector.multi_reduction <add>, %382, %cst_80 [0] : vector<16x1xf32> to vector<1xf32>
    %384 = vector.shape_cast %383 : vector<1xf32> to vector<1x1xf32>
    %cst_81 = arith.constant 1.024000e+03 : f32
    %385 = vector.broadcast %cst_81 : f32 to vector<1x1xf32>
    %386 = arith.divf %384, %385 : vector<1x1xf32>
    %cst_82 = arith.constant 2.000000e+00 : f32
    %387 = vector.broadcast %cst_82 : f32 to vector<1x1xf32>
    %388 = arith.mulf %387, %386 : vector<1x1xf32>
    %cst_83 = arith.constant 11.2694273 : f32
    %389 = vector.broadcast %cst_83 : f32 to vector<1x1xf32>
    %390 = arith.divf %388, %389 : vector<1x1xf32>
    %cst_84 = arith.constant 9.99999974E-6 : f32
    %391 = vector.broadcast %cst_84 : f32 to vector<1x1xf32>
    %392 = arith.maximumf %390, %391 : vector<1x1xf32>
    %393 = vector.broadcast %392 : vector<1x1xf32> to vector<16x64xf32>
    %394 = arith.divf %379, %393 : vector<16x64xf32>
    %395 = math.roundeven %394 : vector<16x64xf32>
    %cst_85 = arith.constant -1.280000e+02 : f32
    %cst_86 = arith.constant 1.270000e+02 : f32
    %396 = vector.broadcast %cst_85 : f32 to vector<16x64xf32>
    %397 = arith.maximumf %396, %395 : vector<16x64xf32>
    %398 = vector.broadcast %cst_86 : f32 to vector<16x64xf32>
    %399 = arith.minimumf %398, %397 : vector<16x64xf32>
    %400 = arith.truncf %399 : vector<16x64xf32> to vector<16x64xbf16>
    %cst_87 = arith.constant dense<0.000000e+00> : vector<16x128xf32>
    %401 = tpu.matmul %400, %3, %cst_87 {dimension_numbers = #tpu.dot_dimension_numbers<[1], [0], [0], [1], [0, 0, 1, 1], [], []>} : vector<16x64xbf16>, vector<64x128xbf16>, vector<16x128xf32> -> vector<16x128xf32>
    %402 = arith.mulf %392, %21 : vector<1x1xf32>
    %403 = vector.broadcast %402 : vector<1x1xf32> to vector<16x128xf32>
    %404 = arith.mulf %401, %403 : vector<16x128xf32>
    %cst_88 = arith.constant 0.000000e+00 : f32
    %405 = vector.broadcast %cst_88 : f32 to vector<16x128xf32>
    %406 = arith.maximumf %404, %405 : vector<16x128xf32>
    %407 = math.absf %406 : vector<16x128xf32>
    %cst_89 = arith.constant dense<0.000000e+00> : vector<16xf32>
    %408 = vector.multi_reduction <add>, %407, %cst_89 [1] : vector<16x128xf32> to vector<16xf32>
    %409 = vector.shape_cast %408 : vector<16xf32> to vector<16x1xf32>
    %cst_90 = arith.constant dense<0.000000e+00> : vector<1xf32>
    %410 = vector.multi_reduction <add>, %409, %cst_90 [0] : vector<16x1xf32> to vector<1xf32>
    %411 = vector.shape_cast %410 : vector<1xf32> to vector<1x1xf32>
    %cst_91 = arith.constant 2.048000e+03 : f32
    %412 = vector.broadcast %cst_91 : f32 to vector<1x1xf32>
    %413 = arith.divf %411, %412 : vector<1x1xf32>
    %cst_92 = arith.constant 2.000000e+00 : f32
    %414 = vector.broadcast %cst_92 : f32 to vector<1x1xf32>
    %415 = arith.mulf %414, %413 : vector<1x1xf32>
    %cst_93 = arith.constant 11.2694273 : f32
    %416 = vector.broadcast %cst_93 : f32 to vector<1x1xf32>
    %417 = arith.divf %415, %416 : vector<1x1xf32>
    %cst_94 = arith.constant 9.99999974E-6 : f32
    %418 = vector.broadcast %cst_94 : f32 to vector<1x1xf32>
    %419 = arith.maximumf %417, %418 : vector<1x1xf32>
    %420 = vector.broadcast %419 : vector<1x1xf32> to vector<16x128xf32>
    %421 = arith.divf %406, %420 : vector<16x128xf32>
    %422 = math.roundeven %421 : vector<16x128xf32>
    %cst_95 = arith.constant -1.280000e+02 : f32
    %cst_96 = arith.constant 1.270000e+02 : f32
    %423 = vector.broadcast %cst_95 : f32 to vector<16x128xf32>
    %424 = arith.maximumf %423, %422 : vector<16x128xf32>
    %425 = vector.broadcast %cst_96 : f32 to vector<16x128xf32>
    %426 = arith.minimumf %425, %424 : vector<16x128xf32>
    %427 = arith.truncf %426 : vector<16x128xf32> to vector<16x128xbf16>
    %cst_97 = arith.constant dense<0.000000e+00> : vector<16x64xf32>
    %428 = tpu.matmul %427, %4, %cst_97 {dimension_numbers = #tpu.dot_dimension_numbers<[1], [0], [0], [1], [0, 0, 1, 1], [], []>} : vector<16x128xbf16>, vector<128x64xbf16>, vector<16x64xf32> -> vector<16x64xf32>
    %429 = arith.mulf %419, %22 : vector<1x1xf32>
    %430 = vector.broadcast %429 : vector<1x1xf32> to vector<16x64xf32>
    %431 = arith.mulf %428, %430 : vector<16x64xf32>
    %432 = arith.addf %379, %431 : vector<16x64xf32>
    %cst_98 = arith.constant dense<0.000000e+00> : vector<16xf32>
    %433 = vector.multi_reduction <add>, %432, %cst_98 [1] : vector<16x64xf32> to vector<16xf32>
    %434 = vector.shape_cast %433 : vector<16xf32> to vector<16x1xf32>
    %cst_99 = arith.constant 6.400000e+01 : f32
    %435 = vector.broadcast %cst_99 : f32 to vector<16x1xf32>
    %436 = arith.divf %434, %435 : vector<16x1xf32>
    %437 = vector.broadcast %436 : vector<16x1xf32> to vector<16x64xf32>
    %438 = arith.subf %432, %437 : vector<16x64xf32>
    %439 = arith.mulf %438, %438 : vector<16x64xf32>
    %cst_100 = arith.constant dense<0.000000e+00> : vector<16xf32>
    %440 = vector.multi_reduction <add>, %439, %cst_100 [1] : vector<16x64xf32> to vector<16xf32>
    %441 = vector.shape_cast %440 : vector<16xf32> to vector<16x1xf32>
    %cst_101 = arith.constant 6.400000e+01 : f32
    %442 = vector.broadcast %cst_101 : f32 to vector<16x1xf32>
    %443 = arith.divf %441, %442 : vector<16x1xf32>
    %cst_102 = arith.constant 9.99999974E-6 : f32
    %444 = vector.broadcast %cst_102 : f32 to vector<16x1xf32>
    %445 = arith.addf %443, %444 : vector<16x1xf32>
    %446 = math.rsqrt %445 : vector<16x1xf32>
    %447 = vector.broadcast %446 : vector<16x1xf32> to vector<16x64xf32>
    %448 = arith.mulf %438, %447 : vector<16x64xf32>
    %449 = vector.broadcast %9 : vector<1x64xf32> to vector<16x64xf32>
    %450 = arith.mulf %448, %449 : vector<16x64xf32>
    %451 = vector.broadcast %10 : vector<1x64xf32> to vector<16x64xf32>
    %452 = arith.addf %450, %451 : vector<16x64xf32>
    %c0_i32 = arith.constant 0 : i32
    %c5_i32 = arith.constant 5 : i32
    %453 = arith.addi %c0_i32, %c5_i32 : i32
    %c1_i32 = arith.constant 1 : i32
    %454:2 = scf.for %arg10 = %c0_i32 to %453 step %c1_i32 iter_args(%arg11 = %452, %arg12 = %192) -> (vector<16x64xf32>, vector<8x8x8xf32>)  : i32 {
      %480 = vector.broadcast %42 : vector<1x1xf32> to vector<16x64xf32>
      %481 = arith.divf %arg11, %480 : vector<16x64xf32>
      %482 = math.roundeven %481 : vector<16x64xf32>
      %cst_108 = arith.constant -8.000000e+00 : f32
      %cst_109 = arith.constant 7.000000e+00 : f32
      %483 = vector.broadcast %cst_108 : f32 to vector<16x64xf32>
      %484 = arith.maximumf %483, %482 : vector<16x64xf32>
      %485 = vector.broadcast %cst_109 : f32 to vector<16x64xf32>
      %486 = arith.minimumf %485, %484 : vector<16x64xf32>
      %487 = arith.truncf %486 : vector<16x64xf32> to vector<16x64xbf16>
      %cst_110 = arith.constant dense<0.000000e+00> : vector<16x192xf32>
      %488 = tpu.matmul %487, %1, %cst_110 {dimension_numbers = #tpu.dot_dimension_numbers<[1], [0], [0], [1], [0, 0, 1, 1], [], []>} : vector<16x64xbf16>, vector<64x192xbf16>, vector<16x192xf32> -> vector<16x192xf32>
      %489 = vector.extract_strided_slice %488 {offsets = [0, 0], sizes = [16, 64], strides = [1, 1]} : vector<16x192xf32> to vector<16x64xf32>
      %490 = arith.mulf %42, %17 : vector<1x1xf32>
      %491 = vector.broadcast %490 : vector<1x1xf32> to vector<16x64xf32>
      %492 = arith.mulf %489, %491 : vector<16x64xf32>
      %493 = vector.broadcast %12 : vector<1x64xf32> to vector<16x64xf32>
      %494 = arith.addf %492, %493 : vector<16x64xf32>
      %495 = vector.extract_strided_slice %488 {offsets = [0, 64], sizes = [16, 64], strides = [1, 1]} : vector<16x192xf32> to vector<16x64xf32>
      %496 = arith.mulf %42, %18 : vector<1x1xf32>
      %497 = vector.broadcast %496 : vector<1x1xf32> to vector<16x64xf32>
      %498 = arith.mulf %495, %497 : vector<16x64xf32>
      %499 = vector.broadcast %13 : vector<1x64xf32> to vector<16x64xf32>
      %500 = arith.addf %498, %499 : vector<16x64xf32>
      %501 = vector.extract_strided_slice %488 {offsets = [0, 128], sizes = [16, 64], strides = [1, 1]} : vector<16x192xf32> to vector<16x64xf32>
      %502 = arith.mulf %42, %19 : vector<1x1xf32>
      %503 = vector.broadcast %502 : vector<1x1xf32> to vector<16x64xf32>
      %504 = arith.mulf %501, %503 : vector<16x64xf32>
      %505 = vector.broadcast %14 : vector<1x64xf32> to vector<16x64xf32>
      %506 = arith.addf %504, %505 : vector<16x64xf32>
      %507 = vector.broadcast %82 : vector<1x1xf32> to vector<16x64xf32>
      %508 = arith.divf %494, %507 : vector<16x64xf32>
      %509 = math.roundeven %508 : vector<16x64xf32>
      %cst_111 = arith.constant -8.000000e+00 : f32
      %cst_112 = arith.constant 7.000000e+00 : f32
      %510 = vector.broadcast %cst_111 : f32 to vector<16x64xf32>
      %511 = arith.maximumf %510, %509 : vector<16x64xf32>
      %512 = vector.broadcast %cst_112 : f32 to vector<16x64xf32>
      %513 = arith.minimumf %512, %511 : vector<16x64xf32>
      %514 = vector.extract_strided_slice %513 {offsets = [0, 0], sizes = [8, 16], strides = [1, 1]} : vector<16x64xf32> to vector<8x16xf32>
      %515 = vector.extract_strided_slice %513 {offsets = [8, 0], sizes = [8, 16], strides = [1, 1]} : vector<16x64xf32> to vector<8x16xf32>
      %516 = vector.extract_strided_slice %513 {offsets = [0, 16], sizes = [8, 16], strides = [1, 1]} : vector<16x64xf32> to vector<8x16xf32>
      %517 = vector.extract_strided_slice %513 {offsets = [8, 16], sizes = [8, 16], strides = [1, 1]} : vector<16x64xf32> to vector<8x16xf32>
      %518 = vector.extract_strided_slice %513 {offsets = [0, 32], sizes = [8, 16], strides = [1, 1]} : vector<16x64xf32> to vector<8x16xf32>
      %519 = vector.extract_strided_slice %513 {offsets = [8, 32], sizes = [8, 16], strides = [1, 1]} : vector<16x64xf32> to vector<8x16xf32>
      %520 = vector.extract_strided_slice %513 {offsets = [0, 48], sizes = [8, 16], strides = [1, 1]} : vector<16x64xf32> to vector<8x16xf32>
      %521 = vector.extract_strided_slice %513 {offsets = [8, 48], sizes = [8, 16], strides = [1, 1]} : vector<16x64xf32> to vector<8x16xf32>
      %522 = vector.shape_cast %514 : vector<8x16xf32> to vector<1x8x16xf32>
      %523 = vector.shape_cast %515 : vector<8x16xf32> to vector<1x8x16xf32>
      %524 = vector.shape_cast %516 : vector<8x16xf32> to vector<1x8x16xf32>
      %525 = vector.shape_cast %517 : vector<8x16xf32> to vector<1x8x16xf32>
      %526 = vector.shape_cast %518 : vector<8x16xf32> to vector<1x8x16xf32>
      %527 = vector.shape_cast %519 : vector<8x16xf32> to vector<1x8x16xf32>
      %528 = vector.shape_cast %520 : vector<8x16xf32> to vector<1x8x16xf32>
      %529 = vector.shape_cast %521 : vector<8x16xf32> to vector<1x8x16xf32>
      %530 = tpu.concatenate %522, %523, %524, %525, %526, %527, %528, %529 in 0 : vector<1x8x16xf32>, vector<1x8x16xf32>, vector<1x8x16xf32>, vector<1x8x16xf32>, vector<1x8x16xf32>, vector<1x8x16xf32>, vector<1x8x16xf32>, vector<1x8x16xf32> -> vector<8x8x16xf32>
      %531 = arith.truncf %530 : vector<8x8x16xf32> to vector<8x8x16xbf16>
      %532 = vector.broadcast %95 : vector<1x1xf32> to vector<16x64xf32>
      %533 = arith.divf %500, %532 : vector<16x64xf32>
      %534 = math.roundeven %533 : vector<16x64xf32>
      %cst_113 = arith.constant -8.000000e+00 : f32
      %cst_114 = arith.constant 7.000000e+00 : f32
      %535 = vector.broadcast %cst_113 : f32 to vector<16x64xf32>
      %536 = arith.maximumf %535, %534 : vector<16x64xf32>
      %537 = vector.broadcast %cst_114 : f32 to vector<16x64xf32>
      %538 = arith.minimumf %537, %536 : vector<16x64xf32>
      %539 = vector.extract_strided_slice %538 {offsets = [0, 0], sizes = [8, 16], strides = [1, 1]} : vector<16x64xf32> to vector<8x16xf32>
      %540 = vector.extract_strided_slice %538 {offsets = [8, 0], sizes = [8, 16], strides = [1, 1]} : vector<16x64xf32> to vector<8x16xf32>
      %541 = vector.extract_strided_slice %538 {offsets = [0, 16], sizes = [8, 16], strides = [1, 1]} : vector<16x64xf32> to vector<8x16xf32>
      %542 = vector.extract_strided_slice %538 {offsets = [8, 16], sizes = [8, 16], strides = [1, 1]} : vector<16x64xf32> to vector<8x16xf32>
      %543 = vector.extract_strided_slice %538 {offsets = [0, 32], sizes = [8, 16], strides = [1, 1]} : vector<16x64xf32> to vector<8x16xf32>
      %544 = vector.extract_strided_slice %538 {offsets = [8, 32], sizes = [8, 16], strides = [1, 1]} : vector<16x64xf32> to vector<8x16xf32>
      %545 = vector.extract_strided_slice %538 {offsets = [0, 48], sizes = [8, 16], strides = [1, 1]} : vector<16x64xf32> to vector<8x16xf32>
      %546 = vector.extract_strided_slice %538 {offsets = [8, 48], sizes = [8, 16], strides = [1, 1]} : vector<16x64xf32> to vector<8x16xf32>
      %547 = vector.shape_cast %539 : vector<8x16xf32> to vector<1x8x16xf32>
      %548 = vector.shape_cast %540 : vector<8x16xf32> to vector<1x8x16xf32>
      %549 = vector.shape_cast %541 : vector<8x16xf32> to vector<1x8x16xf32>
      %550 = vector.shape_cast %542 : vector<8x16xf32> to vector<1x8x16xf32>
      %551 = vector.shape_cast %543 : vector<8x16xf32> to vector<1x8x16xf32>
      %552 = vector.shape_cast %544 : vector<8x16xf32> to vector<1x8x16xf32>
      %553 = vector.shape_cast %545 : vector<8x16xf32> to vector<1x8x16xf32>
      %554 = vector.shape_cast %546 : vector<8x16xf32> to vector<1x8x16xf32>
      %555 = tpu.concatenate %547, %548, %549, %550, %551, %552, %553, %554 in 0 : vector<1x8x16xf32>, vector<1x8x16xf32>, vector<1x8x16xf32>, vector<1x8x16xf32>, vector<1x8x16xf32>, vector<1x8x16xf32>, vector<1x8x16xf32>, vector<1x8x16xf32> -> vector<8x8x16xf32>
      %556 = arith.truncf %555 : vector<8x8x16xf32> to vector<8x8x16xbf16>
      %557 = vector.broadcast %108 : vector<1x1xf32> to vector<16x64xf32>
      %558 = arith.divf %506, %557 : vector<16x64xf32>
      %559 = math.roundeven %558 : vector<16x64xf32>
      %cst_115 = arith.constant -8.000000e+00 : f32
      %cst_116 = arith.constant 7.000000e+00 : f32
      %560 = vector.broadcast %cst_115 : f32 to vector<16x64xf32>
      %561 = arith.maximumf %560, %559 : vector<16x64xf32>
      %562 = vector.broadcast %cst_116 : f32 to vector<16x64xf32>
      %563 = arith.minimumf %562, %561 : vector<16x64xf32>
      %564 = vector.extract_strided_slice %563 {offsets = [0, 0], sizes = [8, 16], strides = [1, 1]} : vector<16x64xf32> to vector<8x16xf32>
      %565 = vector.extract_strided_slice %563 {offsets = [8, 0], sizes = [8, 16], strides = [1, 1]} : vector<16x64xf32> to vector<8x16xf32>
      %566 = vector.extract_strided_slice %563 {offsets = [0, 16], sizes = [8, 16], strides = [1, 1]} : vector<16x64xf32> to vector<8x16xf32>
      %567 = vector.extract_strided_slice %563 {offsets = [8, 16], sizes = [8, 16], strides = [1, 1]} : vector<16x64xf32> to vector<8x16xf32>
      %568 = vector.extract_strided_slice %563 {offsets = [0, 32], sizes = [8, 16], strides = [1, 1]} : vector<16x64xf32> to vector<8x16xf32>
      %569 = vector.extract_strided_slice %563 {offsets = [8, 32], sizes = [8, 16], strides = [1, 1]} : vector<16x64xf32> to vector<8x16xf32>
      %570 = vector.extract_strided_slice %563 {offsets = [0, 48], sizes = [8, 16], strides = [1, 1]} : vector<16x64xf32> to vector<8x16xf32>
      %571 = vector.extract_strided_slice %563 {offsets = [8, 48], sizes = [8, 16], strides = [1, 1]} : vector<16x64xf32> to vector<8x16xf32>
      %572 = vector.shape_cast %564 : vector<8x16xf32> to vector<1x8x16xf32>
      %573 = vector.shape_cast %565 : vector<8x16xf32> to vector<1x8x16xf32>
      %574 = vector.shape_cast %566 : vector<8x16xf32> to vector<1x8x16xf32>
      %575 = vector.shape_cast %567 : vector<8x16xf32> to vector<1x8x16xf32>
      %576 = vector.shape_cast %568 : vector<8x16xf32> to vector<1x8x16xf32>
      %577 = vector.shape_cast %569 : vector<8x16xf32> to vector<1x8x16xf32>
      %578 = vector.shape_cast %570 : vector<8x16xf32> to vector<1x8x16xf32>
      %579 = vector.shape_cast %571 : vector<8x16xf32> to vector<1x8x16xf32>
      %580 = tpu.concatenate %572, %573, %574, %575, %576, %577, %578, %579 in 0 : vector<1x8x16xf32>, vector<1x8x16xf32>, vector<1x8x16xf32>, vector<1x8x16xf32>, vector<1x8x16xf32>, vector<1x8x16xf32>, vector<1x8x16xf32>, vector<1x8x16xf32> -> vector<8x8x16xf32>
      %581 = vector.shape_cast %108 : vector<1x1xf32> to vector<1x1x1xf32>
      %582 = vector.broadcast %581 : vector<1x1x1xf32> to vector<8x8x16xf32>
      %583 = arith.mulf %580, %582 : vector<8x8x16xf32>
      "tpu.trace_start"() <{level = 10 : i32, message = "bqd,bkd->bqk"}> : () -> ()
      %cst_117 = arith.constant dense<0.000000e+00> : vector<8x8x8xf32>
      %584 = tpu.matmul %531, %556, %cst_117 {dimension_numbers = #tpu.dot_dimension_numbers<[2], [2], [1], [1], [0, 0, 0, 1, 1, 1], [0], [0]>} : vector<8x8x16xbf16>, vector<8x8x16xbf16>, vector<8x8x8xf32> -> vector<8x8x8xf32>
      "tpu.trace_stop"() : () -> ()
      %585 = arith.mulf %82, %95 : vector<1x1xf32>
      %cst_118 = arith.constant 2.500000e-01 : f32
      %586 = vector.broadcast %cst_118 : f32 to vector<1x1xf32>
      %587 = arith.mulf %585, %586 : vector<1x1xf32>
      %588 = vector.shape_cast %587 : vector<1x1xf32> to vector<1x1x1xf32>
      %589 = vector.broadcast %588 : vector<1x1x1xf32> to vector<8x8x8xf32>
      %590 = arith.mulf %584, %589 : vector<8x8x8xf32>
      %cst_119 = arith.constant dense<0xFF800000> : vector<8x8xf32>
      %591 = vector.multi_reduction <maximumf>, %590, %cst_119 [2] : vector<8x8x8xf32> to vector<8x8xf32>
      %592 = vector.shape_cast %591 : vector<8x8xf32> to vector<8x8x1xf32>
      %593 = vector.broadcast %592 : vector<8x8x1xf32> to vector<8x8x8xf32>
      %594 = arith.subf %590, %593 : vector<8x8x8xf32>
      %595 = math.exp %594 : vector<8x8x8xf32>
      %cst_120 = arith.constant dense<0.000000e+00> : vector<8x8xf32>
      %596 = vector.multi_reduction <add>, %595, %cst_120 [2] : vector<8x8x8xf32> to vector<8x8xf32>
      %597 = vector.shape_cast %596 : vector<8x8xf32> to vector<8x8x1xf32>
      %598 = vector.broadcast %597 : vector<8x8x1xf32> to vector<8x8x8xf32>
      %599 = arith.divf %595, %598 : vector<8x8x8xf32>
      %cst_121 = arith.constant dense<0x7F800000> : vector<8x8xf32>
      %600 = vector.multi_reduction <minimumf>, %599, %cst_121 [2] : vector<8x8x8xf32> to vector<8x8xf32>
      %601 = vector.shape_cast %600 : vector<8x8xf32> to vector<8x8x1xf32>
      %cst_122 = arith.constant dense<0x7F800000> : vector<8x1xf32>
      %602 = vector.multi_reduction <minimumf>, %601, %cst_122 [1] : vector<8x8x1xf32> to vector<8x1xf32>
      %603 = vector.shape_cast %602 : vector<8x1xf32> to vector<8x1x1xf32>
      %cst_123 = arith.constant dense<0x7F800000> : vector<1x1xf32>
      %604 = vector.multi_reduction <minimumf>, %603, %cst_123 [0] : vector<8x1x1xf32> to vector<1x1xf32>
      %605 = vector.shape_cast %604 : vector<1x1xf32> to vector<1x1x1xf32>
      %606 = vector.broadcast %605 : vector<1x1x1xf32> to vector<8x8x8xf32>
      %607 = arith.subf %599, %606 : vector<8x8x8xf32>
      %608 = vector.broadcast %222 : vector<1x1x1xf32> to vector<8x8x8xf32>
      %609 = arith.divf %607, %608 : vector<8x8x8xf32>
      %610 = math.roundeven %609 : vector<8x8x8xf32>
      %cst_124 = arith.constant 0.000000e+00 : f32
      %cst_125 = arith.constant 1.500000e+01 : f32
      %611 = vector.broadcast %cst_124 : f32 to vector<8x8x8xf32>
      %612 = arith.maximumf %611, %610 : vector<8x8x8xf32>
      %613 = vector.broadcast %cst_125 : f32 to vector<8x8x8xf32>
      %614 = arith.minimumf %613, %612 : vector<8x8x8xf32>
      %615 = vector.broadcast %222 : vector<1x1x1xf32> to vector<8x8x8xf32>
      %616 = arith.mulf %614, %615 : vector<8x8x8xf32>
      %617 = vector.broadcast %605 : vector<1x1x1xf32> to vector<8x8x8xf32>
      %618 = arith.addf %616, %617 : vector<8x8x8xf32>
      "tpu.trace_start"() <{level = 10 : i32, message = "bqk,bkd->bqd"}> : () -> ()
      %cst_126 = arith.constant dense<0.000000e+00> : vector<8x8x16xf32>
      %619 = tpu.matmul %618, %583, %cst_126 {dimension_numbers = #tpu.dot_dimension_numbers<[2], [1], [1], [2], [0, 0, 0, 1, 1, 2], [0], [0]>} : vector<8x8x8xf32>, vector<8x8x16xf32>, vector<8x8x16xf32> -> vector<8x8x16xf32>
      "tpu.trace_stop"() : () -> ()
      %620 = vector.extract_strided_slice %619 {offsets = [0, 0, 0], sizes = [1, 8, 16], strides = [1, 1, 1]} : vector<8x8x16xf32> to vector<1x8x16xf32>
      %621 = vector.shape_cast %620 : vector<1x8x16xf32> to vector<8x16xf32>
      %622 = vector.extract_strided_slice %621 {offsets = [0, 0], sizes = [1, 16], strides = [1, 1]} : vector<8x16xf32> to vector<1x16xf32>
      %623 = vector.extract_strided_slice %621 {offsets = [1, 0], sizes = [1, 16], strides = [1, 1]} : vector<8x16xf32> to vector<1x16xf32>
      %624 = vector.extract_strided_slice %621 {offsets = [2, 0], sizes = [1, 16], strides = [1, 1]} : vector<8x16xf32> to vector<1x16xf32>
      %625 = vector.extract_strided_slice %621 {offsets = [3, 0], sizes = [1, 16], strides = [1, 1]} : vector<8x16xf32> to vector<1x16xf32>
      %626 = tpu.concatenate %622, %623, %624, %625 in 1 : vector<1x16xf32>, vector<1x16xf32>, vector<1x16xf32>, vector<1x16xf32> -> vector<1x64xf32>
      %627 = vector.extract_strided_slice %621 {offsets = [4, 0], sizes = [1, 16], strides = [1, 1]} : vector<8x16xf32> to vector<1x16xf32>
      %628 = vector.extract_strided_slice %621 {offsets = [5, 0], sizes = [1, 16], strides = [1, 1]} : vector<8x16xf32> to vector<1x16xf32>
      %629 = vector.extract_strided_slice %621 {offsets = [6, 0], sizes = [1, 16], strides = [1, 1]} : vector<8x16xf32> to vector<1x16xf32>
      %630 = vector.extract_strided_slice %621 {offsets = [7, 0], sizes = [1, 16], strides = [1, 1]} : vector<8x16xf32> to vector<1x16xf32>
      %631 = tpu.concatenate %627, %628, %629, %630 in 1 : vector<1x16xf32>, vector<1x16xf32>, vector<1x16xf32>, vector<1x16xf32> -> vector<1x64xf32>
      %632 = vector.extract_strided_slice %619 {offsets = [2, 0, 0], sizes = [1, 8, 16], strides = [1, 1, 1]} : vector<8x8x16xf32> to vector<1x8x16xf32>
      %633 = vector.shape_cast %632 : vector<1x8x16xf32> to vector<8x16xf32>
      %634 = vector.extract_strided_slice %633 {offsets = [0, 0], sizes = [1, 16], strides = [1, 1]} : vector<8x16xf32> to vector<1x16xf32>
      %635 = vector.extract_strided_slice %633 {offsets = [1, 0], sizes = [1, 16], strides = [1, 1]} : vector<8x16xf32> to vector<1x16xf32>
      %636 = vector.extract_strided_slice %633 {offsets = [2, 0], sizes = [1, 16], strides = [1, 1]} : vector<8x16xf32> to vector<1x16xf32>
      %637 = vector.extract_strided_slice %633 {offsets = [3, 0], sizes = [1, 16], strides = [1, 1]} : vector<8x16xf32> to vector<1x16xf32>
      %638 = tpu.concatenate %634, %635, %636, %637 in 1 : vector<1x16xf32>, vector<1x16xf32>, vector<1x16xf32>, vector<1x16xf32> -> vector<1x64xf32>
      %639 = vector.extract_strided_slice %633 {offsets = [4, 0], sizes = [1, 16], strides = [1, 1]} : vector<8x16xf32> to vector<1x16xf32>
      %640 = vector.extract_strided_slice %633 {offsets = [5, 0], sizes = [1, 16], strides = [1, 1]} : vector<8x16xf32> to vector<1x16xf32>
      %641 = vector.extract_strided_slice %633 {offsets = [6, 0], sizes = [1, 16], strides = [1, 1]} : vector<8x16xf32> to vector<1x16xf32>
      %642 = vector.extract_strided_slice %633 {offsets = [7, 0], sizes = [1, 16], strides = [1, 1]} : vector<8x16xf32> to vector<1x16xf32>
      %643 = tpu.concatenate %639, %640, %641, %642 in 1 : vector<1x16xf32>, vector<1x16xf32>, vector<1x16xf32>, vector<1x16xf32> -> vector<1x64xf32>
      %644 = vector.extract_strided_slice %619 {offsets = [4, 0, 0], sizes = [1, 8, 16], strides = [1, 1, 1]} : vector<8x8x16xf32> to vector<1x8x16xf32>
      %645 = vector.shape_cast %644 : vector<1x8x16xf32> to vector<8x16xf32>
      %646 = vector.extract_strided_slice %645 {offsets = [0, 0], sizes = [1, 16], strides = [1, 1]} : vector<8x16xf32> to vector<1x16xf32>
      %647 = vector.extract_strided_slice %645 {offsets = [1, 0], sizes = [1, 16], strides = [1, 1]} : vector<8x16xf32> to vector<1x16xf32>
      %648 = vector.extract_strided_slice %645 {offsets = [2, 0], sizes = [1, 16], strides = [1, 1]} : vector<8x16xf32> to vector<1x16xf32>
      %649 = vector.extract_strided_slice %645 {offsets = [3, 0], sizes = [1, 16], strides = [1, 1]} : vector<8x16xf32> to vector<1x16xf32>
      %650 = tpu.concatenate %646, %647, %648, %649 in 1 : vector<1x16xf32>, vector<1x16xf32>, vector<1x16xf32>, vector<1x16xf32> -> vector<1x64xf32>
      %651 = vector.extract_strided_slice %645 {offsets = [4, 0], sizes = [1, 16], strides = [1, 1]} : vector<8x16xf32> to vector<1x16xf32>
      %652 = vector.extract_strided_slice %645 {offsets = [5, 0], sizes = [1, 16], strides = [1, 1]} : vector<8x16xf32> to vector<1x16xf32>
      %653 = vector.extract_strided_slice %645 {offsets = [6, 0], sizes = [1, 16], strides = [1, 1]} : vector<8x16xf32> to vector<1x16xf32>
      %654 = vector.extract_strided_slice %645 {offsets = [7, 0], sizes = [1, 16], strides = [1, 1]} : vector<8x16xf32> to vector<1x16xf32>
      %655 = tpu.concatenate %651, %652, %653, %654 in 1 : vector<1x16xf32>, vector<1x16xf32>, vector<1x16xf32>, vector<1x16xf32> -> vector<1x64xf32>
      %656 = vector.extract_strided_slice %619 {offsets = [6, 0, 0], sizes = [1, 8, 16], strides = [1, 1, 1]} : vector<8x8x16xf32> to vector<1x8x16xf32>
      %657 = vector.shape_cast %656 : vector<1x8x16xf32> to vector<8x16xf32>
      %658 = vector.extract_strided_slice %657 {offsets = [0, 0], sizes = [1, 16], strides = [1, 1]} : vector<8x16xf32> to vector<1x16xf32>
      %659 = vector.extract_strided_slice %657 {offsets = [1, 0], sizes = [1, 16], strides = [1, 1]} : vector<8x16xf32> to vector<1x16xf32>
      %660 = vector.extract_strided_slice %657 {offsets = [2, 0], sizes = [1, 16], strides = [1, 1]} : vector<8x16xf32> to vector<1x16xf32>
      %661 = vector.extract_strided_slice %657 {offsets = [3, 0], sizes = [1, 16], strides = [1, 1]} : vector<8x16xf32> to vector<1x16xf32>
      %662 = tpu.concatenate %658, %659, %660, %661 in 1 : vector<1x16xf32>, vector<1x16xf32>, vector<1x16xf32>, vector<1x16xf32> -> vector<1x64xf32>
      %663 = vector.extract_strided_slice %657 {offsets = [4, 0], sizes = [1, 16], strides = [1, 1]} : vector<8x16xf32> to vector<1x16xf32>
      %664 = vector.extract_strided_slice %657 {offsets = [5, 0], sizes = [1, 16], strides = [1, 1]} : vector<8x16xf32> to vector<1x16xf32>
      %665 = vector.extract_strided_slice %657 {offsets = [6, 0], sizes = [1, 16], strides = [1, 1]} : vector<8x16xf32> to vector<1x16xf32>
      %666 = vector.extract_strided_slice %657 {offsets = [7, 0], sizes = [1, 16], strides = [1, 1]} : vector<8x16xf32> to vector<1x16xf32>
      %667 = tpu.concatenate %663, %664, %665, %666 in 1 : vector<1x16xf32>, vector<1x16xf32>, vector<1x16xf32>, vector<1x16xf32> -> vector<1x64xf32>
      %668 = vector.extract_strided_slice %619 {offsets = [1, 0, 0], sizes = [1, 8, 16], strides = [1, 1, 1]} : vector<8x8x16xf32> to vector<1x8x16xf32>
      %669 = vector.shape_cast %668 : vector<1x8x16xf32> to vector<8x16xf32>
      %670 = vector.extract_strided_slice %669 {offsets = [0, 0], sizes = [1, 16], strides = [1, 1]} : vector<8x16xf32> to vector<1x16xf32>
      %671 = vector.extract_strided_slice %669 {offsets = [1, 0], sizes = [1, 16], strides = [1, 1]} : vector<8x16xf32> to vector<1x16xf32>
      %672 = vector.extract_strided_slice %669 {offsets = [2, 0], sizes = [1, 16], strides = [1, 1]} : vector<8x16xf32> to vector<1x16xf32>
      %673 = vector.extract_strided_slice %669 {offsets = [3, 0], sizes = [1, 16], strides = [1, 1]} : vector<8x16xf32> to vector<1x16xf32>
      %674 = tpu.concatenate %670, %671, %672, %673 in 1 : vector<1x16xf32>, vector<1x16xf32>, vector<1x16xf32>, vector<1x16xf32> -> vector<1x64xf32>
      %675 = vector.extract_strided_slice %669 {offsets = [4, 0], sizes = [1, 16], strides = [1, 1]} : vector<8x16xf32> to vector<1x16xf32>
      %676 = vector.extract_strided_slice %669 {offsets = [5, 0], sizes = [1, 16], strides = [1, 1]} : vector<8x16xf32> to vector<1x16xf32>
      %677 = vector.extract_strided_slice %669 {offsets = [6, 0], sizes = [1, 16], strides = [1, 1]} : vector<8x16xf32> to vector<1x16xf32>
      %678 = vector.extract_strided_slice %669 {offsets = [7, 0], sizes = [1, 16], strides = [1, 1]} : vector<8x16xf32> to vector<1x16xf32>
      %679 = tpu.concatenate %675, %676, %677, %678 in 1 : vector<1x16xf32>, vector<1x16xf32>, vector<1x16xf32>, vector<1x16xf32> -> vector<1x64xf32>
      %680 = vector.extract_strided_slice %619 {offsets = [3, 0, 0], sizes = [1, 8, 16], strides = [1, 1, 1]} : vector<8x8x16xf32> to vector<1x8x16xf32>
      %681 = vector.shape_cast %680 : vector<1x8x16xf32> to vector<8x16xf32>
      %682 = vector.extract_strided_slice %681 {offsets = [0, 0], sizes = [1, 16], strides = [1, 1]} : vector<8x16xf32> to vector<1x16xf32>
      %683 = vector.extract_strided_slice %681 {offsets = [1, 0], sizes = [1, 16], strides = [1, 1]} : vector<8x16xf32> to vector<1x16xf32>
      %684 = vector.extract_strided_slice %681 {offsets = [2, 0], sizes = [1, 16], strides = [1, 1]} : vector<8x16xf32> to vector<1x16xf32>
      %685 = vector.extract_strided_slice %681 {offsets = [3, 0], sizes = [1, 16], strides = [1, 1]} : vector<8x16xf32> to vector<1x16xf32>
      %686 = tpu.concatenate %682, %683, %684, %685 in 1 : vector<1x16xf32>, vector<1x16xf32>, vector<1x16xf32>, vector<1x16xf32> -> vector<1x64xf32>
      %687 = vector.extract_strided_slice %681 {offsets = [4, 0], sizes = [1, 16], strides = [1, 1]} : vector<8x16xf32> to vector<1x16xf32>
      %688 = vector.extract_strided_slice %681 {offsets = [5, 0], sizes = [1, 16], strides = [1, 1]} : vector<8x16xf32> to vector<1x16xf32>
      %689 = vector.extract_strided_slice %681 {offsets = [6, 0], sizes = [1, 16], strides = [1, 1]} : vector<8x16xf32> to vector<1x16xf32>
      %690 = vector.extract_strided_slice %681 {offsets = [7, 0], sizes = [1, 16], strides = [1, 1]} : vector<8x16xf32> to vector<1x16xf32>
      %691 = tpu.concatenate %687, %688, %689, %690 in 1 : vector<1x16xf32>, vector<1x16xf32>, vector<1x16xf32>, vector<1x16xf32> -> vector<1x64xf32>
      %692 = vector.extract_strided_slice %619 {offsets = [5, 0, 0], sizes = [1, 8, 16], strides = [1, 1, 1]} : vector<8x8x16xf32> to vector<1x8x16xf32>
      %693 = vector.shape_cast %692 : vector<1x8x16xf32> to vector<8x16xf32>
      %694 = vector.extract_strided_slice %693 {offsets = [0, 0], sizes = [1, 16], strides = [1, 1]} : vector<8x16xf32> to vector<1x16xf32>
      %695 = vector.extract_strided_slice %693 {offsets = [1, 0], sizes = [1, 16], strides = [1, 1]} : vector<8x16xf32> to vector<1x16xf32>
      %696 = vector.extract_strided_slice %693 {offsets = [2, 0], sizes = [1, 16], strides = [1, 1]} : vector<8x16xf32> to vector<1x16xf32>
      %697 = vector.extract_strided_slice %693 {offsets = [3, 0], sizes = [1, 16], strides = [1, 1]} : vector<8x16xf32> to vector<1x16xf32>
      %698 = tpu.concatenate %694, %695, %696, %697 in 1 : vector<1x16xf32>, vector<1x16xf32>, vector<1x16xf32>, vector<1x16xf32> -> vector<1x64xf32>
      %699 = vector.extract_strided_slice %693 {offsets = [4, 0], sizes = [1, 16], strides = [1, 1]} : vector<8x16xf32> to vector<1x16xf32>
      %700 = vector.extract_strided_slice %693 {offsets = [5, 0], sizes = [1, 16], strides = [1, 1]} : vector<8x16xf32> to vector<1x16xf32>
      %701 = vector.extract_strided_slice %693 {offsets = [6, 0], sizes = [1, 16], strides = [1, 1]} : vector<8x16xf32> to vector<1x16xf32>
      %702 = vector.extract_strided_slice %693 {offsets = [7, 0], sizes = [1, 16], strides = [1, 1]} : vector<8x16xf32> to vector<1x16xf32>
      %703 = tpu.concatenate %699, %700, %701, %702 in 1 : vector<1x16xf32>, vector<1x16xf32>, vector<1x16xf32>, vector<1x16xf32> -> vector<1x64xf32>
      %704 = vector.extract_strided_slice %619 {offsets = [7, 0, 0], sizes = [1, 8, 16], strides = [1, 1, 1]} : vector<8x8x16xf32> to vector<1x8x16xf32>
      %705 = vector.shape_cast %704 : vector<1x8x16xf32> to vector<8x16xf32>
      %706 = vector.extract_strided_slice %705 {offsets = [0, 0], sizes = [1, 16], strides = [1, 1]} : vector<8x16xf32> to vector<1x16xf32>
      %707 = vector.extract_strided_slice %705 {offsets = [1, 0], sizes = [1, 16], strides = [1, 1]} : vector<8x16xf32> to vector<1x16xf32>
      %708 = vector.extract_strided_slice %705 {offsets = [2, 0], sizes = [1, 16], strides = [1, 1]} : vector<8x16xf32> to vector<1x16xf32>
      %709 = vector.extract_strided_slice %705 {offsets = [3, 0], sizes = [1, 16], strides = [1, 1]} : vector<8x16xf32> to vector<1x16xf32>
      %710 = tpu.concatenate %706, %707, %708, %709 in 1 : vector<1x16xf32>, vector<1x16xf32>, vector<1x16xf32>, vector<1x16xf32> -> vector<1x64xf32>
      %711 = vector.extract_strided_slice %705 {offsets = [4, 0], sizes = [1, 16], strides = [1, 1]} : vector<8x16xf32> to vector<1x16xf32>
      %712 = vector.extract_strided_slice %705 {offsets = [5, 0], sizes = [1, 16], strides = [1, 1]} : vector<8x16xf32> to vector<1x16xf32>
      %713 = vector.extract_strided_slice %705 {offsets = [6, 0], sizes = [1, 16], strides = [1, 1]} : vector<8x16xf32> to vector<1x16xf32>
      %714 = vector.extract_strided_slice %705 {offsets = [7, 0], sizes = [1, 16], strides = [1, 1]} : vector<8x16xf32> to vector<1x16xf32>
      %715 = tpu.concatenate %711, %712, %713, %714 in 1 : vector<1x16xf32>, vector<1x16xf32>, vector<1x16xf32>, vector<1x16xf32> -> vector<1x64xf32>
      %716 = tpu.concatenate %626, %631, %638, %643, %650, %655, %662, %667, %674, %679, %686, %691, %698, %703, %710, %715 in 0 : vector<1x64xf32>, vector<1x64xf32>, vector<1x64xf32>, vector<1x64xf32>, vector<1x64xf32>, vector<1x64xf32>, vector<1x64xf32>, vector<1x64xf32>, vector<1x64xf32>, vector<1x64xf32>, vector<1x64xf32>, vector<1x64xf32>, vector<1x64xf32>, vector<1x64xf32>, vector<1x64xf32>, vector<1x64xf32> -> vector<16x64xf32>
      %717 = vector.broadcast %346 : vector<1x1xf32> to vector<16x64xf32>
      %718 = arith.divf %716, %717 : vector<16x64xf32>
      %719 = math.roundeven %718 : vector<16x64xf32>
      %cst_127 = arith.constant -1.280000e+02 : f32
      %cst_128 = arith.constant 1.270000e+02 : f32
      %720 = vector.broadcast %cst_127 : f32 to vector<16x64xf32>
      %721 = arith.maximumf %720, %719 : vector<16x64xf32>
      %722 = vector.broadcast %cst_128 : f32 to vector<16x64xf32>
      %723 = arith.minimumf %722, %721 : vector<16x64xf32>
      %724 = arith.truncf %723 : vector<16x64xf32> to vector<16x64xbf16>
      %cst_129 = arith.constant dense<0.000000e+00> : vector<16x64xf32>
      %725 = tpu.matmul %724, %2, %cst_129 {dimension_numbers = #tpu.dot_dimension_numbers<[1], [0], [0], [1], [0, 0, 1, 1], [], []>} : vector<16x64xbf16>, vector<64x64xbf16>, vector<16x64xf32> -> vector<16x64xf32>
      %726 = arith.mulf %346, %20 : vector<1x1xf32>
      %727 = vector.broadcast %726 : vector<1x1xf32> to vector<16x64xf32>
      %728 = arith.mulf %725, %727 : vector<16x64xf32>
      %729 = arith.addf %arg11, %728 : vector<16x64xf32>
      %cst_130 = arith.constant dense<0.000000e+00> : vector<16xf32>
      %730 = vector.multi_reduction <add>, %729, %cst_130 [1] : vector<16x64xf32> to vector<16xf32>
      %731 = vector.shape_cast %730 : vector<16xf32> to vector<16x1xf32>
      %cst_131 = arith.constant 6.400000e+01 : f32
      %732 = vector.broadcast %cst_131 : f32 to vector<16x1xf32>
      %733 = arith.divf %731, %732 : vector<16x1xf32>
      %734 = vector.broadcast %733 : vector<16x1xf32> to vector<16x64xf32>
      %735 = arith.subf %729, %734 : vector<16x64xf32>
      %736 = arith.mulf %735, %735 : vector<16x64xf32>
      %cst_132 = arith.constant dense<0.000000e+00> : vector<16xf32>
      %737 = vector.multi_reduction <add>, %736, %cst_132 [1] : vector<16x64xf32> to vector<16xf32>
      %738 = vector.shape_cast %737 : vector<16xf32> to vector<16x1xf32>
      %cst_133 = arith.constant 6.400000e+01 : f32
      %739 = vector.broadcast %cst_133 : f32 to vector<16x1xf32>
      %740 = arith.divf %738, %739 : vector<16x1xf32>
      %cst_134 = arith.constant 9.99999974E-6 : f32
      %741 = vector.broadcast %cst_134 : f32 to vector<16x1xf32>
      %742 = arith.addf %740, %741 : vector<16x1xf32>
      %743 = math.rsqrt %742 : vector<16x1xf32>
      %744 = vector.broadcast %743 : vector<16x1xf32> to vector<16x64xf32>
      %745 = arith.mulf %735, %744 : vector<16x64xf32>
      %746 = vector.broadcast %7 : vector<1x64xf32> to vector<16x64xf32>
      %747 = arith.mulf %745, %746 : vector<16x64xf32>
      %748 = vector.broadcast %8 : vector<1x64xf32> to vector<16x64xf32>
      %749 = arith.addf %747, %748 : vector<16x64xf32>
      %750 = vector.broadcast %392 : vector<1x1xf32> to vector<16x64xf32>
      %751 = arith.divf %749, %750 : vector<16x64xf32>
      %752 = math.roundeven %751 : vector<16x64xf32>
      %cst_135 = arith.constant -1.280000e+02 : f32
      %cst_136 = arith.constant 1.270000e+02 : f32
      %753 = vector.broadcast %cst_135 : f32 to vector<16x64xf32>
      %754 = arith.maximumf %753, %752 : vector<16x64xf32>
      %755 = vector.broadcast %cst_136 : f32 to vector<16x64xf32>
      %756 = arith.minimumf %755, %754 : vector<16x64xf32>
      %757 = arith.truncf %756 : vector<16x64xf32> to vector<16x64xbf16>
      %cst_137 = arith.constant dense<0.000000e+00> : vector<16x128xf32>
      %758 = tpu.matmul %757, %3, %cst_137 {dimension_numbers = #tpu.dot_dimension_numbers<[1], [0], [0], [1], [0, 0, 1, 1], [], []>} : vector<16x64xbf16>, vector<64x128xbf16>, vector<16x128xf32> -> vector<16x128xf32>
      %759 = arith.mulf %392, %21 : vector<1x1xf32>
      %760 = vector.broadcast %759 : vector<1x1xf32> to vector<16x128xf32>
      %761 = arith.mulf %758, %760 : vector<16x128xf32>
      %cst_138 = arith.constant 0.000000e+00 : f32
      %762 = vector.broadcast %cst_138 : f32 to vector<16x128xf32>
      %763 = arith.maximumf %761, %762 : vector<16x128xf32>
      %764 = vector.broadcast %419 : vector<1x1xf32> to vector<16x128xf32>
      %765 = arith.divf %763, %764 : vector<16x128xf32>
      %766 = math.roundeven %765 : vector<16x128xf32>
      %cst_139 = arith.constant -1.280000e+02 : f32
      %cst_140 = arith.constant 1.270000e+02 : f32
      %767 = vector.broadcast %cst_139 : f32 to vector<16x128xf32>
      %768 = arith.maximumf %767, %766 : vector<16x128xf32>
      %769 = vector.broadcast %cst_140 : f32 to vector<16x128xf32>
      %770 = arith.minimumf %769, %768 : vector<16x128xf32>
      %771 = arith.truncf %770 : vector<16x128xf32> to vector<16x128xbf16>
      %cst_141 = arith.constant dense<0.000000e+00> : vector<16x64xf32>
      %772 = tpu.matmul %771, %4, %cst_141 {dimension_numbers = #tpu.dot_dimension_numbers<[1], [0], [0], [1], [0, 0, 1, 1], [], []>} : vector<16x128xbf16>, vector<128x64xbf16>, vector<16x64xf32> -> vector<16x64xf32>
      %773 = arith.mulf %419, %22 : vector<1x1xf32>
      %774 = vector.broadcast %773 : vector<1x1xf32> to vector<16x64xf32>
      %775 = arith.mulf %772, %774 : vector<16x64xf32>
      %776 = arith.addf %749, %775 : vector<16x64xf32>
      %cst_142 = arith.constant dense<0.000000e+00> : vector<16xf32>
      %777 = vector.multi_reduction <add>, %776, %cst_142 [1] : vector<16x64xf32> to vector<16xf32>
      %778 = vector.shape_cast %777 : vector<16xf32> to vector<16x1xf32>
      %cst_143 = arith.constant 6.400000e+01 : f32
      %779 = vector.broadcast %cst_143 : f32 to vector<16x1xf32>
      %780 = arith.divf %778, %779 : vector<16x1xf32>
      %781 = vector.broadcast %780 : vector<16x1xf32> to vector<16x64xf32>
      %782 = arith.subf %776, %781 : vector<16x64xf32>
      %783 = arith.mulf %782, %782 : vector<16x64xf32>
      %cst_144 = arith.constant dense<0.000000e+00> : vector<16xf32>
      %784 = vector.multi_reduction <add>, %783, %cst_144 [1] : vector<16x64xf32> to vector<16xf32>
      %785 = vector.shape_cast %784 : vector<16xf32> to vector<16x1xf32>
      %cst_145 = arith.constant 6.400000e+01 : f32
      %786 = vector.broadcast %cst_145 : f32 to vector<16x1xf32>
      %787 = arith.divf %785, %786 : vector<16x1xf32>
      %cst_146 = arith.constant 9.99999974E-6 : f32
      %788 = vector.broadcast %cst_146 : f32 to vector<16x1xf32>
      %789 = arith.addf %787, %788 : vector<16x1xf32>
      %790 = math.rsqrt %789 : vector<16x1xf32>
      %791 = vector.broadcast %790 : vector<16x1xf32> to vector<16x64xf32>
      %792 = arith.mulf %782, %791 : vector<16x64xf32>
      %793 = vector.broadcast %9 : vector<1x64xf32> to vector<16x64xf32>
      %794 = arith.mulf %792, %793 : vector<16x64xf32>
      %795 = vector.broadcast %10 : vector<1x64xf32> to vector<16x64xf32>
      %796 = arith.addf %794, %795 : vector<16x64xf32>
      scf.yield %796, %590 : vector<16x64xf32>, vector<8x8x8xf32>
    }
    %455 = vector.extract_strided_slice %454#1 {offsets = [0, 0, 0], sizes = [1, 8, 8], strides = [1, 1, 1]} : vector<8x8x8xf32> to vector<1x8x8xf32>
    %456 = vector.shape_cast %455 : vector<1x8x8xf32> to vector<8x8xf32>
    %457 = vector.extract_strided_slice %454#1 {offsets = [1, 0, 0], sizes = [1, 8, 8], strides = [1, 1, 1]} : vector<8x8x8xf32> to vector<1x8x8xf32>
    %458 = vector.shape_cast %457 : vector<1x8x8xf32> to vector<8x8xf32>
    %459 = vector.extract_strided_slice %454#1 {offsets = [2, 0, 0], sizes = [1, 8, 8], strides = [1, 1, 1]} : vector<8x8x8xf32> to vector<1x8x8xf32>
    %460 = vector.shape_cast %459 : vector<1x8x8xf32> to vector<8x8xf32>
    %461 = vector.extract_strided_slice %454#1 {offsets = [3, 0, 0], sizes = [1, 8, 8], strides = [1, 1, 1]} : vector<8x8x8xf32> to vector<1x8x8xf32>
    %462 = vector.shape_cast %461 : vector<1x8x8xf32> to vector<8x8xf32>
    %463 = vector.extract_strided_slice %454#1 {offsets = [4, 0, 0], sizes = [1, 8, 8], strides = [1, 1, 1]} : vector<8x8x8xf32> to vector<1x8x8xf32>
    %464 = vector.shape_cast %463 : vector<1x8x8xf32> to vector<8x8xf32>
    %465 = vector.extract_strided_slice %454#1 {offsets = [5, 0, 0], sizes = [1, 8, 8], strides = [1, 1, 1]} : vector<8x8x8xf32> to vector<1x8x8xf32>
    %466 = vector.shape_cast %465 : vector<1x8x8xf32> to vector<8x8xf32>
    %467 = vector.extract_strided_slice %454#1 {offsets = [6, 0, 0], sizes = [1, 8, 8], strides = [1, 1, 1]} : vector<8x8x8xf32> to vector<1x8x8xf32>
    %468 = vector.shape_cast %467 : vector<1x8x8xf32> to vector<8x8xf32>
    %469 = vector.extract_strided_slice %454#1 {offsets = [7, 0, 0], sizes = [1, 8, 8], strides = [1, 1, 1]} : vector<8x8x8xf32> to vector<1x8x8xf32>
    %470 = vector.shape_cast %469 : vector<1x8x8xf32> to vector<8x8xf32>
    %471 = tpu.concatenate %456, %458, %460, %462, %464, %466, %468, %470 in 1 : vector<8x8xf32>, vector<8x8xf32>, vector<8x8xf32>, vector<8x8xf32>, vector<8x8xf32>, vector<8x8xf32>, vector<8x8xf32>, vector<8x8xf32> -> vector<8x64xf32>
    %c0_103 = arith.constant 0 : index
    %c0_104 = arith.constant 0 : index
    %472 = vector.load %arg9[%c0_103, %c0_104] : memref<8x64xf32, #tpu.memory_space<vmem>>, vector<8x64xf32>
    tpu.vector_store %arg9[%c0_103, %c0_104], %471 {strides = array<i32>} : memref<8x64xf32, #tpu.memory_space<vmem>>, vector<8x64xf32>,
    %473 = vector.broadcast %11 : vector<1x64xf32> to vector<16x64xf32>
    %474 = arith.mulf %454#0, %473 : vector<16x64xf32>
    %cst_105 = arith.constant dense<0.000000e+00> : vector<16xf32>
    %475 = vector.multi_reduction <add>, %474, %cst_105 [1] : vector<16x64xf32> to vector<16xf32>
    %476 = vector.shape_cast %475 : vector<16xf32> to vector<16x1xf32>
    %477 = vector.broadcast %16 : vector<1x1xf32> to vector<16x1xf32>
    %478 = arith.addf %476, %477 : vector<16x1xf32>
    %c0_106 = arith.constant 0 : index
    %c0_107 = arith.constant 0 : index
    %479 = vector.load %arg8[%c0_106, %c0_107] : memref<16x1xf32, #tpu.memory_space<vmem>>, vector<16x1xf32>
    tpu.vector_store %arg8[%c0_106, %c0_107], %478 {strides = array<i32>} : memref<16x1xf32, #tpu.memory_space<vmem>>, vector<16x1xf32>,
    return
  }
}

</mosaic_0001>

<bundles_post_ra>
// kernel: transformer_forward.1
= control target key start
LH: loop header
LB: loop body
LE: loop exit
PB: predicated region body
PF: predicated region fallthrough
CT: control target
= control target key end

     0   :  { %15 = vsyncpa [#allocation3], 0  ;;  %s5116_s30 = smov [#allocation2]   ;;  %s6467_s0 = inlined_call_operand.vmem [shape: f32[16,16], index: 0, kind: input, shape index: {}]   ;;  %s6468_s1 = inlined_call_operand.vmem [shape: f32[8,64], index: 1, kind: input, shape index: {}]   ;;  %s6469_s2 = inlined_call_operand.hbm [shape: f32[16,64], index: 2, kind: input, shape index: {}]   ;;  %s6470_s3 = inlined_call_operand.vmem [shape: bf16[64,192], index: 3, kind: input, shape index: {}]   ;;  %s6471_s4 = inlined_call_operand.vmem [shape: bf16[64,64], index: 4, kind: input, shape index: {}]   ;;  %s6472_s5 = inlined_call_operand.vmem [shape: bf16[64,128], index: 5, kind: input, shape index: {}]   ;;  %s6473_s6 = inlined_call_operand.vmem [shape: bf16[128,64], index: 6, kind: input, shape index: {}]   ;;  %s6474_s7 = inlined_call_operand.vmem [shape: f32[10,64], index: 7, kind: input, shape index: {}]   ;;  %s6475_s8 = inlined_call_operand.vmem [shape: f32[16,1], index: 8, kind: output, shape index: {0}]   ;;  %s6476_s9 = inlined_call_operand.vmem [shape: f32[8,64], index: 9, kind: output, shape index: {1}]  }
   0x1   :  { %s25_s10 = sshll.u32 %s5116_s30, 4  ;;  %s5068_s13 = scalar_lea.hbm %s6469_s2, 256  ;;  %s26_s10 = int_to_ptr.vmem [resolvable:$true] %s25_s10 }
   0x2   :  { %p5069_p0 = scmp.ne.s32.totalorder %s6469_s2, %s5068_s13  ;;  %p5072_p1 = scmp.lt.u32.totalorder %s5068_s13, %s6469_s2 }
   0x4   :  { %p5074_p2 = pnand %p5072_p1, %p5069_p0 }
   0x6   :  { %5077 = shalt.err (!%p5074_p2)
}
   0x7   :  { %s5078_s18 = scalar_lea.vmem %s26_s10, 256  ;;  %p5083_p4 = scmp.lt.s32.totalorder %s26_s10, %s26_s10 }
   0x8   :  { %p5079_p3 = scmp.ne.s32.totalorder %s26_s10, %s5078_s18  ;;  %p5084_p5 = scmp.lt.s32.totalorder %s5078_s18, %s5078_s18 }
   0xa   :  { %p5085_p6 = por %p5084_p5, %p5083_p4 }
   0xc   :  { %p5086_p7 = pnand %p5085_p6, %p5079_p3 }
   0xe   :  { %5089 = shalt.err (!%p5086_p7)
}
   0xf   :  { %s5117_s19 = smov 128   ;;  %s5118_s20 = smov 8  }
  0x10   :  { %31 = dma.hbm_to_vmem [thread:$0]  %s6469_s2, 256, %s26_s10, [#allocation3], %s5117_s19, %s5117_s19, %s5118_s20  }
  0x11   :  { %5102 = dma.done.wait [#allocation3], 256  }
  0x12   :  { %5103 = vsyncadd [#allocation3], 4294967040  ;;  %vm97_vm0 = vcmask 130048   ;;  %v46_v0 = vld [vmem:[#allocation2] sm:$0xff]  ;;  %v47_v1 = vld [vmem:[#allocation2 + $0x8] sm:$0xff]  ;;  %v93_v5 = vlaneseq  ;;  %vm183_vm1 = vcmask 523264  }
  0x13   :  { %v91_v2 = vld [vmem:[%s6467_s0] sm:$0xff]  ;;  %v4786_v3 = vpack.c.bf16 %v47_v1, %v46_v0  ;;  %v92_v4 = vld [vmem:[%s6467_s0 + $0x8] sm:$0xff]  ;;  %v5256_v23 = vld [vmem:[%s6470_s3 + $0x14] ss:$8 sps:$4 sm:$0xff]   ;;  %v5119_v27 = vmov 0   ;;  %s5121_s26 = smov 127  }
  0x14   :  { %4519 = vmatprep.mubr.msk.f32.mxu0 %vm97_vm0, %v91_v2  ;;  %v5219_v6 = vshrl.u32 %v93_v5, 7  ;;  %v5225_v8 = vld [vmem:[%s6474_s7] sm:$0xff]  ;;  %6548 = vst [vmem:[#allocation9_spill] sm:$0xff] %v5256_v23  ;;  %v5261_v24 = vld [vmem:[%s6470_s3 + $0x10] ss:$8 sps:$4 sm:$0xff]   ;;  %s5122_s2 = smov 126  }
  0x15   :  { %4787 = vmatprep.subr.bf16.mxu0 %v4786_v3  ;;  %6545 = vst [vmem:[#allocation6_spill] sm:$0xff] %v5225_v8  ;;  %v90_v11 = vld [vmem:[%s6468_s1] sm:$0xff]  ;;  %6549 = vst [vmem:[#allocation10_spill] sm:$0xff] %v5261_v24  ;;  %v5279_v28 = vld [vmem:[%s6470_s3 + $0x34] ss:$8 sps:$4 sm:$0xff]   ;;  %s5124_s28 = smov 112  }
  0x16   :  { %4789 = vmatpush3.bf16.msra.mxu0 %v4786_v3  ;;  %6544 = vst [vmem:[#allocation5_spill] sm:$0xff] %v5219_v6  ;;  %v95_v7 = vsub.s32 0, %v5219_v6  ;;  %v5244_v21 = vld [vmem:[%s6470_s3 + $0x4] ss:$8 sps:$4 sm:$0xff]   ;;  %v5249_v22 = vld [vmem:[%s6470_s3] ss:$8 sps:$4 sm:$0xff]  }
  0x17   :  { %6546 = vst [vmem:[#allocation7_spill] sm:$0xff] %v5244_v21  ;;  %6547 = vst [vmem:[#allocation8_spill] sm:$0xff] %v5249_v22  ;;  %256 = vmatprep.subr.bf16.mxu0 %v5244_v21  ;;  %v5266_v25 = vld [vmem:[%s6470_s3 + $0x24] ss:$8 sps:$4 sm:$0xff]   ;;  %v5273_v26 = vld [vmem:[%s6470_s3 + $0x20] ss:$8 sps:$4 sm:$0xff]  }
  0x18   :  { %v96_v9 = vrot.slane %v5225_v8, %v95_v7  ;;  %6550 = vst [vmem:[#allocation11_spill] sm:$0xff] %v5266_v25  ;;  %6551 = vst [vmem:[#allocation12_spill] sm:$0xff] %v5273_v26  ;;  %v5285_v29 = vld [vmem:[%s6470_s3 + $0x30] ss:$8 sps:$4 sm:$0xff]   ;;  %v324_v38 = vsub.s32 7, %v5219_v6  ;;  %s5120_s3 = smov 64  }
  0x19   :  { %4520 = vmatmul.mubr.msk.f32.vlgmr.msra.gmra.mrb[0].mxu0 %vm97_vm0, %v92_v4  ;;  %6552 = vst [vmem:[#allocation13_spill] sm:$0xff] %v5279_v28  ;;  %6553 = vst [vmem:[#allocation14_spill] sm:$0xff] %v5285_v29  ;;  %v5295_v44 = vld [vmem:[%s6474_s7 + $0x8] sm:$0x3]  ;;  %vm5125_vm2 = vmmov 0   ;;  %s5126_s29 = smov 80  }
  0x1a   :  { %257 = vmatpush1.bf16.msra.mxu0 %v5249_v22  ;;  %288 = vmatprep.mubr.bf16.mxu0 %v5119_v27  ;;  %v325_v40 = vrot.slane %v5225_v8, %v324_v38  ;;  %6554 = vst [vmem:[#allocation15_spill] sm:$0xff] %v5295_v44  ;;  %s5127_s1 = smov 96   ;;  %vm923_vm3 = vcmask 64512   ;;  %s5128_s30 = smov 125   ;;  %vm1839_vm4 = vcmask 261120   ;;  %vm1841_vm5 = vcmask 392192  }
  0x1b   :  { %258 = vmatprep.subr.bf16.mxu0 %v5256_v23  ;;  %s5129_s11 = smov 16   ;;  %s5130_s12 = smov 32   ;;  %vm1991_vm6 = vcmask 1040384   ;;  %vm1993_vm7 = vcmask 1041408   ;;  %vm1995_vm8 = vcmask 1042432   ;;  %vm1997_vm9 = vcmask 1043456  }
  0x1c   :  { %s5131_s13 = smov 48   ;;  %vm1999_vm10 = vcmask 1044480   ;;  %vm2001_vm11 = vcmask 1045504   ;;  %vm2003_vm12 = vcmask 1046528  }
  0x1e   :  { %259 = vmatpush1.bf16.msra.mxu0 %v5261_v24 }
  0x1f   :  { %260 = vmatprep.subr.bf16.mxu0 %v5266_v25 }
  0x22   :  { %261 = vmatpush1.bf16.msra.mxu0 %v5273_v26 }
  0x23   :  { %262 = vmatprep.subr.bf16.mxu0 %v5279_v28 }
  0x26   :  { %263 = vmatpush1.bf16.msra.mxu0 %v5285_v29 }
  0xec   :  { %v4521_v10 = vpop.f32.mrb[0].mxu0 }
  0xed   :  { %v176_v12 = vadd.f32 %v4521_v10, %v96_v9  ;;  %v170_v13 = vpop.f32.mrb[1].mxu0 }
  0xee   :  { %v171_v14 = vadd.f32 %v170_v13, %v96_v9 }
  0xef   :  { %v5233_v15 = vadd.f32 %v176_v12, %v90_v11 }
  0xf0   :  { %v5235_v16 = vadd.f32 %v171_v14, %v90_v11  ;;  %v311_v14 = vsub.s32 6, %v5219_v6 }
  0xf1   :  { %v182_v19 = vand.u32 2147483647, %v5233_v15 }
  0xf2   :  { %v181_v17 = vand.u32 2147483647, %v5235_v16 }
  0xf3   :  { %v187_v20 = vsel %vm183_vm1, %v182_v19, 0.0 }
  0xf4   :  { %v184_v18 = vsel %vm183_vm1, %v181_v17, 0.0  ;;  %v5329_v17 = vrot.slane %v5225_v8, %v311_v14 }
  0xf5   :  { %185 = vadd.xlane.f32.xlu0 %v184_v18 }
  0xf6   :  { %6559 = vst [vmem:[#allocation20_spill] sm:$0xff] %v5329_v17 }
  0xf9   :  { %188 = vadd.xlane.f32.xlu0 %v187_v20 }
 0x10f   :  { %327 = vrot.lane.b32.xlu0 %v325_v40, %s5120_s3 }
 0x182   :  { %v186_v30 = vpop.xlane.xlu0 %185 }
 0x186   :  { %v189_v31 = vpop.xlane.xlu0 %188 }
 0x187   :  { %v190_v32 = vadd.f32 %v189_v31, %v186_v30 }
 0x189   :  { %v191_v33 = vrot.slane %v190_v32, 4 }
 0x18a   :  { %v5313_v63 = vpop.permute.xlu0 %327 }
 0x18b   :  { %v192_v34 = vadd.f32 %v191_v33, %v190_v32  ;;  %6558 = vst [vmem:[#allocation19_spill] sm:$0xff] %v5313_v63 }
 0x18d   :  { %v193_v35 = vrot.slane %v192_v34, 2 }
 0x18f   :  { %v194_v36 = vadd.f32 %v193_v35, %v192_v34 }
 0x191   :  { %v195_v37 = vrot.slane %v194_v36, 1 }
 0x193   :  { %v196_v39 = vadd.f32 %v195_v37, %v194_v36 }
 0x195   :  { %v198_v41 = vmul.f32 0.0009765625, %v196_v39 }
 0x197   :  { %v199_v42 = vmul.f32 2.0, %v198_v41 }
 0x199   :  { %v201_v43 = vmul.f32 0.3779645, %v199_v42 }
 0x19b   :  { %v202_v45 = vmax.f32 %v201_v43, 1e-05 }
 0x19d   :  { %v299_v46 = vmul.f32 %v202_v45, %v5295_v44  ;;  %4940 = vrcp.f32 %v202_v45 }
 0x19f   :  { %v5298_v47 = vrot.slane %v299_v46, 1 }
 0x1a1   :  { %302 = vrot.lane.b32.xlu1 %v5298_v47, %s5121_s26 }
 0x1a5   :  { %315 = vrot.lane.b32.xlu1 %v5298_v47, %s5122_s2 }
 0x1a7   :  { %v5302_v48 = vpop.eup %4940 }
 0x1a8   :  { %6555 = vst [vmem:[#allocation16_spill] sm:$0xff] %v5302_v48  ;;  %v204_v49 = vmul.f32 %v5302_v48, %v5235_v16  ;;  %v205_v50 = vmul.f32 %v5302_v48, %v5233_v15 }
 0x1aa   :  { %v4790_v51 = vround.rtne.f32 %v204_v49  ;;  %v4791_v52 = vround.rtne.f32 %v205_v50 }
 0x1ac   :  { %v208_v53 = vmax.f32 %v4790_v51, -8.0  ;;  %v209_v54 = vmax.f32 %v4791_v52, -8.0 }
 0x1ae   :  { %v210_v55 = vmin.f32 %v208_v53, 7.0  ;;  %v211_v56 = vmin.f32 %v209_v54, 7.0 }
 0x1b0   :  { %v212_v57 = vpack.c.bf16 %v211_v56, %v210_v55 }
 0x1b2   :  { %4355 = vmatmul.mubr.msk.bf16.vlgmr.msra.gmra.mrb[4].mxu0 %vm183_vm1, %v212_v57 }
 0x213   :  { %v303_v58 = vpop.permute.xlu1 %302 }
 0x214   :  { %4792 = vpush %v303_v58 }
 0x217   :  { %v316_v59 = vpop.permute.xlu1 %315 }
 0x218   :  { %4794 = vpush %v316_v59 }
 0x245   :  { %s4793_s27 = spop %4792 }
 0x246   :  { %v5309_v60 = vstv %s4793_s27 }
 0x247   :  { %6556 = vst [vmem:[#allocation17_spill] sm:$0xff] %v5309_v60 }
 0x249   :  { %s4795_s0 = spop %4794 }
 0x24a   :  { %v5311_v61 = vstv %s4795_s0  ;;  %s5957_s0 = smov 0  }
 0x24b   :  { %6557 = vst [vmem:[#allocation18_spill] sm:$0xff] %v5311_v61 }
 0x285   :  { %v290_v62 = vpop.f32.mrb[4].mxu0 }
 0x286   :  { %v307_v0 = vmul.f32 %v5309_v60, %v290_v62  ;;  %v320_v1 = vmul.f32 %v5311_v61, %v290_v62  ;;  %v5317_v2 = vpop.f32.mrb[5].mxu0 }
 0x287   :  { %v294_v3 = vpop.f32.mrb[6].mxu0 }
 0x288   :  { %v308_v4 = vmul.f32 %v5309_v60, %v294_v3  ;;  %v321_v5 = vmul.f32 %v5311_v61, %v294_v3  ;;  %v330_v9 = vadd.f32 %v5313_v63, %v320_v1  ;;  %v5322_v10 = vpop.f32.mrb[7].mxu0  ;;  %v5332_v18 = vadd.f32 %v5329_v17, %v307_v0 }
 0x28a   :  { %v331_v11 = vadd.f32 %v5313_v63, %v321_v5  ;;  %v364_v12 = vand.u32 2147483647, %v330_v9  ;;  %v5335_v20 = vadd.f32 %v5329_v17, %v308_v4  ;;  %v345_v30 = vand.u32 2147483647, %v5332_v18 }
 0x28c   :  { %368 = vrot.lane.b32.xlu1 %v364_v12, %s5120_s3  ;;  %v365_v13 = vand.u32 2147483647, %v331_v11  ;;  %v347_v32 = vsel %vm183_vm1, %v345_v30, 0.0  ;;  %v346_v34 = vand.u32 2147483647, %v5335_v20  ;;  %v6477_v30 = vmov 0.0  }
 0x28d   :  { %4522 = vmatprep.subr.bf16.mxu0 %v6477_v30  ;;  %4534 = vmatprep.subr.bf16.mxu1 %v6477_v30 }
 0x28e   :  { %v350_v35 = vsel %vm183_vm1, %v346_v34, 0.0  ;;  %4524 = vmatprep.mubr.msk.bf16.mxu0 %vm5125_vm2, %v6477_v30  ;;  %4536 = vmatprep.mubr.msk.bf16.mxu1 %vm5125_vm2, %v6477_v30 }
 0x290   :  { %370 = vrot.lane.b32.xlu1 %v365_v13, %s5120_s3 }
 0x2fe   :  { %v369_v19 = vpop.permute.xlu1 %368 }
 0x2ff   :  { %v374_v27 = vsel %vm183_vm1, %v369_v19, 0.0 }
 0x300   :  { %375 = vadd.xlane.f32.xlu1 %v374_v27 }
 0x302   :  { %v371_v31 = vpop.permute.xlu1 %370 }
 0x303   :  { %v377_v33 = vsel %vm183_vm1, %v371_v31, 0.0 }
 0x304   :  { %348 = vadd.xlane.f32.xlu1 %v347_v32  ;;  %378 = vadd.xlane.f32.xlu0 %v377_v33 }
 0x308   :  { %351 = vadd.xlane.f32.xlu1 %v350_v35 }
 0x38d   :  { %v376_v36 = vpop.xlane.xlu1 %375 }
 0x391   :  { %v379_v37 = vpop.xlane.xlu0 %378  ;;  %v349_v38 = vpop.xlane.xlu1 %348 }
 0x392   :  { %v380_v39 = vadd.f32 %v379_v37, %v376_v36 }
 0x394   :  { %v381_v40 = vrot.slane %v380_v39, 4 }
 0x395   :  { %v352_v41 = vpop.xlane.xlu1 %351 }
 0x396   :  { %v382_v42 = vadd.f32 %v381_v40, %v380_v39  ;;  %v353_v43 = vadd.f32 %v352_v41, %v349_v38 }
 0x398   :  { %v383_v45 = vrot.slane %v382_v42, 2  ;;  %v354_v46 = vrot.slane %v353_v43, 4 }
 0x39a   :  { %v384_v49 = vadd.f32 %v383_v45, %v382_v42  ;;  %v355_v50 = vadd.f32 %v354_v46, %v353_v43 }
 0x39c   :  { %v385_v51 = vrot.slane %v384_v49, 1  ;;  %v356_v52 = vrot.slane %v355_v50, 2 }
 0x39e   :  { %v386_v53 = vadd.f32 %v385_v51, %v384_v49  ;;  %v357_v54 = vadd.f32 %v356_v52, %v355_v50 }
 0x3a0   :  { %v387_v55 = vmul.f32 0.0009765625, %v386_v53  ;;  %v358_v56 = vrot.slane %v357_v54, 1 }
 0x3a2   :  { %v388_v57 = vmul.f32 2.0, %v387_v55  ;;  %v359_v58 = vadd.f32 %v358_v56, %v357_v54 }
 0x3a4   :  { %v389_v59 = vmul.f32 0.3779645, %v388_v57  ;;  %v360_v62 = vmul.f32 0.0009765625, %v359_v58 }
 0x3a6   :  { %v390_v0 = vmax.f32 %v389_v59, 1e-05  ;;  %v361_v1 = vmul.f32 2.0, %v360_v62 }
 0x3a8   :  { %4942 = vrcp.f32 %v390_v0  ;;  %v362_v3 = vmul.f32 0.3779645, %v361_v1 }
 0x3aa   :  { %v363_v4 = vmax.f32 %v362_v3, 1e-05 }
 0x3ac   :  { %v5343_v5 = vmul.f32 %v390_v0, %v363_v4  ;;  %4944 = vrcp.f32 %v363_v4 }
 0x3b2   :  { %v5345_v12 = vpop.eup %4942 }
 0x3b3   :  { %6560 = vst [vmem:[#allocation21_spill] sm:$0xff] %v5345_v12  ;;  %v449_v13 = vmul.f32 %v5345_v12, %v331_v11  ;;  %v448_v14 = vmul.f32 %v5345_v12, %v330_v9 }
 0x3b5   :  { %v4801_v19 = vround.rtne.f32 %v449_v13  ;;  %v4800_v27 = vround.rtne.f32 %v448_v14 }
 0x3b6   :  { %v5363_v35 = vpop.eup %4944 }
 0x3b7   :  { %v453_v31 = vmax.f32 %v4801_v19, -8.0  ;;  %v452_v32 = vmax.f32 %v4800_v27, -8.0  ;;  %6561 = vst [vmem:[#allocation22_spill] sm:$0xff] %v5363_v35  ;;  %v411_v36 = vmul.f32 %v5363_v35, %v5332_v18  ;;  %v412_v37 = vmul.f32 %v5363_v35, %v5335_v20 }
 0x3b9   :  { %v455_v33 = vmin.f32 %v453_v31, 7.0  ;;  %v454_v34 = vmin.f32 %v452_v32, 7.0  ;;  %v4798_v38 = vround.rtne.f32 %v411_v36  ;;  %v4799_v39 = vround.rtne.f32 %v412_v37 }
 0x3bb   :  { %461 = vrot.lane.b32.xlu0 %v455_v33, %s5124_s28  ;;  %457 = vrot.lane.b32.xlu1 %v454_v34, %s5124_s28  ;;  %v476_v9 = vpack.c.bf16 %v454_v34, %v454_v34  ;;  %v477_v11 = vpack.c.bf16 %v455_v33, %v455_v33  ;;  %v415_v40 = vmax.f32 %v4798_v38, -8.0  ;;  %v416_v41 = vmax.f32 %v4799_v39, -8.0 }
 0x3bd   :  { %v417_v49 = vmin.f32 %v415_v40, 7.0  ;;  %v418_v50 = vmin.f32 %v416_v41, 7.0 }
 0x3bf   :  { %470 = vrot.lane.b32.xlu0 %v454_v34, %s5126_s29  ;;  %464 = vrot.lane.b32.xlu1 %v454_v34, %s5127_s1  ;;  %v4902_v53 = vpack.i.bf16 %v418_v50, %v417_v49  ;;  %v439_v62 = vpack.c.bf16 %v417_v49, %v417_v49  ;;  %v440_v3 = vpack.c.bf16 %v418_v50, %v418_v50 }
 0x3c3   :  { %467 = vrot.lane.b32.xlu1 %v455_v33, %s5127_s1  ;;  %522 = vrot.lane.b32.xlu0 %v476_v9, %s5120_s3 }
 0x3c7   :  { %473 = vrot.lane.b32.xlu1 %v455_v33, %s5126_s29 }
 0x3cb   :  { %571 = vrot.lane.b32.xlu1 %v477_v11, %s5120_s3 }
 0x42d   :  { %v462_v42 = vpop.permute.xlu0 %461  ;;  %v458_v43 = vpop.permute.xlu1 %457 }
 0x42e   :  { %v479_v45 = vpack.c.bf16 %v462_v42, %v462_v42  ;;  %v478_v46 = vpack.c.bf16 %v458_v43, %v458_v43 }
 0x430   :  { %669 = vrot.lane.b32.xlu1 %v479_v45, %s5120_s3  ;;  %620 = vrot.lane.b32.xlu0 %v478_v46, %s5120_s3 }
 0x431   :  { %v471_v51 = vpop.permute.xlu0 %470  ;;  %v465_v52 = vpop.permute.xlu1 %464 }
 0x432   :  { %v480_v18 = vpack.c.bf16 %v465_v52, %v465_v52  ;;  %v482_v58 = vpack.c.bf16 %v471_v51, %v471_v51 }
 0x434   :  { %4903 = vrot.lane.b32.xlu0 %v4902_v53, %s5124_s28  ;;  %718 = vrot.lane.b32.xlu1 %v480_v18, %s5120_s3 }
 0x435   :  { %v523_v20 = vpop.permute.xlu0 %522  ;;  %v468_v54 = vpop.permute.xlu1 %467 }
 0x436   :  { %v528_v55 = vsel %vm97_vm0, %v523_v20, 0  ;;  %v481_v56 = vpack.c.bf16 %v468_v54, %v468_v54 }
 0x437   :  { %4523 = vmatpush3.bf16.xpose.msra.mxu0 %v528_v55 }
 0x438   :  { %4908 = vrot.lane.b32.xlu1 %v4902_v53, %s5127_s1  ;;  %767 = vrot.lane.b32.xlu0 %v481_v56, %s5120_s3  ;;  %v5420_v53 = vmul.f32 0.25, %v5343_v5 }
 0x439   :  { %v474_v57 = vpop.permute.xlu1 %473  ;;  %4528 = vmatprep.subr.bf16.mxu0 %v6477_v30 }
 0x43a   :  { %v483_v59 = vpack.c.bf16 %v474_v57, %v474_v57  ;;  %6562 = vst [vmem:[#allocation23_spill] sm:$0xff] %v5420_v53 }
 0x43c   :  { %816 = vrot.lane.b32.xlu0 %v482_v58, %s5120_s3  ;;  %865 = vrot.lane.b32.xlu1 %v483_v59, %s5120_s3  ;;  %s5132_s3 = smov 124  }
 0x43d   :  { %v572_v0 = vpop.permute.xlu1 %571 }
 0x43e   :  { %v577_v1 = vsel %vm97_vm0, %v572_v0, 0  ;;  %4525 = vmatmul.mubr.msk.bf16.vlgmr.msra.gmra.mrb[8].mxu0 %vm97_vm0, %v439_v62 }
 0x43f   :  { %4529 = vmatpush3.bf16.xpose.msra.mxu0 %v577_v1  ;;  %4530 = vmatprep.mubr.msk.bf16.mxu0 %vm5125_vm2, %v6477_v30 }
 0x440   :  { %433 = vrot.lane.b32.xlu0 %v417_v49, %s5126_s29  ;;  %436 = vrot.lane.b32.xlu1 %v418_v50, %s5126_s29 }
 0x441   :  { %4540 = vmatprep.subr.bf16.mxu0 %v6477_v30 }
 0x446   :  { %4531 = vmatmul.mubr.msk.bf16.vlgmr.msra.gmra.mrb[12].mxu0 %vm97_vm0, %v440_v3 }
 0x447   :  { %4542 = vmatprep.mubr.msk.bf16.mxu0 %vm5125_vm2, %v6477_v30 }
 0x4a2   :  { %v621_v4 = vpop.permute.xlu0 %620  ;;  %v670_v13 = vpop.permute.xlu1 %669 }
 0x4a3   :  { %v675_v14 = vsel %vm97_vm0, %v670_v13, 0  ;;  %v626_v19 = vsel %vm97_vm0, %v621_v4, 0 }
 0x4a4   :  { %4535 = vmatpush3.bf16.xpose.msra.mxu1 %v626_v19  ;;  %4541 = vmatpush3.bf16.xpose.msra.mxu0 %v675_v14 }
 0x4a5   :  { %4546 = vmatprep.subr.bf16.mxu1 %v6477_v30  ;;  %4552 = vmatprep.subr.bf16.mxu0 %v6477_v30 }
 0x4a6   :  { %v4904_v27 = vpop.permute.xlu0 %4903  ;;  %v719_v31 = vpop.permute.xlu1 %718 }
 0x4a7   :  { %v4906_v32 = vunpack.i.h.bf16 %v4904_v27  ;;  %v4905_v33 = vunpack.i.l.bf16 %v4904_v27  ;;  %v724_v37 = vsel %vm97_vm0, %v719_v31, 0 }
 0x4a9   :  { %v442_v34 = vpack.c.bf16 %v4906_v32, %v4906_v32  ;;  %v441_v9 = vpack.c.bf16 %v4905_v33, %v4905_v33 }
 0x4aa   :  { %v768_v11 = vpop.permute.xlu0 %767  ;;  %v4909_v36 = vpop.permute.xlu1 %4908 }
 0x4ab   :  { %v773_v38 = vsel %vm97_vm0, %v768_v11, 0  ;;  %4537 = vmatmul.mubr.msk.bf16.vlgmr.msra.gmra.mrb[0].mxu1 %vm97_vm0, %v441_v9  ;;  %4543 = vmatmul.mubr.msk.bf16.vlgmr.msra.gmra.mrb[16].mxu0 %vm97_vm0, %v442_v34  ;;  %v4911_v39 = vunpack.i.h.bf16 %v4909_v36  ;;  %v4910_v40 = vunpack.i.l.bf16 %v4909_v36 }
 0x4ac   :  { %4547 = vmatpush3.bf16.xpose.msra.mxu1 %v724_v37  ;;  %4553 = vmatpush3.bf16.xpose.msra.mxu0 %v773_v38 }
 0x4ad   :  { %4548 = vmatprep.mubr.msk.bf16.mxu1 %vm5125_vm2, %v6477_v30  ;;  %4554 = vmatprep.mubr.msk.bf16.mxu0 %vm5125_vm2, %v6477_v30  ;;  %v444_v43 = vpack.c.bf16 %v4911_v39, %v4911_v39  ;;  %v443_v45 = vpack.c.bf16 %v4910_v40, %v4910_v40 }
 0x4ae   :  { %4558 = vmatprep.subr.bf16.mxu1 %v6477_v30  ;;  %4564 = vmatprep.subr.bf16.mxu0 %v6477_v30  ;;  %v817_v41 = vpop.permute.xlu0 %816  ;;  %v866_v42 = vpop.permute.xlu1 %865 }
 0x4af   :  { %v822_v46 = vsel %vm97_vm0, %v817_v41, 0  ;;  %v871_v49 = vsel %vm97_vm0, %v866_v42, 0 }
 0x4b2   :  { %v434_v50 = vpop.permute.xlu0 %433  ;;  %v437_v51 = vpop.permute.xlu1 %436 }
 0x4b3   :  { %4549 = vmatmul.mubr.msk.bf16.vlgmr.msra.gmra.mrb[4].mxu1 %vm97_vm0, %v443_v45  ;;  %4555 = vmatmul.mubr.msk.bf16.vlgmr.msra.gmra.mrb[20].mxu0 %vm97_vm0, %v444_v43  ;;  %v445_v52 = vpack.c.bf16 %v434_v50, %v434_v50  ;;  %v446_v18 = vpack.c.bf16 %v437_v51, %v437_v51 }
 0x4b4   :  { %4559 = vmatpush3.bf16.xpose.msra.mxu1 %v822_v46  ;;  %4565 = vmatpush3.bf16.xpose.msra.mxu0 %v871_v49 }
 0x4b5   :  { %4560 = vmatprep.mubr.msk.bf16.mxu1 %vm5125_vm2, %v6477_v30  ;;  %4566 = vmatprep.mubr.msk.bf16.mxu0 %vm5125_vm2, %v6477_v30 }
 0x4b6   :  { %4570 = vmatprep.subr.mxu1 %v6477_v30  ;;  %4575 = vmatprep.subr.mxu0 %v6477_v30 }
 0x4bb   :  { %4561 = vmatmul.mubr.msk.bf16.vlgmr.msra.gmra.mrb[8].mxu1 %vm97_vm0, %v445_v52  ;;  %4567 = vmatmul.mubr.msk.bf16.vlgmr.msra.gmra.mrb[24].mxu0 %vm97_vm0, %v446_v18 }
 0x4bc   :  { %4572 = vmatprep.mubr.msk.f32.mxu1 %vm5125_vm2, %v6477_v30  ;;  %4577 = vmatprep.mubr.msk.f32.mxu0 %vm5125_vm2, %v6477_v30 }
 0x511   :  { %v564_v20 = vpop.f32.mrb[8].mxu0 }
 0x512   :  { %v915_v54 = vmul.f32 %v5420_v53, %v564_v20  ;;  %v4526_v55 = vpop.f32.mrb[9].mxu0 }
 0x513   :  { %v567_v56 = vpop.f32.mrb[10].mxu0 }
 0x514   :  { %v4527_v57 = vpop.f32.mrb[11].mxu0  ;;  %v924_v58 = vsel %vm923_vm3, %v915_v54, -inf }
 0x515   :  { %925 = vmax.xlane.f32.xlu0 %v924_v58 }
 0x519   :  { %v613_v59 = vpop.f32.mrb[12].mxu0 }
 0x51a   :  { %v916_v62 = vmul.f32 %v5420_v53, %v613_v59  ;;  %v4532_v0 = vpop.f32.mrb[13].mxu0 }
 0x51b   :  { %v616_v1 = vpop.f32.mrb[14].mxu0 }
 0x51c   :  { %v4533_v3 = vpop.f32.mrb[15].mxu0  ;;  %v927_v4 = vsel %vm923_vm3, %v916_v62, -inf }
 0x51d   :  { %928 = vmax.xlane.f32.xlu1 %v927_v4 }
 0x57e   :  { %v662_v5 = vpop.f32.mrb[0].mxu1  ;;  %v711_v13 = vpop.f32.mrb[16].mxu0 }
 0x57f   :  { %v917_v14 = vmul.f32 %v5420_v53, %v662_v5  ;;  %v4538_v19 = vpop.f32.mrb[1].mxu1  ;;  %v4544_v27 = vpop.f32.mrb[17].mxu0  ;;  %v918_v33 = vmul.f32 %v5420_v53, %v711_v13 }
 0x580   :  { %v665_v31 = vpop.f32.mrb[2].mxu1  ;;  %v714_v32 = vpop.f32.mrb[18].mxu0 }
 0x581   :  { %v4539_v34 = vpop.f32.mrb[3].mxu1  ;;  %v4545_v9 = vpop.f32.mrb[19].mxu0  ;;  %v930_v11 = vsel %vm923_vm3, %v917_v14, -inf  ;;  %v933_v36 = vsel %vm923_vm3, %v918_v33, -inf }
 0x582   :  { %931 = vmax.xlane.f32.xlu0 %v930_v11 }
 0x586   :  { %934 = vmax.xlane.f32.xlu0 %v933_v36  ;;  %v760_v37 = vpop.f32.mrb[4].mxu1  ;;  %v809_v38 = vpop.f32.mrb[20].mxu0 }
 0x587   :  { %v919_v39 = vmul.f32 %v5420_v53, %v760_v37  ;;  %v920_v40 = vmul.f32 %v5420_v53, %v809_v38  ;;  %v4550_v41 = vpop.f32.mrb[5].mxu1  ;;  %v4556_v42 = vpop.f32.mrb[21].mxu0 }
 0x588   :  { %v763_v43 = vpop.f32.mrb[6].mxu1  ;;  %v812_v45 = vpop.f32.mrb[22].mxu0 }
 0x589   :  { %v4551_v46 = vpop.f32.mrb[7].mxu1  ;;  %v4557_v49 = vpop.f32.mrb[23].mxu0  ;;  %v939_v50 = vsel %vm923_vm3, %v920_v40, -inf  ;;  %v936_v51 = vsel %vm923_vm3, %v919_v39, -inf }
 0x58a   :  { %940 = vmax.xlane.f32.xlu0 %v939_v50  ;;  %937 = vmax.xlane.f32.xlu1 %v936_v51 }
 0x58e   :  { %v858_v52 = vpop.f32.mrb[8].mxu1  ;;  %v907_v18 = vpop.f32.mrb[24].mxu0 }
 0x58f   :  { %v921_v20 = vmul.f32 %v5420_v53, %v858_v52  ;;  %v922_v55 = vmul.f32 %v5420_v53, %v907_v18  ;;  %v4562_v56 = vpop.f32.mrb[9].mxu1  ;;  %v4568_v57 = vpop.f32.mrb[25].mxu0 }
 0x590   :  { %v861_v58 = vpop.f32.mrb[10].mxu1  ;;  %v910_v59 = vpop.f32.mrb[26].mxu0 }
 0x591   :  { %v4563_v0 = vpop.f32.mrb[11].mxu1  ;;  %v4569_v1 = vpop.f32.mrb[27].mxu0  ;;  %v945_v3 = vsel %vm923_vm3, %v922_v55, -inf  ;;  %v942_v4 = vsel %vm923_vm3, %v921_v20, -inf }
 0x592   :  { %946 = vmax.xlane.f32.xlu0 %v945_v3  ;;  %943 = vmax.xlane.f32.xlu1 %v942_v4 }
 0x5a2   :  { %v926_v5 = vpop.xlane.xlu0 %925 }
 0x5a3   :  { %v948_v13 = vsub.f32 %v915_v54, %v926_v5  ;;  %332 = vrot.lane.b32.xlu1 %v5298_v47, %s5128_s30 }
 0x5a5   :  { %v956_v19 = vmul.f32 1.442695, %v948_v13 }
 0x5a7   :  { %4946 = vpow2.f32 %v956_v19 }
 0x5aa   :  { %v929_v27 = vpop.xlane.xlu1 %928 }
 0x5ab   :  { %v949_v31 = vsub.f32 %v916_v62, %v929_v27 }
 0x5ad   :  { %v958_v32 = vmul.f32 1.442695, %v949_v31  ;;  %v5468_v31 = vrot.slane %v5295_v44, %v95_v7 }
 0x5af   :  { %4948 = vpow2.f32 %v958_v32  ;;  %6563 = vst [vmem:[#allocation24_spill] sm:$0xff] %v5468_v31 }
 0x5b1   :  { %v5439_v34 = vpop.eup %4946 }
 0x5b2   :  { %v972_v9 = vsel %vm923_vm3, %v5439_v34, 0.0 }
 0x5b3   :  { %973 = vadd.xlane.f32.xlu0 %v972_v9 }
 0x5b9   :  { %v5443_v11 = vpop.eup %4948 }
 0x5ba   :  { %v975_v54 = vsel %vm923_vm3, %v5443_v11, 0.0 }
 0x5bb   :  { %976 = vadd.xlane.f32.xlu0 %v975_v54 }
 0x60f   :  { %v932_v36 = vpop.xlane.xlu0 %931 }
 0x610   :  { %v950_v47 = vsub.f32 %v917_v14, %v932_v36 }
 0x612   :  { %v960_v37 = vmul.f32 1.442695, %v950_v47 }
 0x613   :  { %v935_v38 = vpop.xlane.xlu0 %934 }
 0x614   :  { %4950 = vpow2.f32 %v960_v37  ;;  %v951_v62 = vsub.f32 %v918_v33, %v935_v38 }
 0x616   :  { %v962_v41 = vmul.f32 1.442695, %v951_v62 }
 0x617   :  { %v941_v42 = vpop.xlane.xlu0 %940  ;;  %v938_v43 = vpop.xlane.xlu1 %937 }
 0x618   :  { %4952 = vpow2.f32 %v962_v41  ;;  %v953_v45 = vsub.f32 %v920_v40, %v941_v42  ;;  %v952_v46 = vsub.f32 %v919_v39, %v938_v43 }
 0x61a   :  { %v966_v49 = vmul.f32 1.442695, %v953_v45  ;;  %v964_v50 = vmul.f32 1.442695, %v952_v46 }
 0x61c   :  { %4954 = vpow2.f32 %v966_v49 }
 0x61d   :  { %4956 = vpow2.f32 %v964_v50 }
 0x61e   :  { %v5447_v51 = vpop.eup %4950 }
 0x61f   :  { %v947_v52 = vpop.xlane.xlu0 %946  ;;  %v944_v18 = vpop.xlane.xlu1 %943  ;;  %v978_v14 = vsel %vm923_vm3, %v5447_v51, 0.0 }
 0x620   :  { %v955_v56 = vsub.f32 %v922_v55, %v947_v52  ;;  %v954_v57 = vsub.f32 %v921_v20, %v944_v18  ;;  %979 = vadd.xlane.f32.xlu0 %v978_v14 }
 0x622   :  { %v4953_v33 = vpop.eup %4952  ;;  %v968_v58 = vmul.f32 1.442695, %v954_v57  ;;  %v970_v59 = vmul.f32 1.442695, %v955_v56 }
 0x623   :  { %v333_v0 = vpop.permute.xlu1 %332  ;;  %v981_v39 = vsel %vm923_vm3, %v4953_v33, 0.0 }
 0x624   :  { %982 = vadd.xlane.f32.xlu0 %v981_v39  ;;  %4796 = vpush %v333_v0  ;;  %4958 = vpow2.f32 %v968_v58 }
 0x625   :  { %4960 = vpow2.f32 %v970_v59 }
 0x626   :  { %v4955_v40 = vpop.eup %4954 }
 0x627   :  { %v5452_v1 = vpop.eup %4956  ;;  %v987_v3 = vsel %vm923_vm3, %v4955_v40, 0.0 }
 0x628   :  { %v984_v55 = vsel %vm923_vm3, %v5452_v1, 0.0  ;;  %988 = vadd.xlane.f32.xlu1 %v987_v3 }
 0x629   :  { %985 = vadd.xlane.f32.xlu0 %v984_v55 }
 0x62e   :  { %v5457_v20 = vpop.eup %4958 }
 0x62f   :  { %v990_v4 = vsel %vm923_vm3, %v5457_v20, 0.0  ;;  %v5461_v5 = vpop.eup %4960 }
 0x630   :  { %991 = vadd.xlane.f32.xlu0 %v990_v4  ;;  %v993_v13 = vsel %vm923_vm3, %v5461_v5, 0.0 }
 0x634   :  { %994 = vadd.xlane.f32.xlu0 %v993_v13 }
 0x640   :  { %v974_v19 = vpop.xlane.xlu0 %973 }
 0x641   :  { %4962 = vrcp.f32 %v974_v19 }
 0x648   :  { %v977_v27 = vpop.xlane.xlu0 %976 }
 0x649   :  { %4964 = vrcp.f32 %v977_v27 }
 0x64b   :  { %v4963_v37 = vpop.eup %4962 }
 0x64c   :  { %v5486_v41 = vmul.f32 %v4963_v37, %v5439_v34 }
 0x64e   :  { %v1091_v42 = vand.u32 2147483647, %v5486_v41 }
 0x650   :  { %v1099_v45 = vsel %vm923_vm3, %v1091_v42, 0.0 }
 0x655   :  { %s4797_s10 = spop %4796 }
 0x656   :  { %v5470_v32 = vstv %s4797_s10 }
 0x657   :  { %6564 = vst [vmem:[#allocation25_spill] sm:$0xff] %v5470_v32  ;;  %v337_v9 = vmul.f32 %v5470_v32, %v5317_v2  ;;  %v338_v54 = vmul.f32 %v5470_v32, %v5322_v10  ;;  %v4965_v2 = vpop.eup %4964 }
 0x658   :  { %v5491_v43 = vmul.f32 %v4965_v2, %v5443_v11 }
 0x659   :  { %v5477_v36 = vadd.f32 %v5468_v31, %v337_v9  ;;  %v5480_v47 = vadd.f32 %v5468_v31, %v338_v54 }
 0x65a   :  { %v1092_v46 = vand.u32 2147483647, %v5491_v43 }
 0x65b   :  { %v391_v38 = vand.u32 2147483647, %v5477_v36  ;;  %v392_v62 = vand.u32 2147483647, %v5480_v47 }
 0x65c   :  { %v1102_v49 = vsel %vm923_vm3, %v1092_v46, 0.0 }
 0x65d   :  { %v393_v7 = vsel %vm183_vm1, %v391_v38, 0.0  ;;  %v396_v10 = vsel %vm183_vm1, %v392_v62, 0.0 }
 0x65e   :  { %394 = vadd.xlane.f32.xlu0 %v393_v7 }
 0x662   :  { %397 = vadd.xlane.f32.xlu0 %v396_v10  ;;  %v1012_v10 = vsel %vm923_vm3, %v5486_v41, inf }
 0x666   :  { %1100 = vadd.xlane.f32.xlu0 %v1099_v45  ;;  %v1015_v45 = vsel %vm923_vm3, %v5491_v43, inf }
 0x66a   :  { %1103 = vadd.xlane.f32.xlu0 %v1102_v49 }
 0x6ad   :  { %v980_v34 = vpop.xlane.xlu0 %979 }
 0x6ae   :  { %4966 = vrcp.f32 %v980_v34 }
 0x6b1   :  { %v983_v50 = vpop.xlane.xlu0 %982 }
 0x6b2   :  { %4968 = vrcp.f32 %v983_v50 }
 0x6b5   :  { %v989_v52 = vpop.xlane.xlu1 %988 }
 0x6b6   :  { %v986_v18 = vpop.xlane.xlu0 %985  ;;  %4970 = vrcp.f32 %v989_v52 }
 0x6b7   :  { %4972 = vrcp.f32 %v986_v18 }
 0x6b8   :  { %v4967_v14 = vpop.eup %4966 }
 0x6b9   :  { %v5497_v11 = vmul.f32 %v4967_v14, %v5447_v51 }
 0x6bb   :  { %v1093_v56 = vand.u32 2147483647, %v5497_v11 }
 0x6bc   :  { %v4969_v57 = vpop.eup %4968 }
 0x6bd   :  { %v1105_v58 = vsel %vm923_vm3, %v1093_v56, 0.0  ;;  %v5501_v59 = vmul.f32 %v4969_v57, %v4953_v33  ;;  %v992_v0 = vpop.xlane.xlu0 %991 }
 0x6be   :  { %1106 = vadd.xlane.f32.xlu0 %v1105_v58  ;;  %4974 = vrcp.f32 %v992_v0 }
 0x6bf   :  { %v1094_v39 = vand.u32 2147483647, %v5501_v59  ;;  %v1021_v46 = vsel %vm923_vm3, %v5501_v59, inf }
 0x6c0   :  { %v4971_v3 = vpop.eup %4970 }
 0x6c1   :  { %v4973_v55 = vpop.eup %4972  ;;  %v1108_v4 = vsel %vm923_vm3, %v1094_v39, 0.0  ;;  %v5505_v13 = vmul.f32 %v4971_v3, %v4955_v40  ;;  %v995_v51 = vpop.xlane.xlu0 %994 }
 0x6c2   :  { %1109 = vadd.xlane.f32.xlu0 %v1108_v4  ;;  %v5508_v19 = vmul.f32 %v4973_v55, %v5452_v1  ;;  %4976 = vrcp.f32 %v995_v51 }
 0x6c3   :  { %v1096_v33 = vand.u32 2147483647, %v5505_v13  ;;  %v1027_v34 = vsel %vm923_vm3, %v5505_v13, inf }
 0x6c4   :  { %v1095_v27 = vand.u32 2147483647, %v5508_v19 }
 0x6c5   :  { %v1114_v9 = vsel %vm923_vm3, %v1096_v33, 0.0 }
 0x6c6   :  { %v1111_v54 = vsel %vm923_vm3, %v1095_v27, 0.0  ;;  %1115 = vadd.xlane.f32.xlu1 %v1114_v9 }
 0x6c7   :  { %1112 = vadd.xlane.f32.xlu0 %v1111_v54 }
 0x6c8   :  { %v4975_v37 = vpop.eup %4974 }
 0x6c9   :  { %v5515_v40 = vmul.f32 %v4975_v37, %v5457_v20  ;;  %v1018_v20 = vsel %vm923_vm3, %v5497_v11, inf }
 0x6cb   :  { %v1097_v38 = vand.u32 2147483647, %v5515_v40  ;;  %v1030_v49 = vsel %vm923_vm3, %v5515_v40, inf }
 0x6cc   :  { %v4977_v7 = vpop.eup %4976 }
 0x6cd   :  { %v1117_v1 = vsel %vm923_vm3, %v1097_v38, 0.0  ;;  %v5520_v62 = vmul.f32 %v4977_v7, %v5461_v5  ;;  %v1024_v5 = vsel %vm923_vm3, %v5508_v19, inf }
 0x6ce   :  { %1118 = vadd.xlane.f32.xlu0 %v1117_v1 }
 0x6cf   :  { %v1098_v2 = vand.u32 2147483647, %v5520_v62  ;;  %v1033_v50 = vsel %vm923_vm3, %v5520_v62, inf }
 0x6d1   :  { %v1120_v42 = vsel %vm923_vm3, %v1098_v2, 0.0 }
 0x6d2   :  { %1013 = vmin.xlane.f32.xlu0 %v1012_v10  ;;  %1121 = vadd.xlane.f32.xlu1 %v1120_v42 }
 0x6d6   :  { %1019 = vmin.xlane.f32.xlu0 %v1018_v20  ;;  %1016 = vmin.xlane.f32.xlu1 %v1015_v45 }
 0x6da   :  { %1025 = vmin.xlane.f32.xlu0 %v1024_v5  ;;  %1022 = vmin.xlane.f32.xlu1 %v1021_v46 }
 0x6de   :  { %1031 = vmin.xlane.f32.xlu0 %v1030_v49  ;;  %1028 = vmin.xlane.f32.xlu1 %v1027_v34 }
 0x6e2   :  { %1034 = vmin.xlane.f32.xlu1 %v1033_v50 }
 0x6eb   :  { %v395_v52 = vpop.xlane.xlu0 %394 }
 0x6ef   :  { %v398_v18 = vpop.xlane.xlu0 %397 }
 0x6f0   :  { %v399_v14 = vadd.f32 %v398_v18, %v395_v52 }
 0x6f2   :  { %v400_v56 = vrot.slane %v399_v14, 4 }
 0x6f4   :  { %v401_v57 = vadd.f32 %v400_v56, %v399_v14 }
 0x6f6   :  { %v402_v58 = vrot.slane %v401_v57, 2 }
 0x6f8   :  { %v403_v0 = vadd.f32 %v402_v58, %v401_v57 }
 0x6fa   :  { %v404_v39 = vrot.slane %v403_v0, 1 }
 0x6fc   :  { %v405_v3 = vadd.f32 %v404_v39, %v403_v0 }
 0x6fe   :  { %v406_v55 = vmul.f32 0.0009765625, %v405_v3 }
 0x700   :  { %v407_v4 = vmul.f32 2.0, %v406_v55 }
 0x702   :  { %v408_v51 = vmul.f32 0.3779645, %v407_v4 }
 0x704   :  { %v5540_v33 = vmax.f32 %v408_v51, 1e-05 }
 0x706   :  { %4978 = vrcp.f32 %v5540_v33 }
 0x710   :  { %v5543_v27 = vpop.eup %4978 }
 0x711   :  { %6565 = vst [vmem:[#allocation26_spill] sm:$0xff] %v5543_v27  ;;  %v485_v9 = vmul.f32 %v5543_v27, %v5477_v36  ;;  %v486_v54 = vmul.f32 %v5543_v27, %v5480_v47  ;;  %v1101_v36 = vpop.xlane.xlu0 %1100 }
 0x712   :  { %v1123_v5 = vrot.slane %v1101_v36, 4 }
 0x713   :  { %v4802_v37 = vround.rtne.f32 %v485_v9  ;;  %v4803_v38 = vround.rtne.f32 %v486_v54 }
 0x714   :  { %v1124_v50 = vadd.f32 %v1123_v5, %v1101_v36 }
 0x715   :  { %v489_v7 = vmax.f32 %v4802_v37, -8.0  ;;  %v490_v1 = vmax.f32 %v4803_v38, -8.0  ;;  %v1104_v47 = vpop.xlane.xlu0 %1103 }
 0x716   :  { %v1129_v45 = vrot.slane %v1104_v47, 4  ;;  %v1125_v57 = vrot.slane %v1124_v50, 2 }
 0x717   :  { %v491_v2 = vmin.f32 %v489_v7, 7.0  ;;  %v492_v10 = vmin.f32 %v490_v1, 7.0 }
 0x718   :  { %v1130_v46 = vadd.f32 %v1129_v45, %v1104_v47  ;;  %v1126_v9 = vadd.f32 %v1125_v57, %v1124_v50 }
 0x719   :  { %494 = vrot.lane.b32.xlu0 %v491_v2, %s5124_s28  ;;  %498 = vrot.lane.b32.xlu1 %v492_v10, %s5124_s28  ;;  %v513_v42 = vmul.f32 %v491_v2, %v5540_v33  ;;  %v514_v20 = vmul.f32 %v492_v10, %v5540_v33 }
 0x71a   :  { %v1131_v18 = vrot.slane %v1130_v46, 2 }
 0x71b   :  { %4571 = vmatpush3.msra.mxu1 %v513_v42  ;;  %4576 = vmatpush3.msra.mxu0 %v514_v20 }
 0x71c   :  { %4580 = vmatprep.subr.mxu1 %v6477_v30  ;;  %4585 = vmatprep.subr.mxu0 %v6477_v30  ;;  %v1132_v39 = vadd.f32 %v1131_v18, %v1130_v46 }
 0x71d   :  { %507 = vrot.lane.b32.xlu0 %v491_v2, %s5126_s29  ;;  %501 = vrot.lane.b32.xlu1 %v491_v2, %s5127_s1 }
 0x71e   :  { %v1133_v38 = vrot.slane %v1132_v39, 1 }
 0x720   :  { %v1134_v36 = vadd.f32 %v1133_v38, %v1132_v39 }
 0x721   :  { %504 = vrot.lane.b32.xlu1 %v492_v10, %s5127_s1 }
 0x725   :  { %510 = vrot.lane.b32.xlu1 %v492_v10, %s5126_s29  ;;  %v1127_v10 = vrot.slane %v1126_v9, 1 }
 0x727   :  { %v1128_v46 = vadd.f32 %v1127_v10, %v1126_v9 }
 0x74b   :  { %v1107_v49 = vpop.xlane.xlu0 %1106 }
 0x74c   :  { %v1135_v34 = vrot.slane %v1107_v49, 4 }
 0x74e   :  { %v1136_v52 = vadd.f32 %v1135_v34, %v1107_v49 }
 0x74f   :  { %v1110_v14 = vpop.xlane.xlu0 %1109 }
 0x750   :  { %v1141_v56 = vrot.slane %v1110_v14, 4  ;;  %v1137_v58 = vrot.slane %v1136_v52, 2 }
 0x752   :  { %v1142_v0 = vadd.f32 %v1141_v56, %v1110_v14  ;;  %v1138_v54 = vadd.f32 %v1137_v58, %v1136_v52  ;;  %v1171_v56 = vadd.f32 %v1134_v36, %v1128_v46 }
 0x753   :  { %v1116_v3 = vpop.xlane.xlu1 %1115 }
 0x754   :  { %v1143_v55 = vrot.slane %v1142_v0, 2  ;;  %v1113_v4 = vpop.xlane.xlu0 %1112  ;;  %v1153_v51 = vrot.slane %v1116_v3, 4  ;;  %v1139_v42 = vrot.slane %v1138_v54, 1 }
 0x755   :  { %v1147_v37 = vrot.slane %v1113_v4, 4 }
 0x756   :  { %v1144_v7 = vadd.f32 %v1143_v55, %v1142_v0  ;;  %v1154_v2 = vadd.f32 %v1153_v51, %v1116_v3  ;;  %v1140_v34 = vadd.f32 %v1139_v42, %v1138_v54 }
 0x757   :  { %v1148_v1 = vadd.f32 %v1147_v37, %v1113_v4 }
 0x758   :  { %v1145_v47 = vrot.slane %v1144_v7, 1  ;;  %v1155_v5 = vrot.slane %v1154_v2, 2  ;;  %v1172_v55 = vadd.f32 %v1171_v56, %v1140_v34 }
 0x759   :  { %v1149_v20 = vrot.slane %v1148_v1, 2 }
 0x75a   :  { %v1146_v50 = vadd.f32 %v1145_v47, %v1144_v7  ;;  %v1156_v52 = vadd.f32 %v1155_v5, %v1154_v2 }
 0x75b   :  { %v1150_v45 = vadd.f32 %v1149_v20, %v1148_v1  ;;  %v1119_v49 = vpop.xlane.xlu0 %1118 }
 0x75c   :  { %v1159_v14 = vrot.slane %v1119_v49, 4  ;;  %v1173_v37 = vadd.f32 %v1172_v55, %v1146_v50  ;;  %v1157_v39 = vrot.slane %v1156_v52, 1 }
 0x75d   :  { %v1151_v18 = vrot.slane %v1150_v45, 1 }
 0x75e   :  { %v1160_v57 = vadd.f32 %v1159_v14, %v1119_v49  ;;  %v1158_v2 = vadd.f32 %v1157_v39, %v1156_v52 }
 0x75f   :  { %v1014_v58 = vpop.xlane.xlu0 %1013  ;;  %v1122_v0 = vpop.xlane.xlu1 %1121  ;;  %v1152_v3 = vadd.f32 %v1151_v18, %v1150_v45 }
 0x760   :  { %v1161_v4 = vrot.slane %v1160_v57, 2  ;;  %v1165_v51 = vrot.slane %v1122_v0, 4  ;;  %v1036_v42 = vrot.slane %v1014_v58, 4 }
 0x761   :  { %v1174_v9 = vadd.f32 %v1173_v37, %v1152_v3 }
 0x762   :  { %v1162_v38 = vadd.f32 %v1161_v4, %v1160_v57  ;;  %v1166_v1 = vadd.f32 %v1165_v51, %v1122_v0  ;;  %v1037_v14 = vmin.f32 %v1014_v58, %v1036_v42 }
 0x763   :  { %v1020_v20 = vpop.xlane.xlu0 %1019  ;;  %v1017_v30 = vpop.xlane.xlu1 %1016  ;;  %v1175_v34 = vadd.f32 %v1174_v9, %v1158_v2 }
 0x764   :  { %v1163_v54 = vrot.slane %v1162_v38, 1  ;;  %v1167_v10 = vrot.slane %v1166_v1, 2  ;;  %v1048_v36 = vrot.slane %v1020_v20, 4  ;;  %v1042_v7 = vrot.slane %v1017_v30, 4 }
 0x766   :  { %v1164_v47 = vadd.f32 %v1163_v54, %v1162_v38  ;;  %v1168_v5 = vadd.f32 %v1167_v10, %v1166_v1  ;;  %v1043_v49 = vmin.f32 %v1017_v30, %v1042_v7  ;;  %v1049_v56 = vmin.f32 %v1020_v20, %v1048_v36 }
 0x767   :  { %v1026_v46 = vpop.xlane.xlu0 %1025  ;;  %v1023_v45 = vpop.xlane.xlu1 %1022  ;;  %v1038_v38 = vrot.slane %v1037_v14, 2 }
 0x768   :  { %v1169_v18 = vrot.slane %v1168_v5, 1  ;;  %v1060_v50 = vrot.slane %v1026_v46, 4  ;;  %v1054_v57 = vrot.slane %v1023_v45, 4  ;;  %v1176_v0 = vadd.f32 %v1175_v34, %v1164_v47 }
 0x769   :  { %v1044_v3 = vrot.slane %v1043_v49, 2  ;;  %v1050_v30 = vrot.slane %v1049_v56, 2 }
 0x76a   :  { %v1170_v55 = vadd.f32 %v1169_v18, %v1168_v5  ;;  %v1061_v4 = vmin.f32 %v1026_v46, %v1060_v50  ;;  %v1055_v51 = vmin.f32 %v1023_v45, %v1054_v57  ;;  %v1039_v46 = vmin.f32 %v1037_v14, %v1038_v38 }
 0x76b   :  { %v1032_v37 = vpop.xlane.xlu0 %1031  ;;  %v1029_v44 = vpop.xlane.xlu1 %1028  ;;  %v1045_v20 = vmin.f32 %v1043_v49, %v1044_v3  ;;  %v1051_v45 = vmin.f32 %v1049_v56, %v1050_v30 }
 0x76c   :  { %v1177_v8 = vadd.f32 %v1176_v0, %v1170_v55  ;;  %v1072_v52 = vrot.slane %v1032_v37, 4  ;;  %v1066_v39 = vrot.slane %v1029_v44, 4  ;;  %v1062_v1 = vrot.slane %v1061_v4, 2 }
 0x76d   :  { %v1056_v54 = vrot.slane %v1055_v51, 2  ;;  %v1046_v55 = vrot.slane %v1045_v20, 1  ;;  %v1052_v3 = vrot.slane %v1051_v45, 1 }
 0x76e   :  { %v1179_v9 = vmul.f32 0.001953125, %v1177_v8  ;;  %v1073_v10 = vmin.f32 %v1032_v37, %v1072_v52  ;;  %v1067_v58 = vmin.f32 %v1029_v44, %v1066_v39  ;;  %v1063_v42 = vmin.f32 %v1061_v4, %v1062_v1 }
 0x76f   :  { %v1035_v36 = vpop.xlane.xlu1 %1034  ;;  %v1057_v34 = vmin.f32 %v1055_v51, %v1056_v54  ;;  %v1040_v44 = vrot.slane %v1039_v46, 1  ;;  %v1047_v1 = vmin.f32 %v1045_v20, %v1046_v55  ;;  %v1053_v30 = vmin.f32 %v1051_v45, %v1052_v3 }
 0x770   :  { %v1180_v7 = vmul.f32 4.0, %v1179_v9  ;;  %v1074_v2 = vrot.slane %v1073_v10, 2  ;;  %v1068_v47 = vrot.slane %v1067_v58, 2  ;;  %v1078_v5 = vrot.slane %v1035_v36, 4 }
 0x771   :  { %v1064_v53 = vrot.slane %v1063_v42, 1  ;;  %v1058_v4 = vrot.slane %v1057_v34, 1  ;;  %v1041_v38 = vmin.f32 %v1039_v46, %v1040_v44 }
 0x772   :  { %v1182_v18 = vmul.f32 0.2581989, %v1180_v7  ;;  %v1075_v50 = vmin.f32 %v1073_v10, %v1074_v2  ;;  %v1069_v57 = vmin.f32 %v1067_v58, %v1068_v47  ;;  %v1079_v0 = vmin.f32 %v1035_v36, %v1078_v5 }
 0x773   :  { %v1065_v14 = vmin.f32 %v1063_v42, %v1064_v53  ;;  %v1059_v54 = vmin.f32 %v1057_v34, %v1058_v4 }
 0x774   :  { %v1076_v27 = vrot.slane %v1075_v50, 1  ;;  %v1070_v8 = vrot.slane %v1069_v57, 1  ;;  %v1080_v37 = vrot.slane %v1079_v0, 2  ;;  %v5559_v49 = vmax.f32 %v1182_v18, 1e-05 }
 0x775   :  { %v1084_v58 = vmin.f32 %v1041_v38, %v1065_v14 }
 0x776   :  { %v1071_v52 = vmin.f32 %v1069_v57, %v1070_v8  ;;  %v1081_v39 = vmin.f32 %v1079_v0, %v1080_v37  ;;  %v1077_v56 = vmin.f32 %v1075_v50, %v1076_v27  ;;  %4980 = vrcp.f32 %v5559_v49 }
 0x778   :  { %v1082_v51 = vrot.slane %v1081_v39, 1  ;;  %v1085_v9 = vmin.f32 %v1047_v1, %v1071_v52  ;;  %v1086_v36 = vmin.f32 %v1053_v30, %v1077_v56 }
 0x77a   :  { %v1083_v10 = vmin.f32 %v1081_v39, %v1082_v51  ;;  %v1088_v2 = vmin.f32 %v1084_v58, %v1085_v9 }
 0x77c   :  { %v1087_v7 = vmin.f32 %v1059_v54, %v1083_v10 }
 0x77e   :  { %v1089_v47 = vmin.f32 %v1086_v36, %v1087_v7 }
 0x780   :  { %v5562_v5 = vmin.f32 %v1088_v2, %v1089_v47  ;;  %v5572_v46 = vpop.eup %4980 }
 0x782   :  { %v1184_v20 = vsub.f32 %v5486_v41, %v5562_v5  ;;  %v1185_v53 = vsub.f32 %v5491_v43, %v5562_v5  ;;  %v1186_v27 = vsub.f32 %v5497_v11, %v5562_v5  ;;  %v1187_v42 = vsub.f32 %v5501_v59, %v5562_v5 }
 0x783   :  { %v1188_v45 = vsub.f32 %v5508_v19, %v5562_v5  ;;  %v1189_v34 = vsub.f32 %v5505_v13, %v5562_v5  ;;  %v1190_v41 = vsub.f32 %v5515_v40, %v5562_v5  ;;  %v1191_v43 = vsub.f32 %v5520_v62, %v5562_v5 }
 0x784   :  { %v1193_v18 = vmul.f32 %v5572_v46, %v1184_v20  ;;  %v1194_v11 = vmul.f32 %v5572_v46, %v1185_v53  ;;  %v1195_v59 = vmul.f32 %v5572_v46, %v1186_v27  ;;  %v1196_v50 = vmul.f32 %v5572_v46, %v1187_v42 }
 0x785   :  { %v1197_v57 = vmul.f32 %v5572_v46, %v1188_v45  ;;  %v1198_v19 = vmul.f32 %v5572_v46, %v1189_v34  ;;  %v1199_v13 = vmul.f32 %v5572_v46, %v1190_v41  ;;  %v1200_v0 = vmul.f32 %v5572_v46, %v1191_v43 }
 0x786   :  { %v4804_v40 = vround.rtne.f32 %v1193_v18  ;;  %v4805_v55 = vround.rtne.f32 %v1194_v11  ;;  %v4806_v8 = vround.rtne.f32 %v1195_v59  ;;  %v4807_v62 = vround.rtne.f32 %v1196_v50 }
 0x787   :  { %v4808_v37 = vround.rtne.f32 %v1197_v57  ;;  %v4809_v44 = vround.rtne.f32 %v1198_v19  ;;  %v4810_v56 = vround.rtne.f32 %v1199_v13  ;;  %v4811_v51 = vround.rtne.f32 %v1200_v0 }
 0x788   :  { %v1209_v3 = vmax.f32 %v4804_v40, 0.0  ;;  %v1210_v4 = vmax.f32 %v4805_v55, 0.0  ;;  %v1211_v52 = vmax.f32 %v4806_v8, 0.0  ;;  %v1212_v39 = vmax.f32 %v4807_v62, 0.0 }
 0x789   :  { %v1213_v1 = vmax.f32 %v4808_v37, 0.0  ;;  %v1214_v14 = vmax.f32 %v4809_v44, 0.0  ;;  %v1215_v20 = vmax.f32 %v4810_v56, 0.0  ;;  %v1216_v53 = vmax.f32 %v4811_v51, 0.0 }
 0x78a   :  { %v1217_v30 = vmin.f32 %v1209_v3, 15.0  ;;  %v1218_v54 = vmin.f32 %v1210_v4, 15.0  ;;  %v1219_v9 = vmin.f32 %v1211_v52, 15.0  ;;  %v1220_v10 = vmin.f32 %v1212_v39, 15.0 }
 0x78b   :  { %v499_v38 = vpop.permute.xlu1 %498  ;;  %v495_v58 = vpop.permute.xlu0 %494  ;;  %v1221_v2 = vmin.f32 %v1213_v1, 15.0  ;;  %v1222_v47 = vmin.f32 %v1214_v14, 15.0  ;;  %v6566_v50 = vmov 0.0   ;;  %v1223_v0 = vmin.f32 %v1215_v20, 15.0 }
 0x78c   :  { %v1225_v36 = vmul.f32 %v1217_v30, %v5559_v49  ;;  %v1226_v7 = vmul.f32 %v1218_v54, %v5559_v49  ;;  %v1227_v34 = vmul.f32 %v1219_v9, %v5559_v49  ;;  %v1228_v41 = vmul.f32 %v1220_v10, %v5559_v49 }
 0x78d   :  { %v515_v43 = vmul.f32 %v495_v58, %v5540_v33  ;;  %v516_v18 = vmul.f32 %v499_v38, %v5540_v33  ;;  %v1229_v11 = vmul.f32 %v1221_v2, %v5559_v49  ;;  %v1230_v59 = vmul.f32 %v1222_v47, %v5559_v49 }
 0x78e   :  { %v1233_v42 = vadd.f32 %v1225_v36, %v5562_v5  ;;  %v1234_v45 = vadd.f32 %v1226_v7, %v5562_v5  ;;  %v1235_v19 = vadd.f32 %v1227_v34, %v5562_v5  ;;  %v1236_v13 = vadd.f32 %v1228_v41, %v5562_v5 }
 0x78f   :  { %v502_v27 = vpop.permute.xlu1 %501  ;;  %v1224_v40 = vmin.f32 %v1216_v53, 15.0  ;;  %v508_v62 = vpop.permute.xlu0 %507  ;;  %v1237_v37 = vadd.f32 %v1229_v11, %v5562_v5  ;;  %v1238_v3 = vadd.f32 %v1230_v59, %v5562_v5  ;;  %v1231_v4 = vmul.f32 %v1223_v0, %v5559_v49 }
 0x790   :  { %4573 = vmatmul.mubr.msk.f32.vlgmr.msra.gmra.mrb[12].mxu1 %vm923_vm3, %v1233_v42  ;;  %4578 = vmatmul.mubr.msk.f32.vlgmr.msra.gmra.mrb[2].mxu0 %vm923_vm3, %v1234_v45  ;;  %v517_v55 = vmul.f32 %v502_v27, %v5540_v33  ;;  %v519_v39 = vmul.f32 %v508_v62, %v5540_v33 }
 0x791   :  { %4581 = vmatpush3.msra.mxu1 %v515_v43  ;;  %4586 = vmatpush3.msra.mxu0 %v516_v18  ;;  %v1232_v52 = vmul.f32 %v1224_v40, %v5559_v49  ;;  %v1239_v14 = vadd.f32 %v1231_v4, %v5562_v5 }
 0x792   :  { %4582 = vmatprep.mubr.msk.f32.mxu1 %vm5125_vm2, %v6566_v50  ;;  %4587 = vmatprep.mubr.msk.f32.mxu0 %vm5125_vm2, %v6566_v50 }
 0x793   :  { %v505_v57 = vpop.permute.xlu1 %504  ;;  %4590 = vmatprep.subr.mxu1 %v6566_v50  ;;  %4595 = vmatprep.subr.mxu0 %v6566_v50  ;;  %v1240_v56 = vadd.f32 %v1232_v52, %v5562_v5 }
 0x794   :  { %v518_v8 = vmul.f32 %v505_v57, %v5540_v33  ;;  %4583 = vmatmul.mubr.msk.f32.vlgmr.msra.gmra.mrb[14].mxu1 %vm923_vm3, %v1235_v19  ;;  %4588 = vmatmul.mubr.msk.f32.vlgmr.msra.gmra.mrb[28].mxu0 %vm923_vm3, %v1236_v13 }
 0x795   :  { %4591 = vmatpush3.msra.mxu1 %v517_v55  ;;  %4592 = vmatprep.mubr.msk.f32.mxu1 %vm5125_vm2, %v6566_v50 }
 0x796   :  { %4596 = vmatpush3.msra.mxu0 %v518_v8  ;;  %4597 = vmatprep.mubr.msk.f32.mxu0 %vm5125_vm2, %v6566_v50 }
 0x797   :  { %v511_v44 = vpop.permute.xlu1 %510  ;;  %4600 = vmatprep.subr.mxu1 %v6566_v50  ;;  %4605 = vmatprep.subr.mxu0 %v6566_v50 }
 0x798   :  { %v520_v1 = vmul.f32 %v511_v44, %v5540_v33  ;;  %4593 = vmatmul.mubr.msk.f32.vlgmr.msra.gmra.mrb[16].mxu1 %vm923_vm3, %v1237_v37  ;;  %4598 = vmatmul.mubr.msk.f32.vlgmr.msra.gmra.mrb[30].mxu0 %vm923_vm3, %v1238_v3 }
 0x799   :  { %4601 = vmatpush3.msra.mxu1 %v519_v39  ;;  %4602 = vmatprep.mubr.msk.f32.mxu1 %vm5125_vm2, %v6566_v50 }
 0x79a   :  { %4606 = vmatpush3.msra.mxu0 %v520_v1  ;;  %4607 = vmatprep.mubr.msk.f32.mxu0 %vm5125_vm2, %v6566_v50 }
 0x79b   :  { %4610 = vmatprep.subr.bf16.mxu1 %v6566_v50  ;;  %4622 = vmatprep.subr.bf16.mxu0 %v6566_v50 }
 0x79c   :  { %4603 = vmatmul.mubr.msk.f32.vlgmr.msra.gmra.mrb[18].mxu1 %vm923_vm3, %v1239_v14  ;;  %4608 = vmatmul.mubr.msk.f32.vlgmr.msra.gmra.mrb[32].mxu0 %vm923_vm3, %v1240_v56 }
 0x79d   :  { %4618 = vmatprep.mubr.msk.bf16.mxu1 %vm5125_vm2, %v6566_v50  ;;  %4630 = vmatprep.mubr.msk.bf16.mxu0 %vm5125_vm2, %v6566_v50 }
 0x863   :  { %v5642_v51 = vpop.f32.mrb[12].mxu1  ;;  %v5644_v38 = vpop.f32.mrb[2].mxu0 }
 0x864   :  { %v4574_v30 = vpop.f32.mrb[13].mxu1  ;;  %v4579_v5 = vpop.f32.mrb[3].mxu0  ;;  %v1892_v54 = vrot.slane %v5644_v38, 1  ;;  %v1826_v9 = vrot.slane %v5642_v51, 1  ;;  %v1830_v2 = vrot.slane %v5642_v51, 2  ;;  %v1896_v45 = vrot.slane %v5644_v38, 2 }
 0x865   :  { %v1834_v59 = vrot.slane %v5642_v51, 3  ;;  %v1900_v19 = vrot.slane %v5644_v38, 3 }
 0x866   :  { %1893 = vrot.lane.b32.xlu1 %v1892_v54, %s5129_s11  ;;  %1827 = vrot.lane.b32.xlu0 %v1826_v9, %s5129_s11 }
 0x867   :  { %v5650_v10 = vpop.f32.mrb[14].mxu1  ;;  %v5652_v58 = vpop.f32.mrb[28].mxu0 }
 0x868   :  { %v4584_v36 = vpop.f32.mrb[15].mxu1  ;;  %v4589_v7 = vpop.f32.mrb[29].mxu0  ;;  %v1844_v47 = vrot.slane %v5650_v10, 1  ;;  %v1908_v34 = vrot.slane %v5652_v58, 1  ;;  %v1848_v57 = vrot.slane %v5650_v10, 2  ;;  %v1912_v13 = vrot.slane %v5652_v58, 2 }
 0x869   :  { %v1852_v0 = vrot.slane %v5650_v10, 3  ;;  %v1916_v55 = vrot.slane %v5652_v58, 3 }
 0x86a   :  { %1831 = vrot.lane.b32.xlu0 %v1830_v2, %s5130_s12  ;;  %1845 = vrot.lane.b32.xlu1 %v1844_v47, %s5129_s11 }
 0x86b   :  { %v5658_v20 = vpop.f32.mrb[16].mxu1  ;;  %v5660_v53 = vpop.f32.mrb[30].mxu0 }
 0x86c   :  { %v4594_v27 = vpop.f32.mrb[17].mxu1  ;;  %v4599_v42 = vpop.f32.mrb[31].mxu0  ;;  %v1860_v40 = vrot.slane %v5658_v20, 1  ;;  %v1924_v8 = vrot.slane %v5660_v53, 1  ;;  %v1864_v62 = vrot.slane %v5658_v20, 2  ;;  %v1928_v37 = vrot.slane %v5660_v53, 2 }
 0x86d   :  { %v1868_v44 = vrot.slane %v5658_v20, 3  ;;  %v1932_v4 = vrot.slane %v5660_v53, 3 }
 0x86e   :  { %1897 = vrot.lane.b32.xlu0 %v1896_v45, %s5130_s12  ;;  %1909 = vrot.lane.b32.xlu1 %v1908_v34, %s5129_s11 }
 0x86f   :  { %v5666_v41 = vpop.f32.mrb[18].mxu1  ;;  %v5668_v43 = vpop.f32.mrb[32].mxu0 }
 0x870   :  { %v4604_v18 = vpop.f32.mrb[19].mxu1  ;;  %v4609_v11 = vpop.f32.mrb[33].mxu0  ;;  %v1876_v3 = vrot.slane %v5666_v41, 1  ;;  %v1940_v52 = vrot.slane %v5668_v43, 1  ;;  %v1880_v39 = vrot.slane %v5666_v41, 2  ;;  %v1944_v1 = vrot.slane %v5668_v43, 2 }
 0x871   :  { %v1884_v14 = vrot.slane %v5666_v41, 3  ;;  %v1948_v56 = vrot.slane %v5668_v43, 3 }
 0x872   :  { %1835 = vrot.lane.b32.xlu0 %v1834_v59, %s5131_s13  ;;  %1849 = vrot.lane.b32.xlu1 %v1848_v57, %s5130_s12 }
 0x876   :  { %1901 = vrot.lane.b32.xlu0 %v1900_v19, %s5131_s13  ;;  %1913 = vrot.lane.b32.xlu1 %v1912_v13, %s5130_s12 }
 0x87a   :  { %1853 = vrot.lane.b32.xlu0 %v1852_v0, %s5131_s13  ;;  %1861 = vrot.lane.b32.xlu1 %v1860_v40, %s5129_s11 }
 0x87e   :  { %1917 = vrot.lane.b32.xlu0 %v1916_v55, %s5131_s13  ;;  %1925 = vrot.lane.b32.xlu1 %v1924_v8, %s5129_s11 }
 0x882   :  { %1865 = vrot.lane.b32.xlu0 %v1864_v62, %s5130_s12  ;;  %1929 = vrot.lane.b32.xlu1 %v1928_v37, %s5130_s12 }
 0x886   :  { %1869 = vrot.lane.b32.xlu0 %v1868_v44, %s5131_s13  ;;  %1877 = vrot.lane.b32.xlu1 %v1876_v3, %s5129_s11 }
 0x88a   :  { %1933 = vrot.lane.b32.xlu0 %v1932_v4, %s5131_s13  ;;  %1941 = vrot.lane.b32.xlu1 %v1940_v52, %s5129_s11 }
 0x88e   :  { %1881 = vrot.lane.b32.xlu0 %v1880_v39, %s5130_s12  ;;  %1945 = vrot.lane.b32.xlu1 %v1944_v1, %s5130_s12 }
 0x892   :  { %1885 = vrot.lane.b32.xlu0 %v1884_v14, %s5131_s13  ;;  %1949 = vrot.lane.b32.xlu1 %v1948_v56, %s5131_s13 }
 0x8d8   :  { %v1894_v30 = vpop.permute.xlu1 %1893  ;;  %v1828_v5 = vpop.permute.xlu0 %1827 }
 0x8d9   :  { %v1838_v27 = vsel %vm97_vm0, %v5642_v51, %v1828_v5  ;;  %v1904_v11 = vsel %vm97_vm0, %v5644_v38, %v1894_v30 }
 0x8dc   :  { %v1832_v54 = vpop.permute.xlu0 %1831  ;;  %v1846_v9 = vpop.permute.xlu1 %1845 }
 0x8dd   :  { %v1840_v42 = vsel %vm1839_vm4, %v1838_v27, %v1832_v54  ;;  %v1856_v59 = vsel %vm97_vm0, %v5650_v10, %v1846_v9 }
 0x8e0   :  { %v1898_v36 = vpop.permute.xlu0 %1897  ;;  %v1910_v7 = vpop.permute.xlu1 %1909 }
 0x8e1   :  { %v1905_v57 = vsel %vm1839_vm4, %v1904_v11, %v1898_v36  ;;  %v1920_v38 = vsel %vm97_vm0, %v5652_v58, %v1910_v7 }
 0x8e4   :  { %v1836_v2 = vpop.permute.xlu0 %1835  ;;  %v1850_v47 = vpop.permute.xlu1 %1849 }
 0x8e5   :  { %v1842_v45 = vsel %vm1841_vm5, %v1840_v42, %v1836_v2  ;;  %v1857_v13 = vsel %vm1839_vm4, %v1856_v59, %v1850_v47 }
 0x8e6   :  { %v1956_v19 = vrot.slane %v1842_v45, 3 }
 0x8e8   :  { %v1902_v34 = vpop.permute.xlu0 %1901  ;;  %v1914_v18 = vpop.permute.xlu1 %1913  ;;  %v1992_v10 = vsel %vm1991_vm6, %v1842_v45, %v1956_v19 }
 0x8e9   :  { %v1906_v51 = vsel %vm1841_vm5, %v1905_v57, %v1902_v34  ;;  %v1921_v44 = vsel %vm1839_vm4, %v1920_v38, %v1914_v18 }
 0x8ea   :  { %v1974_v37 = vrot.slane %v1906_v51, 3 }
 0x8ec   :  { %v1854_v0 = vpop.permute.xlu0 %1853  ;;  %v1862_v40 = vpop.permute.xlu1 %1861  ;;  %v2005_v30 = vsel %vm1991_vm6, %v1906_v51, %v1974_v37 }
 0x8ed   :  { %v1858_v55 = vsel %vm1841_vm5, %v1857_v13, %v1854_v0  ;;  %v1872_v36 = vsel %vm97_vm0, %v5658_v20, %v1862_v40 }
 0x8ee   :  { %v1959_v8 = vrot.slane %v1858_v55, 6  ;;  %v1961_v62 = vrot.slane %v1858_v55, 1 }
 0x8f0   :  { %v1994_v3 = vsel %vm1993_vm7, %v1992_v10, %v1959_v8  ;;  %v1918_v4 = vpop.permute.xlu0 %1917  ;;  %v1926_v52 = vpop.permute.xlu1 %1925 }
 0x8f1   :  { %v1996_v39 = vsel %vm1995_vm8, %v1994_v3, %v1961_v62  ;;  %v1922_v1 = vsel %vm1841_vm5, %v1921_v44, %v1918_v4  ;;  %v1936_v34 = vsel %vm97_vm0, %v5660_v53, %v1926_v52 }
 0x8f2   :  { %v1977_v14 = vrot.slane %v1922_v1, 6  ;;  %v1979_v56 = vrot.slane %v1922_v1, 1 }
 0x8f4   :  { %v2006_v5 = vsel %vm1993_vm7, %v2005_v30, %v1977_v14  ;;  %v1866_v58 = vpop.permute.xlu0 %1865  ;;  %v1930_v54 = vpop.permute.xlu1 %1929 }
 0x8f5   :  { %v2007_v9 = vsel %vm1995_vm8, %v2006_v5, %v1979_v56  ;;  %v1873_v7 = vsel %vm1839_vm4, %v1872_v36, %v1866_v58  ;;  %v1937_v18 = vsel %vm1839_vm4, %v1936_v34, %v1930_v54  ;;  %v5757_v36 = vld [vmem:[%s6471_s4] sm:$0xff]  }
 0x8f6   :  { %4611 = vmatpush3.bf16.msra.mxu1 %v5757_v36 }
 0x8f7   :  { %4612 = vmatprep.subr.bf16.mxu1 %v6566_v50 }
 0x8f8   :  { %v1870_v2 = vpop.permute.xlu0 %1869  ;;  %v1878_v47 = vpop.permute.xlu1 %1877 }
 0x8f9   :  { %v1874_v27 = vsel %vm1841_vm5, %v1873_v7, %v1870_v2  ;;  %v1888_v53 = vsel %vm97_vm0, %v5666_v41, %v1878_v47  ;;  %v5763_v7 = vld [vmem:[%s6471_s4 + $0x8] sm:$0xff]   ;;  %v5770_v2 = vld [vmem:[%s6471_s4 + $0x10] sm:$0xff]   ;;  %v5777_v47 = vld [vmem:[%s6471_s4 + $0x18] sm:$0xff]  }
 0x8fa   :  { %v1964_v42 = vrot.slane %v1874_v27, 4  ;;  %v1966_v45 = vrot.slane %v1874_v27, 7  ;;  %4613 = vmatpush3.bf16.msra.mxu1 %v5763_v7 }
 0x8fb   :  { %4614 = vmatprep.subr.bf16.mxu1 %v6566_v50 }
 0x8fc   :  { %v1998_v11 = vsel %vm1997_vm9, %v1996_v39, %v1964_v42  ;;  %v1934_v59 = vpop.permute.xlu0 %1933  ;;  %v1942_v57 = vpop.permute.xlu1 %1941 }
 0x8fd   :  { %v2000_v20 = vsel %vm1999_vm10, %v1998_v11, %v1966_v45  ;;  %v1938_v19 = vsel %vm1841_vm5, %v1937_v18, %v1934_v59  ;;  %v1952_v62 = vsel %vm97_vm0, %v5668_v43, %v1942_v57 }
 0x8fe   :  { %v1982_v13 = vrot.slane %v1938_v19, 4  ;;  %v1984_v51 = vrot.slane %v1938_v19, 7  ;;  %4615 = vmatpush3.bf16.msra.mxu1 %v5770_v2 }
 0x8ff   :  { %4616 = vmatprep.subr.bf16.mxu1 %v6566_v50 }
 0x900   :  { %v2008_v0 = vsel %vm1997_vm9, %v2007_v9, %v1982_v13  ;;  %v1882_v40 = vpop.permute.xlu0 %1881  ;;  %v1946_v55 = vpop.permute.xlu1 %1945 }
 0x901   :  { %v2009_v8 = vsel %vm1999_vm10, %v2008_v0, %v1984_v51  ;;  %v1889_v38 = vsel %vm1839_vm4, %v1888_v53, %v1882_v40  ;;  %v1953_v10 = vsel %vm1839_vm4, %v1952_v62, %v1946_v55  ;;  %v5785_v40 = vld [vmem:[%s6474_s7 + $0x8] sm:$0x3] }
 0x902   :  { %4617 = vmatpush3.bf16.msra.mxu1 %v5777_v47 }
 0x903   :  { %4634 = vmatprep.subr.bf16.mxu1 %v6566_v50 }
 0x904   :  { %v1886_v37 = vpop.permute.xlu0 %1885  ;;  %v1950_v44 = vpop.permute.xlu1 %1949 }
 0x905   :  { %v1890_v3 = vsel %vm1841_vm5, %v1889_v38, %v1886_v37  ;;  %v1954_v4 = vsel %vm1841_vm5, %v1953_v10, %v1950_v44 }
 0x906   :  { %v1969_v52 = vrot.slane %v1890_v3, 2  ;;  %v1971_v39 = vrot.slane %v1890_v3, 5  ;;  %v1987_v1 = vrot.slane %v1954_v4, 2  ;;  %v1989_v14 = vrot.slane %v1954_v4, 5 }
 0x908   :  { %v2002_v41 = vsel %vm2001_vm11, %v2000_v20, %v1969_v52  ;;  %v2010_v43 = vsel %vm2001_vm11, %v2009_v8, %v1987_v1 }
 0x909   :  { %v2004_v56 = vsel %vm2003_vm12, %v2002_v41, %v1971_v39  ;;  %v2011_v30 = vsel %vm2003_vm12, %v2010_v43, %v1989_v14 }
 0x90a   :  { %v2012_v5 = vand.u32 2147483647, %v2004_v56  ;;  %v2013_v58 = vand.u32 2147483647, %v2011_v30 }
 0x90c   :  { %v2014_v54 = vsel %vm183_vm1, %v2012_v5, 0.0  ;;  %v2017_v9 = vsel %vm183_vm1, %v2013_v58, 0.0 }
 0x90d   :  { %2015 = vadd.xlane.f32.xlu0 %v2014_v54  ;;  %2018 = vadd.xlane.f32.xlu1 %v2017_v9 }
 0x99a   :  { %v2016_v27 = vpop.xlane.xlu0 %2015  ;;  %v2019_v42 = vpop.xlane.xlu1 %2018 }
 0x99b   :  { %v2020_v45 = vadd.f32 %v2019_v42, %v2016_v27 }
 0x99d   :  { %v2021_v34 = vrot.slane %v2020_v45, 4 }
 0x99f   :  { %v2022_v18 = vadd.f32 %v2021_v34, %v2020_v45 }
 0x9a1   :  { %v2023_v11 = vrot.slane %v2022_v18, 2 }
 0x9a3   :  { %v2024_v59 = vadd.f32 %v2023_v11, %v2022_v18 }
 0x9a5   :  { %v2025_v57 = vrot.slane %v2024_v59, 1 }
 0x9a7   :  { %v2026_v20 = vadd.f32 %v2025_v57, %v2024_v59 }
 0x9a9   :  { %v2027_v19 = vmul.f32 0.0009765625, %v2026_v20 }
 0x9ab   :  { %v2028_v13 = vmul.f32 2.0, %v2027_v19 }
 0x9ad   :  { %v2030_v51 = vmul.f32 0.088735655, %v2028_v13 }
 0x9af   :  { %v2031_v0 = vmax.f32 %v2030_v51, 1e-05 }
 0x9b1   :  { %4982 = vrcp.f32 %v2031_v0  ;;  %v2110_v55 = vmul.f32 %v5785_v40, %v2031_v0 }
 0x9b3   :  { %v2112_v8 = vrot.slane %v2110_v55, 1 }
 0x9b5   :  { %2113 = vrot.lane.b32.xlu0 %v2112_v8, %s5132_s3 }
 0x9bb   :  { %v5788_v53 = vpop.eup %4982 }
 0x9bc   :  { %v2033_v62 = vmul.f32 %v5788_v53, %v2004_v56  ;;  %v2034_v38 = vmul.f32 %v5788_v53, %v2011_v30 }
 0x9be   :  { %v4812_v10 = vround.rtne.f32 %v2033_v62  ;;  %v4813_v37 = vround.rtne.f32 %v2034_v38  ;;  %v6485_v38 = vsub.s32 1, %v5219_v6 }
 0x9c0   :  { %v2037_v44 = vmax.f32 %v4812_v10, -128.0  ;;  %v2038_v3 = vmax.f32 %v4813_v37, -128.0  ;;  %v2157_v10 = vsub.s32 2, %v5219_v6  ;;  %v5810_v37 = vld [vmem:[%s6474_s7] sm:$0xff] }
 0x9c2   :  { %v2039_v4 = vmin.f32 %v2037_v44, 127.0  ;;  %v2040_v52 = vmin.f32 %v2038_v3, 127.0  ;;  %v5815_v44 = vrot.slane %v5810_v37, %v6485_v38 }
 0x9c4   :  { %v2041_v39 = vpack.c.bf16 %v2040_v52, %v2039_v4  ;;  %6567 = vst [vmem:[#allocation27_spill] sm:$0xff] %v5815_v44  ;;  %v5818_v52 = vrot.slane %v5810_v37, %v2157_v10 }
 0x9c6   :  { %4619 = vmatmul.mubr.msk.bf16.vlgmr.msra.gmra.mrb[20].mxu1 %vm183_vm1, %v2041_v39  ;;  %6568 = vst [vmem:[#allocation28_spill] sm:$0xff] %v5818_v52 }
 0x9c7   :  { %4650 = vmatprep.mubr.msk.bf16.mxu1 %vm5125_vm2, %v6566_v50 }
 0xa27   :  { %v2114_v1 = vpop.permute.xlu0 %2113 }
 0xa28   :  { %4814 = vpush %v2114_v1 }
 0xa59   :  { %s4815_s24 = spop %4814 }
 0xa5a   :  { %v5795_v14 = vstv %s4815_s24 }
 0xa99   :  { %v2103_v41 = vpop.f32.mrb[20].mxu1 }
 0xa9a   :  { %v2118_v43 = vmul.f32 %v5795_v14, %v2103_v41  ;;  %v4620_v56 = vpop.f32.mrb[21].mxu1 }
 0xa9b   :  { %v2106_v30 = vpop.f32.mrb[22].mxu1 }
 0xa9c   :  { %v2119_v5 = vmul.f32 %v5795_v14, %v2106_v30  ;;  %v4621_v58 = vpop.f32.mrb[23].mxu1  ;;  %v2120_v54 = vadd.f32 %v2118_v43, %v5235_v16 }
 0xa9e   :  { %v2122_v9 = vsel %vm183_vm1, %v2120_v54, 0.0  ;;  %v2121_v27 = vadd.f32 %v2119_v5, %v5233_v15 }
 0xa9f   :  { %2123 = vadd.xlane.f32.xlu1 %v2122_v9 }
 0xaa0   :  { %v2125_v42 = vsel %vm183_vm1, %v2121_v27, 0.0 }
 0xaa3   :  { %2126 = vadd.xlane.f32.xlu1 %v2125_v42  ;;  %v5841_v42 = vld [vmem:[%s6472_s5 + $0x8] sm:$0xff]  }
 0xb2c   :  { %v2124_v45 = vpop.xlane.xlu1 %2123 }
 0xb2d   :  { %v2129_v34 = vmul.f32 0.015625, %v2124_v45  ;;  %v5848_v45 = vld [vmem:[%s6472_s5 + $0x10] sm:$0xff]  }
 0xb2f   :  { %v2131_v18 = vsub.f32 %v2120_v54, %v2129_v34  ;;  %v5855_v34 = vld [vmem:[%s6472_s5 + $0x18] sm:$0xff]  }
 0xb30   :  { %v2127_v11 = vpop.xlane.xlu1 %2126 }
 0xb31   :  { %v2130_v59 = vmul.f32 0.015625, %v2127_v11  ;;  %v2133_v57 = vmul.f32 %v2131_v18, %v2131_v18 }
 0xb33   :  { %v2132_v20 = vsub.f32 %v2121_v27, %v2130_v59  ;;  %v2135_v19 = vsel %vm183_vm1, %v2133_v57, 0.0  ;;  %v5835_v27 = vld [vmem:[%s6472_s5] sm:$0xff]   ;;  %s5133_s5 = smov 123  }
 0xb34   :  { %2136 = vadd.xlane.f32.xlu1 %v2135_v19  ;;  %4623 = vmatpush3.bf16.msra.mxu0 %v5835_v27 }
 0xb35   :  { %v2134_v13 = vmul.f32 %v2132_v20, %v2132_v20  ;;  %4624 = vmatprep.subr.bf16.mxu0 %v6566_v50 }
 0xb37   :  { %v2138_v16 = vsel %vm183_vm1, %v2134_v13, 0.0 }
 0xb38   :  { %2139 = vadd.xlane.f32.xlu1 %v2138_v16  ;;  %4625 = vmatpush3.bf16.msra.mxu0 %v5841_v42 }
 0xb39   :  { %4626 = vmatprep.subr.bf16.mxu0 %v6566_v50 }
 0xb3c   :  { %4627 = vmatpush3.bf16.msra.mxu0 %v5848_v45 }
 0xb3d   :  { %4628 = vmatprep.subr.bf16.mxu0 %v6566_v50 }
 0xb40   :  { %4629 = vmatpush3.bf16.msra.mxu0 %v5855_v34 }
 0xbc1   :  { %v2137_v51 = vpop.xlane.xlu1 %2136 }
 0xbc2   :  { %v2141_v15 = vmul.f32 0.015625, %v2137_v51 }
 0xbc4   :  { %v2143_v0 = vadd.f32 1e-05, %v2141_v15 }
 0xbc5   :  { %v2140_v55 = vpop.xlane.xlu1 %2139 }
 0xbc6   :  { %4984 = vrsqrt.f32 %v2143_v0  ;;  %v2142_v8 = vmul.f32 0.015625, %v2140_v55 }
 0xbc8   :  { %v2144_v62 = vadd.f32 1e-05, %v2142_v8 }
 0xbca   :  { %4986 = vrsqrt.f32 %v2144_v62 }
 0xbd0   :  { %v4985_v3 = vpop.eup %4984 }
 0xbd1   :  { %v2147_v4 = vmul.f32 %v4985_v3, %v2131_v18 }
 0xbd3   :  { %v2153_v39 = vmul.f32 %v5815_v44, %v2147_v4 }
 0xbd4   :  { %v4987_v1 = vpop.eup %4986 }
 0xbd5   :  { %v5822_v41 = vadd.f32 %v5818_v52, %v2153_v39  ;;  %v2148_v43 = vmul.f32 %v4987_v1, %v2132_v20 }
 0xbd7   :  { %v2161_v56 = vand.u32 2147483647, %v5822_v41  ;;  %v2154_v30 = vmul.f32 %v5815_v44, %v2148_v43 }
 0xbd9   :  { %v2163_v5 = vsel %vm183_vm1, %v2161_v56, 0.0  ;;  %v5828_v58 = vadd.f32 %v5818_v52, %v2154_v30 }
 0xbda   :  { %2164 = vadd.xlane.f32.xlu0 %v2163_v5 }
 0xbdb   :  { %v2162_v54 = vand.u32 2147483647, %v5828_v58 }
 0xbdd   :  { %v2166_v9 = vsel %vm183_vm1, %v2162_v54, 0.0 }
 0xbde   :  { %2167 = vadd.xlane.f32.xlu1 %v2166_v9 }
 0xc67   :  { %v2165_v18 = vpop.xlane.xlu0 %2164 }
 0xc6b   :  { %v2168_v11 = vpop.xlane.xlu1 %2167 }
 0xc6c   :  { %v2169_v59 = vadd.f32 %v2168_v11, %v2165_v18 }
 0xc6e   :  { %v2170_v57 = vrot.slane %v2169_v59, 4 }
 0xc70   :  { %v2171_v20 = vadd.f32 %v2170_v57, %v2169_v59 }
 0xc72   :  { %v2172_v19 = vrot.slane %v2171_v20, 2 }
 0xc74   :  { %v2173_v13 = vadd.f32 %v2172_v19, %v2171_v20 }
 0xc76   :  { %v2174_v16 = vrot.slane %v2173_v13, 1 }
 0xc78   :  { %v2175_v51 = vadd.f32 %v2174_v16, %v2173_v13 }
 0xc7a   :  { %v2176_v15 = vmul.f32 0.0009765625, %v2175_v51 }
 0xc7c   :  { %v2177_v0 = vmul.f32 2.0, %v2176_v15 }
 0xc7e   :  { %v2178_v55 = vmul.f32 0.088735655, %v2177_v0 }
 0xc80   :  { %v2179_v8 = vmax.f32 %v2178_v55, 1e-05 }
 0xc82   :  { %4988 = vrcp.f32 %v2179_v8  ;;  %v2258_v62 = vmul.f32 %v5785_v40, %v2179_v8  ;;  %v5874_v8 = vld [vmem:[%s6473_s6] sm:$0xff]  }
 0xc83   :  { %4635 = vmatpush3.bf16.msra.mxu1 %v5874_v8 }
 0xc84   :  { %v2260_v10 = vrot.slane %v2258_v62, 1  ;;  %4636 = vmatprep.subr.bf16.mxu1 %v6566_v50  ;;  %v5881_v62 = vld [vmem:[%s6473_s6 + $0x8] sm:$0xff]  }
 0xc86   :  { %2261 = vrot.lane.b32.xlu1 %v2260_v10, %s5133_s5  ;;  %v5888_v10 = vld [vmem:[%s6473_s6 + $0x10] sm:$0xff]  }
 0xc87   :  { %4637 = vmatpush3.bf16.msra.mxu1 %v5881_v62 }
 0xc88   :  { %4638 = vmatprep.subr.bf16.mxu1 %v6566_v50 }
 0xc8b   :  { %4639 = vmatpush3.bf16.msra.mxu1 %v5888_v10 }
 0xc8c   :  { %v5860_v3 = vpop.eup %4988  ;;  %4640 = vmatprep.subr.bf16.mxu1 %v6566_v50 }
 0xc8d   :  { %6569 = vst [vmem:[#allocation29_spill] sm:$0xff] %v5860_v3  ;;  %v2181_v4 = vmul.f32 %v5860_v3, %v5822_v41  ;;  %v2182_v39 = vmul.f32 %v5860_v3, %v5828_v58 }
 0xc8f   :  { %v4816_v1 = vround.rtne.f32 %v2181_v4  ;;  %v4817_v43 = vround.rtne.f32 %v2182_v39  ;;  %v5894_v4 = vld [vmem:[%s6473_s6 + $0x18] sm:$0xff]   ;;  %v5901_v39 = vld [vmem:[%s6473_s6 + $0x20] sm:$0xff]  }
 0xc90   :  { %4641 = vmatpush3.bf16.msra.mxu1 %v5894_v4 }
 0xc91   :  { %v2185_v56 = vmax.f32 %v4816_v1, -128.0  ;;  %v2186_v30 = vmax.f32 %v4817_v43, -128.0  ;;  %4642 = vmatprep.subr.bf16.mxu1 %v6566_v50  ;;  %v5908_v1 = vld [vmem:[%s6473_s6 + $0x28] sm:$0xff]   ;;  %v5915_v43 = vld [vmem:[%s6473_s6 + $0x30] sm:$0xff]  }
 0xc93   :  { %v2187_v5 = vmin.f32 %v2185_v56, 127.0  ;;  %v2188_v54 = vmin.f32 %v2186_v30, 127.0  ;;  %v5922_v56 = vld [vmem:[%s6473_s6 + $0x38] sm:$0xff]   ;;  %s5134_s6 = smov 122  }
 0xc94   :  { %4643 = vmatpush3.bf16.msra.mxu1 %v5901_v39 }
 0xc95   :  { %v2189_v9 = vpack.c.bf16 %v2188_v54, %v2187_v5  ;;  %4644 = vmatprep.subr.bf16.mxu1 %v6566_v50 }
 0xc97   :  { %4631 = vmatmul.mubr.msk.bf16.vlgmr.msra.gmra.mrb[36].mxu0 %vm183_vm1, %v2189_v9 }
 0xc98   :  { %4645 = vmatpush3.bf16.msra.mxu1 %v5908_v1 }
 0xc99   :  { %4646 = vmatprep.subr.bf16.mxu1 %v6566_v50 }
 0xc9c   :  { %4647 = vmatpush3.bf16.msra.mxu1 %v5915_v43 }
 0xc9d   :  { %4648 = vmatprep.subr.bf16.mxu1 %v6566_v50 }
 0xca0   :  { %4649 = vmatpush3.bf16.msra.mxu1 %v5922_v56 }
 0xcf8   :  { %v2262_v18 = vpop.permute.xlu1 %2261 }
 0xcf9   :  { %4818 = vpush %v2262_v18 }
 0xd2a   :  { %s4819_s10 = spop %4818 }
 0xd2b   :  { %v5867_v11 = vstv %s4819_s10 }
 0xd2c   :  { %6570 = vst [vmem:[#allocation30_spill] sm:$0xff] %v5867_v11 }
 0xd6a   :  { %v2251_v59 = vpop.f32.mrb[36].mxu0 }
 0xd6b   :  { %v2266_v57 = vmul.f32 %v5867_v11, %v2251_v59  ;;  %v4632_v20 = vpop.f32.mrb[37].mxu0 }
 0xd6c   :  { %v2254_v19 = vpop.f32.mrb[38].mxu0 }
 0xd6d   :  { %v2268_v13 = vmax.f32 %v2266_v57, 0.0  ;;  %v2267_v16 = vmul.f32 %v5867_v11, %v2254_v19  ;;  %v4633_v51 = vpop.f32.mrb[39].mxu0 }
 0xd6f   :  { %v2270_v15 = vand.u32 2147483647, %v2268_v13  ;;  %v2269_v0 = vmax.f32 %v2267_v16, 0.0 }
 0xd71   :  { %v2271_v55 = vand.u32 2147483647, %v2269_v0  ;;  %2272 = vadd.xlane.f32.xlu1 %v2270_v15 }
 0xd73   :  { %2274 = vadd.xlane.f32.xlu0 %v2271_v55 }
 0xdfe   :  { %v2273_v30 = vpop.xlane.xlu1 %2272 }
 0xe00   :  { %v2275_v5 = vpop.xlane.xlu0 %2274 }
 0xe01   :  { %v2276_v54 = vadd.f32 %v2275_v5, %v2273_v30 }
 0xe03   :  { %v2277_v9 = vrot.slane %v2276_v54, 4 }
 0xe05   :  { %v2278_v18 = vadd.f32 %v2277_v9, %v2276_v54 }
 0xe07   :  { %v2279_v59 = vrot.slane %v2278_v18, 2 }
 0xe09   :  { %v2280_v57 = vadd.f32 %v2279_v59, %v2278_v18 }
 0xe0b   :  { %v2281_v20 = vrot.slane %v2280_v57, 1 }
 0xe0d   :  { %v2282_v19 = vadd.f32 %v2281_v20, %v2280_v57 }
 0xe0f   :  { %v2284_v16 = vmul.f32 0.00048828125, %v2282_v19 }
 0xe11   :  { %v2285_v51 = vmul.f32 2.0, %v2284_v16 }
 0xe13   :  { %v2286_v15 = vmul.f32 0.088735655, %v2285_v51 }
 0xe15   :  { %v2287_v55 = vmax.f32 %v2286_v15, 1e-05 }
 0xe17   :  { %4990 = vrcp.f32 %v2287_v55  ;;  %v2387_v38 = vmul.f32 %v5785_v40, %v2287_v55 }
 0xe19   :  { %v2389_v11 = vrot.slane %v2387_v38, 1 }
 0xe1b   :  { %2390 = vrot.lane.b32.xlu0 %v2389_v11, %s5134_s6 }
 0xe21   :  { %v5927_v50 = vpop.eup %4990 }
 0xe22   :  { %6571 = vst [vmem:[#allocation31_spill] sm:$0xff] %v5927_v50  ;;  %v2289_v30 = vmul.f32 %v5927_v50, %v2268_v13  ;;  %v2290_v5 = vmul.f32 %v5927_v50, %v2269_v0 }
 0xe24   :  { %v4820_v54 = vround.rtne.f32 %v2289_v30  ;;  %v4821_v9 = vround.rtne.f32 %v2290_v5 }
 0xe26   :  { %v2293_v18 = vmax.f32 %v4820_v54, -128.0  ;;  %v2294_v59 = vmax.f32 %v4821_v9, -128.0 }
 0xe28   :  { %v2295_v57 = vmin.f32 %v2293_v18, 127.0  ;;  %v2296_v20 = vmin.f32 %v2294_v59, 127.0 }
 0xe2a   :  { %v2297_v19 = vpack.c.bf16 %v2296_v20, %v2295_v57 }
 0xe2c   :  { %4651 = vmatmul.mubr.bf16.vlgmr.msra.gmra.mrb[24].mxu1 %v2297_v19 }
 0xe8d   :  { %v2391_v16 = vpop.permute.xlu0 %2390 }
 0xe8e   :  { %4822 = vpush %v2391_v16 }
 0xebf   :  { %s4823_s27 = spop %4822 }
 0xec0   :  { %v5931_v40 = vstv %s4823_s27 }
 0xec1   :  { %6572 = vst [vmem:[#allocation32_spill] sm:$0xff] %v5931_v40 }
 0xeff   :  { %v2380_v38 = vpop.f32.mrb[24].mxu1 }
 0xf00   :  { %v2395_v11 = vmul.f32 %v5931_v40, %v2380_v38  ;;  %v4652_v51 = vpop.f32.mrb[25].mxu1 }
 0xf01   :  { %v2383_v13 = vpop.f32.mrb[26].mxu1 }
 0xf02   :  { %v2397_v0 = vadd.f32 %v2395_v11, %v5822_v41  ;;  %v2396_v15 = vmul.f32 %v5931_v40, %v2383_v13  ;;  %v4653_v55 = vpop.f32.mrb[27].mxu1 }
 0xf04   :  { %v2398_v30 = vadd.f32 %v2396_v15, %v5828_v58  ;;  %v2399_v5 = vsel %vm183_vm1, %v2397_v0, 0.0 }
 0xf05   :  { %2400 = vadd.xlane.f32.xlu0 %v2399_v5 }
 0xf06   :  { %v2402_v54 = vsel %vm183_vm1, %v2398_v30, 0.0 }
 0xf07   :  { %2403 = vadd.xlane.f32.xlu1 %v2402_v54 }
 0xf92   :  { %v2401_v9 = vpop.xlane.xlu0 %2400 }
 0xf93   :  { %v2405_v18 = vmul.f32 0.015625, %v2401_v9 }
 0xf94   :  { %v2404_v59 = vpop.xlane.xlu1 %2403 }
 0xf95   :  { %v2407_v57 = vsub.f32 %v2397_v0, %v2405_v18  ;;  %v2406_v20 = vmul.f32 0.015625, %v2404_v59  ;;  %v2427_v0 = vsub.s32 3, %v5219_v6 }
 0xf97   :  { %v2408_v19 = vsub.f32 %v2398_v30, %v2406_v20  ;;  %v2409_v16 = vmul.f32 %v2407_v57, %v2407_v57  ;;  %v2433_v30 = vsub.s32 4, %v5219_v6  ;;  %v5944_v54 = vrot.slane %v5810_v37, %v2427_v0 }
 0xf99   :  { %v2411_v41 = vsel %vm183_vm1, %v2409_v16, 0.0  ;;  %v2410_v38 = vmul.f32 %v2408_v19, %v2408_v19  ;;  %6573 = vst [vmem:[#allocation33_spill] sm:$0xff] %v5944_v54  ;;  %v5947_v18 = vrot.slane %v5810_v37, %v2433_v30 }
 0xf9a   :  { %2412 = vadd.xlane.f32.xlu1 %v2411_v41 }
 0xf9b   :  { %v2414_v11 = vsel %vm183_vm1, %v2410_v38, 0.0  ;;  %6574 = vst [vmem:[#allocation34_spill] sm:$0xff] %v5947_v18 }
 0xf9e   :  { %2415 = vadd.xlane.f32.xlu1 %v2414_v11 }
0x1027   :  { %v2413_v58 = vpop.xlane.xlu1 %2412 }
0x1028   :  { %v2417_v51 = vmul.f32 0.015625, %v2413_v58 }
0x102a   :  { %v2419_v13 = vadd.f32 1e-05, %v2417_v51 }
0x102b   :  { %v2416_v15 = vpop.xlane.xlu1 %2415 }
0x102c   :  { %4992 = vrsqrt.f32 %v2419_v13  ;;  %v2418_v55 = vmul.f32 0.015625, %v2416_v15 }
0x102e   :  { %v2420_v5 = vadd.f32 1e-05, %v2418_v55 }
0x1030   :  { %4994 = vrsqrt.f32 %v2420_v5 }
0x1036   :  { %v4993_v9 = vpop.eup %4992 }
0x1037   :  { %v2423_v59 = vmul.f32 %v4993_v9, %v2407_v57 }
0x1039   :  { %v2429_v20 = vmul.f32 %v5944_v54, %v2423_v59 }
0x103a   :  { %v4995_v16 = vpop.eup %4994 }
0x103b   :  { %v2435_v41 = vadd.f32 %v5947_v18, %v2429_v20   ;;  %v2424_v38 = vmul.f32 %v4995_v16, %v2408_v19 }
0x103d   :  { %v2430_v11 = vmul.f32 %v5944_v54, %v2424_v38 }
0x103f   :  { %v2436_v58 = vadd.f32 %v5947_v18, %v2430_v11  }
0x1040 LB: > { %v6575_v63 = vld [vmem:[#allocation19_spill] sm:$0xff]  ;;  %v6576_v61 = vld [vmem:[#allocation18_spill] sm:$0xff]  ;;  %v6577_v60 = vld [vmem:[#allocation17_spill] sm:$0xff]  ;;  %6584 = vst [vmem:[#allocation35_spill] sm:$0xff] %v5106_v58  ;;  %v5135_v37 = vmov 0   ;;  %vm5137_vm13 = vmmov 0   ;;  %s5114_s0 = sphi %s5957_s0, %s2442_s0   ;;  %v5110_v41 = vphi %v2435_v41, %v6617_v41   ;;  %v5106_v58 = vphi %v2436_v58, %v6616_v58  }
0x1041   : > { %v6578_v48 = vld [vmem:[#allocation16_spill] sm:$0xff]  ;;  %v6579_v35 = vld [vmem:[#allocation22_spill] sm:$0xff]  ;;  %v6580_v32 = vld [vmem:[#allocation25_spill] sm:$0xff]  ;;  %6585 = vst [vmem:[#allocation36_spill] sm:$0xff] %v5110_v41  ;;  %2497 = vmatprep.mubr.bf16.mxu1 %v5135_v37  ;;  %s5138_s28 = smov 80   ;;  %s5139_s29 = smov 112  }
0x1042   : > { %v6581_v31 = vld [vmem:[#allocation24_spill] sm:$0xff]  ;;  %v6582_v12 = vld [vmem:[#allocation21_spill] sm:$0xff]  ;;  %v6586_v21 = vld [vmem:[#allocation7_spill] sm:$0xff]  ;;  %v2453_v57 = vmul.f32 %v5110_v41, %v6578_v48  ;;  %v2454_v19 = vmul.f32 %v5106_v58, %v6578_v48  ;;  %s5140_s1 = smov 64   ;;  %s5141_s30 = smov 96  }
0x1043   : > { %v6583_v17 = vld [vmem:[#allocation20_spill] sm:$0xff]  ;;  %2465 = vmatprep.subr.bf16.mxu1 %v6586_v21  ;;  %v6588_v23 = vld [vmem:[#allocation9_spill] sm:$0xff]  ;;  %v6589_v24 = vld [vmem:[#allocation10_spill] sm:$0xff]  ;;  %s5142_s5 = smov 16   ;;  %s5143_s10 = smov 32  }
0x1044   : > { %v6587_v22 = vld [vmem:[#allocation8_spill] sm:$0xff]  ;;  %v4824_v51 = vround.rtne.f32 %v2453_v57  ;;  %v4825_v13 = vround.rtne.f32 %v2454_v19  ;;  %v6590_v25 = vld [vmem:[#allocation11_spill] sm:$0xff]  ;;  %v6592_v28 = vld [vmem:[#allocation13_spill] sm:$0xff]  ;;  %s5144_s14 = smov 48   ;;  %s2442_s0 = sadd.s32 1, %s5114_s0  }
0x1045   : > { %2466 = vmatpush1.bf16.msra.mxu1 %v6587_v22  ;;  %v6591_v26 = vld [vmem:[#allocation12_spill] sm:$0xff]  ;;  %v6593_v29 = vld [vmem:[#allocation14_spill] sm:$0xff]  ;;  %p2439_p8 = scmp.ge.s32.totalorder %s2442_s0, 5  }
0x1046   : > { %2467 = vmatprep.subr.bf16.mxu1 %v6588_v23  ;;  %v2457_v15 = vmax.f32 %v4824_v51, -8.0  ;;  %v2458_v55 = vmax.f32 %v4825_v13, -8.0  ;;  %s5145_s15 = smov (%p2439_p8), 40   ;;  %s5147_s16 = smov (%p2439_p8), 24   ;;  %vm4298_vm14 = vcmask (%p2439_p8), 7168   ;;  %vm4271_vm15 = vcmask (%p2439_p8), 195584  }
0x1047   :  { %vm4274_vm2 = vcmask (%p2439_p8), 326656  }
0x1048   : > { %v2459_v5 = vmin.f32 %v2457_v15, 7.0  ;;  %v2460_v0 = vmin.f32 %v2458_v55, 7.0 }
0x1049   : > { %2468 = vmatpush1.bf16.msra.mxu1 %v6589_v24 }
0x104a   : > { %2469 = vmatprep.subr.bf16.mxu1 %v6590_v25  ;;  %v2461_v30 = vpack.c.bf16 %v2460_v0, %v2459_v5 }
0x104d   : > { %2470 = vmatpush1.bf16.msra.mxu1 %v6591_v26 }
0x104e   : > { %2471 = vmatprep.subr.bf16.mxu1 %v6592_v28 }
0x1051   : > { %2472 = vmatpush1.bf16.msra.mxu1 %v6593_v29 }
0x1054   : > { %4390 = vmatmul.mubr.msk.bf16.vlgmr.msra.gmra.mrb[0].mxu1 %vm183_vm1, %v2461_v30 }
0x1127   : > { %v2499_v9 = vpop.f32.mrb[0].mxu1 }
0x1128   : > { %v2508_v59 = vmul.f32 %v2499_v9, %v6577_v60  ;;  %v2512_v20 = vmul.f32 %v2499_v9, %v6576_v61  ;;  %v5983_v16 = vpop.f32.mrb[1].mxu1 }
0x1129   : > { %v2503_v38 = vpop.f32.mrb[2].mxu1 }
0x112a   : > { %v2510_v11 = vadd.f32 %v2508_v59, %v6583_v17  ;;  %v2514_v37 = vadd.f32 %v2512_v20, %v6575_v63  ;;  %v2509_v57 = vmul.f32 %v2503_v38, %v6577_v60  ;;  %v2513_v19 = vmul.f32 %v2503_v38, %v6576_v61  ;;  %v5989_v51 = vpop.f32.mrb[3].mxu1 }
0x112b   : > { %v6493_v38 = vmov 0.0  }
0x112c   : > { %v2520_v13 = vmul.f32 %v6579_v35, %v2510_v11  ;;  %v2556_v15 = vmul.f32 %v6582_v12, %v2514_v37  ;;  %v2511_v55 = vadd.f32 %v2509_v57, %v6583_v17  ;;  %v2515_v5 = vadd.f32 %v2513_v19, %v6575_v63  ;;  %4654 = vmatprep.subr.bf16.mxu1 %v6493_v38 }
0x112d   : > { %4666 = vmatprep.subr.bf16.mxu0 %v6493_v38  ;;  %4656 = vmatprep.mubr.msk.bf16.mxu1 %vm5137_vm13, %v6493_v38 }
0x112e   : > { %v4826_v0 = vround.rtne.f32 %v2520_v13  ;;  %v4828_v30 = vround.rtne.f32 %v2556_v15  ;;  %v2521_v9 = vmul.f32 %v6579_v35, %v2511_v55  ;;  %v2557_v59 = vmul.f32 %v6582_v12, %v2515_v5  ;;  %4668 = vmatprep.mubr.msk.bf16.mxu0 %vm5137_vm13, %v6493_v38 }
0x1130   : > { %v2560_v20 = vmax.f32 %v4828_v30, -8.0  ;;  %v4827_v21 = vround.rtne.f32 %v2521_v9  ;;  %v4829_v22 = vround.rtne.f32 %v2557_v59  ;;  %v2524_v11 = vmax.f32 %v4826_v0, -8.0 }
0x1132   : > { %v2525_v37 = vmax.f32 %v4827_v21, -8.0  ;;  %v2561_v23 = vmax.f32 %v4829_v22, -8.0  ;;  %v2562_v57 = vmin.f32 %v2560_v20, 7.0  ;;  %v2526_v13 = vmin.f32 %v2524_v11, 7.0 }
0x1134   : > { %v2527_v17 = vmin.f32 %v2525_v37, 7.0  ;;  %v2563_v19 = vmin.f32 %v2561_v23, 7.0  ;;  %v2584_v21 = vpack.c.bf16 %v2562_v57, %v2562_v57 }
0x1136   : > { %v5008_v15 = vpack.i.bf16 %v2563_v19, %v2562_v57  ;;  %v5013_v55 = vpack.i.bf16 %v2527_v17, %v2526_v13  ;;  %v2585_v22 = vpack.c.bf16 %v2563_v19, %v2563_v19 }
0x1138   : > { %5009 = vrot.lane.b32.xlu1 %v5008_v15, %s5138_s28  ;;  %4999 = vrot.lane.b32.xlu0 %v5008_v15, %s5139_s29 }
0x113c   : > { %2629 = vrot.lane.b32.xlu1 %v2584_v21, %s5140_s1  ;;  %5004 = vrot.lane.b32.xlu0 %v5008_v15, %s5141_s30 }
0x1140   : > { %2678 = vrot.lane.b32.xlu0 %v2585_v22, %s5140_s1 }
0x11aa   : > { %v5010_v23 = vpop.permute.xlu1 %5009  ;;  %v5000_v5 = vpop.permute.xlu0 %4999 }
0x11ab   : > { %v5002_v0 = vunpack.i.h.bf16 %v5000_v5  ;;  %v5001_v30 = vunpack.i.l.bf16 %v5000_v5  ;;  %v5012_v22 = vunpack.i.h.bf16 %v5010_v23  ;;  %v2548_v5 = vpack.c.bf16 %v2526_v13, %v2526_v13 }
0x11ac   : > { %v2549_v13 = vpack.c.bf16 %v2527_v17, %v2527_v17 }
0x11ad   : > { %v2587_v9 = vpack.c.bf16 %v5002_v0, %v5002_v0  ;;  %v2586_v59 = vpack.c.bf16 %v5001_v30, %v5001_v30  ;;  %v5011_v0 = vunpack.i.l.bf16 %v5010_v23  ;;  %v2516_v23 = vmul.f32 %v5983_v16, %v6580_v32 }
0x11ae   : > { %v2630_v20 = vpop.permute.xlu1 %2629  ;;  %v5005_v11 = vpop.permute.xlu0 %5004 }
0x11af   : > { %v2635_v37 = vsel %vm97_vm0, %v2630_v20, 0  ;;  %v5006_v57 = vunpack.i.l.bf16 %v5005_v11  ;;  %2727 = vrot.lane.b32.xlu1 %v2586_v59, %s5140_s1  ;;  %2776 = vrot.lane.b32.xlu0 %v2587_v9, %s5140_s1  ;;  %v5007_v19 = vunpack.i.h.bf16 %v5005_v11  ;;  %v2591_v9 = vpack.c.bf16 %v5012_v22, %v5012_v22 }
0x11b0   : > { %4655 = vmatpush3.bf16.xpose.msra.mxu1 %v2635_v37  ;;  %v2590_v59 = vpack.c.bf16 %v5011_v0, %v5011_v0  ;;  %v2518_v17 = vadd.f32 %v2516_v23, %v6581_v31 }
0x11b1   : > { %v2588_v15 = vpack.c.bf16 %v5006_v57, %v5006_v57  ;;  %4660 = vmatprep.subr.bf16.mxu1 %v6493_v38  ;;  %v2589_v30 = vpack.c.bf16 %v5007_v19, %v5007_v19  ;;  %v2517_v57 = vmul.f32 %v5989_v51, %v6580_v32 }
0x11b2   : > { %v2679_v21 = vpop.permute.xlu0 %2678 }
0x11b3   : > { %2825 = vrot.lane.b32.xlu0 %v2588_v15, %s5140_s1  ;;  %5014 = vrot.lane.b32.xlu1 %v5013_v55, %s5139_s29  ;;  %v2684_v20 = vsel %vm97_vm0, %v2679_v21, 0  ;;  %v2519_v16 = vadd.f32 %v2517_v57, %v6581_v31 }
0x11b7   : > { %4657 = vmatmul.mubr.msk.bf16.vlgmr.msra.gmra.mrb[4].mxu1 %vm97_vm0, %v2548_v5  ;;  %5019 = vrot.lane.b32.xlu0 %v5013_v55, %s5141_s30 }
0x11b8   : > { %2874 = vrot.lane.b32.xlu1 %v2589_v30, %s5140_s1  ;;  %4661 = vmatpush3.bf16.xpose.msra.mxu1 %v2684_v20  ;;  %v6594_v30 = vld [vmem:[#allocation26_spill] sm:$0xff] }
0x11b9   : > { %4662 = vmatprep.mubr.msk.bf16.mxu1 %vm5137_vm13, %v6493_v38  ;;  %4672 = vmatprep.subr.bf16.mxu1 %v6493_v38  ;;  %v2592_v20 = vmul.f32 %v6594_v30, %v2518_v17 }
0x11bb   : > { %2972 = vrot.lane.b32.xlu0 %v2591_v9, %s5140_s1  ;;  %v4830_v57 = vround.rtne.f32 %v2592_v20 }
0x11bc   : > { %2923 = vrot.lane.b32.xlu1 %v2590_v59, %s5140_s1  ;;  %v2593_v59 = vmul.f32 %v6594_v30, %v2519_v16 }
0x11bd   : > { %v2596_v16 = vmax.f32 %v4830_v57, -8.0 }
0x11bf   : > { %4663 = vmatmul.mubr.msk.bf16.vlgmr.msra.gmra.mrb[8].mxu1 %vm97_vm0, %v2549_v13 }
0x11c0   : > { %5024 = vrot.lane.b32.xlu1 %v5013_v55, %s5138_s28  ;;  %4674 = vmatprep.mubr.msk.bf16.mxu1 %vm5137_vm13, %v6493_v38 }
0x1221   : > { %v2728_v11 = vpop.permute.xlu1 %2727  ;;  %v2777_v37 = vpop.permute.xlu0 %2776 }
0x1222   : > { %v2782_v15 = vsel %vm97_vm0, %v2777_v37, 0  ;;  %v2733_v19 = vsel %vm97_vm0, %v2728_v11, 0 }
0x1223   : > { %4667 = vmatpush3.bf16.xpose.msra.mxu0 %v2733_v19  ;;  %4673 = vmatpush3.bf16.xpose.msra.mxu1 %v2782_v15  ;;  %v4831_v19 = vround.rtne.f32 %v2593_v59 }
0x1224   : > { %4678 = vmatprep.subr.bf16.mxu0 %v6493_v38  ;;  %4684 = vmatprep.subr.bf16.mxu1 %v6493_v38 }
0x1225   : > { %v2826_v55 = vpop.permute.xlu0 %2825  ;;  %v5015_v21 = vpop.permute.xlu1 %5014 }
0x1226   : > { %v5017_v22 = vunpack.i.h.bf16 %v5015_v21  ;;  %v5016_v5 = vunpack.i.l.bf16 %v5015_v21  ;;  %v2831_v13 = vsel %vm97_vm0, %v2826_v55, 0 }
0x1228   : > { %v2551_v0 = vpack.c.bf16 %v5017_v22, %v5017_v22  ;;  %v2550_v51 = vpack.c.bf16 %v5016_v5, %v5016_v5  ;;  %v2597_v5 = vmax.f32 %v4831_v19, -8.0 }
0x1229   : > { %v5020_v9 = vpop.permute.xlu0 %5019 }
0x122a   : > { %v2875_v11 = vpop.permute.xlu1 %2874  ;;  %4669 = vmatmul.mubr.msk.bf16.vlgmr.msra.gmra.mrb[0].mxu0 %vm97_vm0, %v2550_v51  ;;  %4675 = vmatmul.mubr.msk.bf16.vlgmr.msra.gmra.mrb[12].mxu1 %vm97_vm0, %v2551_v0  ;;  %v5021_v37 = vunpack.i.l.bf16 %v5020_v9  ;;  %v5022_v15 = vunpack.i.h.bf16 %v5020_v9  ;;  %v6055_v9 = vmin.f32 %v2596_v16, 7.0 }
0x122b   : > { %v2880_v23 = vsel %vm97_vm0, %v2875_v11, 0  ;;  %4679 = vmatpush3.bf16.xpose.msra.mxu0 %v2831_v13  ;;  %4680 = vmatprep.mubr.msk.bf16.mxu0 %vm5137_vm13, %v6493_v38  ;;  %v6060_v11 = vmin.f32 %v2597_v5, 7.0 }
0x122c   : > { %4685 = vmatpush3.bf16.xpose.msra.mxu1 %v2880_v23  ;;  %4686 = vmatprep.mubr.msk.bf16.mxu1 %vm5137_vm13, %v6493_v38  ;;  %v2552_v55 = vpack.c.bf16 %v5021_v37, %v5021_v37  ;;  %v2553_v22 = vpack.c.bf16 %v5022_v15, %v5022_v15  ;;  %v2620_v57 = vmul.f32 %v6055_v9, %v5540_v33 }
0x122d   : > { %4690 = vmatprep.subr.bf16.mxu0 %v6493_v38  ;;  %4696 = vmatprep.subr.bf16.mxu1 %v6493_v38  ;;  %v2973_v21 = vpop.permute.xlu0 %2972  ;;  %v2621_v15 = vmul.f32 %v6060_v11, %v5540_v33 }
0x122e   : > { %v2924_v17 = vpop.permute.xlu1 %2923  ;;  %v2978_v13 = vsel %vm97_vm0, %v2973_v21, 0 }
0x122f   : > { %v2929_v0 = vsel %vm97_vm0, %v2924_v17, 0  ;;  %v6595_v17 = vld [vmem:[#allocation23_spill] sm:$0xff] }
0x1232   : > { %v5025_v51 = vpop.permute.xlu1 %5024  ;;  %4681 = vmatmul.mubr.msk.bf16.vlgmr.msra.gmra.mrb[4].mxu0 %vm97_vm0, %v2552_v55 }
0x1233   : > { %4687 = vmatmul.mubr.msk.bf16.vlgmr.msra.gmra.mrb[16].mxu1 %vm97_vm0, %v2553_v22  ;;  %4691 = vmatpush3.bf16.xpose.msra.mxu0 %v2929_v0  ;;  %v5026_v20 = vunpack.i.l.bf16 %v5025_v51  ;;  %v5027_v59 = vunpack.i.h.bf16 %v5025_v51 }
0x1234   : > { %4697 = vmatpush3.bf16.xpose.msra.mxu1 %v2978_v13  ;;  %4692 = vmatprep.mubr.msk.bf16.mxu0 %vm5137_vm13, %v6493_v38 }
0x1235   : > { %4698 = vmatprep.mubr.msk.bf16.mxu1 %vm5137_vm13, %v6493_v38  ;;  %4702 = vmatprep.subr.mxu0 %v6493_v38  ;;  %v2554_v23 = vpack.c.bf16 %v5026_v20, %v5026_v20  ;;  %v2555_v37 = vpack.c.bf16 %v5027_v59, %v5027_v59 }
0x1236   : > { %4707 = vmatprep.subr.mxu1 %v6493_v38 }
0x123a   : > { %4693 = vmatmul.mubr.msk.bf16.vlgmr.msra.gmra.mrb[8].mxu0 %vm97_vm0, %v2554_v23 }
0x123b   : > { %4699 = vmatmul.mubr.msk.bf16.vlgmr.msra.gmra.mrb[20].mxu1 %vm97_vm0, %v2555_v37  ;;  %4703 = vmatpush3.msra.mxu0 %v2620_v57 }
0x123c   : > { %4708 = vmatpush3.msra.mxu1 %v2621_v15  ;;  %4704 = vmatprep.mubr.msk.f32.mxu0 %vm5137_vm13, %v6493_v38 }
0x123d   : > { %4709 = vmatprep.mubr.msk.f32.mxu1 %vm5137_vm13, %v6493_v38  ;;  %4712 = vmatprep.subr.mxu0 %v6493_v38 }
0x123e   : > { %4717 = vmatprep.subr.mxu1 %v6493_v38 }
0x128a   : > { %v2671_v19 = vpop.f32.mrb[4].mxu1 }
0x128b   : > { %v6076_v55 = vmul.f32 %v2671_v19, %v6595_v17  ;;  %v4658_v21 = vpop.f32.mrb[5].mxu1 }
0x128c   : > { %v2674_v16 = vpop.f32.mrb[6].mxu1 }
0x128d   : > { %6596 = vst [vmem:[#allocation37_spill] sm:$0xff] %v6076_v55  ;;  %v4659_v22 = vpop.f32.mrb[7].mxu1  ;;  %v3028_v5 = vsel %vm923_vm3, %v6076_v55, -inf }
0x128e   : > { %3029 = vmax.xlane.f32.xlu0 %v3028_v5 }
0x1292   : > { %v2720_v0 = vpop.f32.mrb[8].mxu1 }
0x1293   : > { %v6081_v51 = vmul.f32 %v2720_v0, %v6595_v17  ;;  %v4664_v13 = vpop.f32.mrb[9].mxu1 }
0x1294   : > { %v2723_v20 = vpop.f32.mrb[10].mxu1 }
0x1295   : > { %6597 = vst [vmem:[#allocation38_spill] sm:$0xff] %v6081_v51  ;;  %v4665_v59 = vpop.f32.mrb[11].mxu1  ;;  %v3031_v23 = vsel %vm923_vm3, %v6081_v51, -inf }
0x1296   : > { %3032 = vmax.xlane.f32.xlu1 %v3031_v23 }
0x12fd   : > { %v2769_v37 = vpop.f32.mrb[0].mxu0  ;;  %v2818_v57 = vpop.f32.mrb[12].mxu1 }
0x12fe   : > { %v6086_v15 = vmul.f32 %v2769_v37, %v6595_v17  ;;  %v4670_v19 = vpop.f32.mrb[1].mxu0  ;;  %v4676_v21 = vpop.f32.mrb[13].mxu1  ;;  %v6089_v5 = vmul.f32 %v2818_v57, %v6595_v17 }
0x12ff   : > { %v2772_v16 = vpop.f32.mrb[2].mxu0  ;;  %v2821_v22 = vpop.f32.mrb[14].mxu1 }
0x1300   : > { %6598 = vst [vmem:[#allocation39_spill] sm:$0xff] %v6086_v15  ;;  %6599 = vst [vmem:[#allocation40_spill] sm:$0xff] %v6089_v5  ;;  %v4671_v0 = vpop.f32.mrb[3].mxu0  ;;  %v4677_v13 = vpop.f32.mrb[15].mxu1  ;;  %v3034_v20 = vsel %vm923_vm3, %v6086_v15, -inf  ;;  %v3037_v59 = vsel %vm923_vm3, %v6089_v5, -inf }
0x1301   : > { %3035 = vmax.xlane.f32.xlu0 %v3034_v20 }
0x1305   : > { %v2867_v23 = vpop.f32.mrb[4].mxu0  ;;  %3038 = vmax.xlane.f32.xlu0 %v3037_v59 }
0x1306   : > { %v6096_v37 = vmul.f32 %v2867_v23, %v6595_v17  ;;  %v2916_v19 = vpop.f32.mrb[16].mxu1  ;;  %v4682_v21 = vpop.f32.mrb[5].mxu0 }
0x1307   : > { %v6099_v16 = vmul.f32 %v2916_v19, %v6595_v17  ;;  %v4688_v57 = vpop.f32.mrb[17].mxu1  ;;  %v2870_v22 = vpop.f32.mrb[6].mxu0 }
0x1308   : > { %6600 = vst [vmem:[#allocation41_spill] sm:$0xff] %v6096_v37  ;;  %v2919_v0 = vpop.f32.mrb[18].mxu1  ;;  %v4683_v13 = vpop.f32.mrb[7].mxu0  ;;  %v3040_v20 = vsel %vm923_vm3, %v6096_v37, -inf }
0x1309   : > { %6601 = vst [vmem:[#allocation42_spill] sm:$0xff] %v6099_v16  ;;  %v4689_v38 = vpop.f32.mrb[19].mxu1  ;;  %3041 = vmax.xlane.f32.xlu1 %v3040_v20  ;;  %v3043_v59 = vsel %vm923_vm3, %v6099_v16, -inf }
0x130a   : > { %3044 = vmax.xlane.f32.xlu0 %v3043_v59 }
0x130d   : > { %v2965_v23 = vpop.f32.mrb[8].mxu0 }
0x130e   : > { %v6106_v12 = vmul.f32 %v2965_v23, %v6595_v17  ;;  %v3014_v21 = vpop.f32.mrb[20].mxu1  ;;  %v4694_v19 = vpop.f32.mrb[9].mxu0 }
0x130f   : > { %v6109_v57 = vmul.f32 %v3014_v21, %v6595_v17  ;;  %v4700_v22 = vpop.f32.mrb[21].mxu1  ;;  %v2968_v0 = vpop.f32.mrb[10].mxu0 }
0x1310   : > { %6602 = vst [vmem:[#allocation43_spill] sm:$0xff] %v6106_v12  ;;  %v3017_v13 = vpop.f32.mrb[22].mxu1  ;;  %v4695_v24 = vpop.f32.mrb[11].mxu0  ;;  %v3046_v38 = vsel %vm923_vm3, %v6106_v12, -inf }
0x1311   : > { %6603 = vst [vmem:[#allocation44_spill] sm:$0xff] %v6109_v57  ;;  %v4701_v20 = vpop.f32.mrb[23].mxu1  ;;  %3047 = vmax.xlane.f32.xlu1 %v3046_v38  ;;  %v3049_v59 = vsel %vm923_vm3, %v6109_v57, -inf }
0x1312   : > { %3050 = vmax.xlane.f32.xlu0 %v3049_v59 }
0x131b   : > { %v3030_v23 = vpop.xlane.xlu0 %3029 }
0x131c   : > { %v3052_v25 = vsub.f32 %v6076_v55, %v3030_v23 }
0x131e   : > { %v3060_v19 = vmul.f32 1.442695, %v3052_v25 }
0x1320   : > { %5028 = vpow2.f32 %v3060_v19 }
0x1323   : > { %v3033_v21 = vpop.xlane.xlu1 %3032 }
0x1324   : > { %v3053_v22 = vsub.f32 %v6081_v51, %v3033_v21 }
0x1326   : > { %v3062_v0 = vmul.f32 1.442695, %v3053_v22 }
0x1328   : > { %5030 = vpow2.f32 %v3062_v0 }
0x132a   : > { %v5029_v24 = vpop.eup %5028 }
0x132b   : > { %v3076_v13 = vsel %vm923_vm3, %v5029_v24, 0.0 }
0x132c   : > { %3077 = vadd.xlane.f32.xlu1 %v3076_v13 }
0x1332   : > { %v5031_v20 = vpop.eup %5030 }
0x1333   : > { %v3079_v38 = vsel %vm923_vm3, %v5031_v20, 0.0 }
0x1334   : > { %3080 = vadd.xlane.f32.xlu0 %v3079_v38 }
0x138e   : > { %v3036_v17 = vpop.xlane.xlu0 %3035 }
0x138f   : > { %v3054_v59 = vsub.f32 %v6086_v15, %v3036_v17 }
0x1391   : > { %v3064_v26 = vmul.f32 1.442695, %v3054_v59 }
0x1392   : > { %v3039_v23 = vpop.xlane.xlu0 %3038 }
0x1393   : > { %5032 = vpow2.f32 %v3064_v26  ;;  %v3055_v25 = vsub.f32 %v6089_v5, %v3039_v23 }
0x1395   : > { %v3066_v19 = vmul.f32 1.442695, %v3055_v25 }
0x1396   : > { %v3042_v21 = vpop.xlane.xlu1 %3041 }
0x1397   : > { %5034 = vpow2.f32 %v3066_v19  ;;  %v3056_v22 = vsub.f32 %v6096_v37, %v3042_v21  ;;  %v3045_v0 = vpop.xlane.xlu0 %3044 }
0x1398   : > { %v3057_v13 = vsub.f32 %v6099_v16, %v3045_v0 }
0x1399   : > { %v3068_v28 = vmul.f32 1.442695, %v3056_v22 }
0x139a   : > { %v3070_v29 = vmul.f32 1.442695, %v3057_v13 }
0x139b   : > { %5036 = vpow2.f32 %v3068_v28 }
0x139c   : > { %5038 = vpow2.f32 %v3070_v29 }
0x139d   : > { %v5033_v38 = vpop.eup %5032 }
0x139e   : > { %v3048_v30 = vpop.xlane.xlu1 %3047  ;;  %v3082_v17 = vsel %vm923_vm3, %v5033_v38, 0.0 }
0x139f   : > { %v3058_v26 = vsub.f32 %v6106_v12, %v3048_v30  ;;  %v3051_v59 = vpop.xlane.xlu0 %3050  ;;  %3083 = vadd.xlane.f32.xlu1 %v3082_v17 }
0x13a0   : > { %v3059_v23 = vsub.f32 %v6109_v57, %v3051_v59 }
0x13a1   : > { %v5035_v25 = vpop.eup %5034  ;;  %v3072_v19 = vmul.f32 1.442695, %v3058_v26 }
0x13a2   : > { %v3074_v21 = vmul.f32 1.442695, %v3059_v23  ;;  %v3085_v31 = vsel %vm923_vm3, %v5035_v25, 0.0 }
0x13a3   : > { %5040 = vpow2.f32 %v3072_v19  ;;  %3086 = vadd.xlane.f32.xlu0 %v3085_v31 }
0x13a4   : > { %5042 = vpow2.f32 %v3074_v21 }
0x13a5   : > { %v5037_v28 = vpop.eup %5036 }
0x13a6   : > { %v5039_v29 = vpop.eup %5038  ;;  %v3088_v22 = vsel %vm923_vm3, %v5037_v28, 0.0 }
0x13a7   : > { %3089 = vadd.xlane.f32.xlu1 %v3088_v22  ;;  %v3091_v0 = vsel %vm923_vm3, %v5039_v29, 0.0 }
0x13a8   : > { %3092 = vadd.xlane.f32.xlu0 %v3091_v0 }
0x13ad   : > { %v5041_v30 = vpop.eup %5040 }
0x13ae   : > { %v5043_v13 = vpop.eup %5042  ;;  %v3094_v17 = vsel %vm923_vm3, %v5041_v30, 0.0 }
0x13af   : > { %3095 = vadd.xlane.f32.xlu1 %v3094_v17  ;;  %v3097_v26 = vsel %vm923_vm3, %v5043_v13, 0.0 }
0x13b0   : > { %3098 = vadd.xlane.f32.xlu0 %v3097_v26 }
0x13b9   : > { %v3078_v59 = vpop.xlane.xlu1 %3077 }
0x13ba   : > { %5044 = vrcp.f32 %v3078_v59 }
0x13c1   : > { %v3081_v31 = vpop.xlane.xlu0 %3080 }
0x13c2   : > { %5046 = vrcp.f32 %v3081_v31 }
0x13c4   : > { %v5045_v23 = vpop.eup %5044 }
0x13c5   : > { %v6131_v19 = vmul.f32 %v5045_v23, %v5029_v24 }
0x13c7   : > { %v3116_v21 = vsel %vm923_vm3, %v6131_v19, inf }
0x13c8   : > { %3117 = vmin.xlane.f32.xlu1 %v3116_v21 }
0x13cc   : > { %v5047_v22 = vpop.eup %5046 }
0x13cd   : > { %v6135_v0 = vmul.f32 %v5047_v22, %v5031_v20 }
0x13cf   : > { %v3119_v17 = vsel %vm923_vm3, %v6135_v0, inf }
0x13d0   : > { %3120 = vmin.xlane.f32.xlu0 %v3119_v17 }
0x142c   : > { %v3084_v32 = vpop.xlane.xlu1 %3083 }
0x142d   : > { %5048 = vrcp.f32 %v3084_v32 }
0x1430   : > { %v3087_v26 = vpop.xlane.xlu0 %3086 }
0x1431   : > { %5050 = vrcp.f32 %v3087_v26 }
0x1434   : > { %v3090_v59 = vpop.xlane.xlu1 %3089 }
0x1435   : > { %5052 = vrcp.f32 %v3090_v59  ;;  %v3093_v31 = vpop.xlane.xlu0 %3092 }
0x1436   : > { %5054 = vrcp.f32 %v3093_v31 }
0x1437   : > { %v5049_v24 = vpop.eup %5048 }
0x1438   : > { %v6139_v23 = vmul.f32 %v5049_v24, %v5033_v38 }
0x143a   : > { %v3122_v21 = vsel %vm923_vm3, %v6139_v23, inf }
0x143b   : > { %v5051_v20 = vpop.eup %5050  ;;  %3123 = vmin.xlane.f32.xlu1 %v3122_v21 }
0x143c   : > { %v3096_v22 = vpop.xlane.xlu1 %3095  ;;  %v6143_v35 = vmul.f32 %v5051_v20, %v5035_v25 }
0x143d   : > { %5056 = vrcp.f32 %v3096_v22  ;;  %v3099_v17 = vpop.xlane.xlu0 %3098 }
0x143e   : > { %5058 = vrcp.f32 %v3099_v17  ;;  %v3125_v32 = vsel %vm923_vm3, %v6143_v35, inf }
0x143f   : > { %v5053_v26 = vpop.eup %5052  ;;  %3126 = vmin.xlane.f32.xlu0 %v3125_v32 }
0x1440   : > { %v5055_v59 = vpop.eup %5054  ;;  %v6147_v31 = vmul.f32 %v5053_v26, %v5037_v28 }
0x1441   : > { %v6149_v38 = vmul.f32 %v5055_v59, %v5039_v29 }
0x1442   : > { %v3128_v24 = vsel %vm923_vm3, %v6147_v31, inf }
0x1443   : > { %3129 = vmin.xlane.f32.xlu1 %v3128_v24  ;;  %v3131_v25 = vsel %vm923_vm3, %v6149_v38, inf }
0x1444   : > { %3132 = vmin.xlane.f32.xlu0 %v3131_v25 }
0x1447   : > { %v5057_v21 = vpop.eup %5056 }
0x1448   : > { %v5059_v20 = vpop.eup %5058  ;;  %v6155_v22 = vmul.f32 %v5057_v21, %v5041_v30 }
0x1449   : > { %v6157_v17 = vmul.f32 %v5059_v20, %v5043_v13 }
0x144a   : > { %v3134_v28 = vsel %vm923_vm3, %v6155_v22, inf }
0x144b   : > { %3135 = vmin.xlane.f32.xlu1 %v3134_v28  ;;  %v3137_v29 = vsel %vm923_vm3, %v6157_v17, inf }
0x144c   : > { %3138 = vmin.xlane.f32.xlu0 %v3137_v29 }
0x1455   : > { %v3118_v30 = vpop.xlane.xlu1 %3117 }
0x1456   : > { %v3140_v59 = vrot.slane %v3118_v30, 4 }
0x1458   : > { %v3141_v48 = vmin.f32 %v3118_v30, %v3140_v59 }
0x145c   : > { %2601 = vrot.lane.b32.xlu1 %v6055_v9, %s5139_s29 }
0x145d   : > { %v3121_v13 = vpop.xlane.xlu0 %3120 }
0x145e   : > { %v3146_v24 = vrot.slane %v3121_v13, 4 }
0x1460   : > { %2608 = vrot.lane.b32.xlu1 %v6055_v9, %s5141_s30  ;;  %v3147_v60 = vmin.f32 %v3121_v13, %v3146_v24 }
0x1462   : > { %2605 = vrot.lane.b32.xlu0 %v6060_v11, %s5139_s29  ;;  %v3148_v12 = vrot.slane %v3147_v60, 2 }
0x1464   : > { %2611 = vrot.lane.b32.xlu1 %v6060_v11, %s5141_s30  ;;  %v3149_v3 = vmin.f32 %v3147_v60, %v3148_v12 }
0x1466   : > { %2614 = vrot.lane.b32.xlu0 %v6055_v9, %s5138_s28 }
0x1468   : > { %2617 = vrot.lane.b32.xlu1 %v6060_v11, %s5138_s28  ;;  %v3142_v11 = vrot.slane %v3141_v48, 2 }
0x146a   : > { %v3143_v50 = vmin.f32 %v3141_v48, %v3142_v11 }
0x14c8   : > { %v3124_v32 = vpop.xlane.xlu1 %3123 }
0x14c9   : > { %v3152_v25 = vrot.slane %v3124_v32, 4 }
0x14cb   : > { %v3153_v63 = vmin.f32 %v3124_v32, %v3152_v25 }
0x14cc   : > { %v3127_v26 = vpop.xlane.xlu0 %3126 }
0x14cd   : > { %v3158_v21 = vrot.slane %v3127_v26, 4  ;;  %v3154_v37 = vrot.slane %v3153_v63, 2 }
0x14cf   : > { %v3159_v9 = vmin.f32 %v3127_v26, %v3158_v21  ;;  %v3155_v13 = vmin.f32 %v3153_v63, %v3154_v37  ;;  %v3144_v21 = vrot.slane %v3143_v50, 1 }
0x14d0   : > { %v3130_v20 = vpop.xlane.xlu1 %3129 }
0x14d1   : > { %v3164_v28 = vrot.slane %v3130_v20, 4  ;;  %v3133_v29 = vpop.xlane.xlu0 %3132  ;;  %v3160_v15 = vrot.slane %v3159_v9, 2  ;;  %v3145_v48 = vmin.f32 %v3143_v50, %v3144_v21 }
0x14d2   : > { %v3170_v61 = vrot.slane %v3133_v29, 4 }
0x14d3   : > { %v3165_v55 = vmin.f32 %v3130_v20, %v3164_v28  ;;  %v3161_v32 = vmin.f32 %v3159_v9, %v3160_v15  ;;  %v3150_v20 = vrot.slane %v3149_v3, 1 }
0x14d4   : > { %v3171_v5 = vmin.f32 %v3133_v29, %v3170_v61  ;;  %v3156_v29 = vrot.slane %v3155_v13, 1 }
0x14d5   : > { %v3166_v57 = vrot.slane %v3165_v55, 2  ;;  %v3151_v60 = vmin.f32 %v3149_v3, %v3150_v20 }
0x14d6   : > { %v3172_v16 = vrot.slane %v3171_v5, 2  ;;  %v3157_v63 = vmin.f32 %v3155_v13, %v3156_v29 }
0x14d7   : > { %v3167_v51 = vmin.f32 %v3165_v55, %v3166_v57  ;;  %v3162_v55 = vrot.slane %v3161_v32, 1 }
0x14d8   : > { %v3173_v6 = vmin.f32 %v3171_v5, %v3172_v16  ;;  %v3136_v18 = vpop.xlane.xlu1 %3135 }
0x14d9   : > { %v3176_v54 = vrot.slane %v3136_v18, 4  ;;  %v3139_v40 = vpop.xlane.xlu0 %3138  ;;  %v3168_v24 = vrot.slane %v3167_v51, 1 }
0x14da   : > { %v3182_v30 = vrot.slane %v3139_v40, 4  ;;  %v3174_v26 = vrot.slane %v3173_v6, 1 }
0x14db   : > { %v3177_v59 = vmin.f32 %v3136_v18, %v3176_v54  ;;  %v3169_v5 = vmin.f32 %v3167_v51, %v3168_v24  ;;  %v3163_v18 = vmin.f32 %v3161_v32, %v3162_v55 }
0x14dc   : > { %v3183_v61 = vmin.f32 %v3139_v40, %v3182_v30  ;;  %v3175_v16 = vmin.f32 %v3173_v6, %v3174_v26 }
0x14dd   : > { %v3178_v25 = vrot.slane %v3177_v59, 2  ;;  %v3188_v15 = vmin.f32 %v3145_v48, %v3169_v5 }
0x14de   : > { %v3184_v28 = vrot.slane %v3183_v61, 2  ;;  %v3189_v37 = vmin.f32 %v3151_v60, %v3175_v16 }
0x14df   : > { %v3179_v52 = vmin.f32 %v3177_v59, %v3178_v25  ;;  %v2602_v59 = vpop.permute.xlu1 %2601 }
0x14e0   : > { %v3185_v57 = vmin.f32 %v3183_v61, %v3184_v28  ;;  %v3192_v30 = vmin.f32 %v3188_v15, %v3189_v37  ;;  %v2606_v15 = vpop.permute.xlu0 %2605 }
0x14e1   : > { %v3180_v44 = vrot.slane %v3179_v52, 1 }
0x14e2   : > { %v3186_v12 = vrot.slane %v3185_v57, 1 }
0x14e3   : > { %v3181_v54 = vmin.f32 %v3179_v52, %v3180_v44  ;;  %v2609_v20 = vpop.permute.xlu1 %2608 }
0x14e4   : > { %v3187_v40 = vmin.f32 %v3185_v57, %v3186_v12 }
0x14e5   : > { %v3190_v9 = vmin.f32 %v3157_v63, %v3181_v54 }
0x14e6   : > { %v3191_v11 = vmin.f32 %v3163_v18, %v3187_v40 }
0x14e8   : > { %v3193_v58 = vmin.f32 %v3190_v9, %v3191_v11 }
0x14ea   : > { %v6175_v41 = vmin.f32 %v3192_v30, %v3193_v58 }
0x14ec   : > { %v3195_v6 = vsub.f32 %v6131_v19, %v6175_v41  ;;  %v3196_v3 = vsub.f32 %v6135_v0, %v6175_v41  ;;  %v3197_v44 = vsub.f32 %v6139_v23, %v6175_v41  ;;  %v3198_v52 = vsub.f32 %v6143_v35, %v6175_v41 }
0x14ed   : > { %v3199_v50 = vsub.f32 %v6147_v31, %v6175_v41  ;;  %v3200_v58 = vsub.f32 %v6149_v38, %v6175_v41  ;;  %v3201_v51 = vsub.f32 %v6155_v22, %v6175_v41  ;;  %v3202_v19 = vsub.f32 %v6157_v17, %v6175_v41 }
0x14ee   : > { %v3203_v0 = vmul.f32 %v5572_v46, %v3195_v6  ;;  %v3204_v13 = vmul.f32 %v5572_v46, %v3196_v3  ;;  %v3205_v23 = vmul.f32 %v5572_v46, %v3197_v44  ;;  %v3206_v35 = vmul.f32 %v5572_v46, %v3198_v52  ;;  %v2612_v3 = vpop.permute.xlu1 %2611 }
0x14ef   : > { %v3207_v32 = vmul.f32 %v5572_v46, %v3199_v50  ;;  %v3208_v31 = vmul.f32 %v5572_v46, %v3200_v58  ;;  %v3209_v38 = vmul.f32 %v5572_v46, %v3201_v51  ;;  %v3210_v24 = vmul.f32 %v5572_v46, %v3202_v19  ;;  %v6625_v46 = vld [vmem:[#allocation44_spill] sm:$0xff] (%p2439_p8) }
0x14f0   : > { %v4832_v22 = vround.rtne.f32 %v3203_v0  ;;  %v4833_v26 = vround.rtne.f32 %v3204_v13  ;;  %v4834_v61 = vround.rtne.f32 %v3205_v23  ;;  %v4835_v17 = vround.rtne.f32 %v3206_v35 }
0x14f1   : > { %v4836_v25 = vround.rtne.f32 %v3207_v32  ;;  %v4837_v21 = vround.rtne.f32 %v3208_v31  ;;  %v4838_v48 = vround.rtne.f32 %v3209_v38  ;;  %v4839_v60 = vround.rtne.f32 %v3210_v24 }
0x14f2   : > { %v3219_v28 = vmax.f32 %v4832_v22, 0.0  ;;  %v3220_v29 = vmax.f32 %v4833_v26, 0.0  ;;  %v3221_v55 = vmax.f32 %v4834_v61, 0.0  ;;  %v3222_v5 = vmax.f32 %v4835_v17, 0.0  ;;  %v2615_v22 = vpop.permute.xlu0 %2614  ;;  %v2618_v26 = vpop.permute.xlu1 %2617 }
0x14f3   : > { %v3223_v16 = vmax.f32 %v4836_v25, 0.0  ;;  %v3224_v57 = vmax.f32 %v4837_v21, 0.0  ;;  %v3225_v30 = vmax.f32 %v4838_v48, 0.0  ;;  %v3226_v6 = vmax.f32 %v4839_v60, 0.0 }
0x14f4   : > { %v3227_v12 = vmin.f32 %v3219_v28, 15.0  ;;  %v3228_v63 = vmin.f32 %v3220_v29, 15.0  ;;  %v3229_v54 = vmin.f32 %v3221_v55, 15.0  ;;  %v3230_v18 = vmin.f32 %v3222_v5, 15.0 }
0x14f5   : > { %v3231_v9 = vmin.f32 %v3223_v16, 15.0  ;;  %v3232_v11 = vmin.f32 %v3224_v57, 15.0  ;;  %v2622_v51 = vmul.f32 %v2602_v59, %v5540_v33  ;;  %v2623_v19 = vmul.f32 %v2606_v15, %v5540_v33 }
0x14f6   : > { %v3235_v37 = vmul.f32 %v3227_v12, %v5559_v49  ;;  %v3236_v40 = vmul.f32 %v3228_v63, %v5559_v49  ;;  %v3237_v50 = vmul.f32 %v3229_v54, %v5559_v49  ;;  %v3238_v58 = vmul.f32 %v3230_v18, %v5559_v49 }
0x14f7   : > { %v3239_v0 = vmul.f32 %v3231_v9, %v5559_v49  ;;  %v3233_v13 = vmin.f32 %v3225_v30, 15.0  ;;  %v6604_v23 = vmov 0.0   ;;  %v3240_v32 = vmul.f32 %v3232_v11, %v5559_v49 }
0x14f8   : > { %v3243_v44 = vadd.f32 %v3235_v37, %v6175_v41  ;;  %v3244_v52 = vadd.f32 %v3236_v40, %v6175_v41  ;;  %v3245_v35 = vadd.f32 %v3237_v50, %v6175_v41  ;;  %v3246_v59 = vadd.f32 %v3238_v58, %v6175_v41 }
0x14f9   : > { %v3234_v31 = vmin.f32 %v3226_v6, 15.0  ;;  %v2624_v38 = vmul.f32 %v2609_v20, %v5540_v33  ;;  %v2625_v24 = vmul.f32 %v2612_v3, %v5540_v33  ;;  %v3241_v61 = vmul.f32 %v3233_v13, %v5559_v49 }
0x14fa   : > { %4705 = vmatmul.mubr.msk.f32.vlgmr.msra.gmra.mrb[12].mxu0 %vm923_vm3, %v3243_v44  ;;  %4710 = vmatmul.mubr.msk.f32.vlgmr.msra.gmra.mrb[24].mxu1 %vm923_vm3, %v3244_v52  ;;  %v3247_v17 = vadd.f32 %v3239_v0, %v6175_v41  ;;  %v3248_v25 = vadd.f32 %v3240_v32, %v6175_v41  ;;  %v2626_v20 = vmul.f32 %v2615_v22, %v5540_v33 }
0x14fb   : > { %4713 = vmatpush3.msra.mxu0 %v2622_v51  ;;  %4718 = vmatpush3.msra.mxu1 %v2623_v19  ;;  %v3242_v21 = vmul.f32 %v3234_v31, %v5559_v49  ;;  %v2627_v28 = vmul.f32 %v2618_v26, %v5540_v33  ;;  %v3249_v29 = vadd.f32 %v3241_v61, %v6175_v41  ;;  %v6623_v33 = vld [vmem:[#allocation42_spill] sm:$0xff] (%p2439_p8)  ;;  %v6624_v49 = vld [vmem:[#allocation43_spill] sm:$0xff] (%p2439_p8) }
0x14fc   : > { %4714 = vmatprep.mubr.msk.f32.mxu0 %vm5137_vm13, %v6604_v23  ;;  %4719 = vmatprep.mubr.msk.f32.mxu1 %vm5137_vm13, %v6604_v23 }
0x14fd   : > { %4722 = vmatprep.subr.mxu0 %v6604_v23  ;;  %4727 = vmatprep.subr.mxu1 %v6604_v23  ;;  %v3250_v55 = vadd.f32 %v3242_v21, %v6175_v41 }
0x14fe   : > { %4715 = vmatmul.mubr.msk.f32.vlgmr.msra.gmra.mrb[14].mxu0 %vm923_vm3, %v3245_v35  ;;  %4720 = vmatmul.mubr.msk.f32.vlgmr.msra.gmra.mrb[26].mxu1 %vm923_vm3, %v3246_v59 }
0x14ff   : > { %4723 = vmatpush3.msra.mxu0 %v2624_v38  ;;  %4728 = vmatpush3.msra.mxu1 %v2625_v24 }
0x1500   : > { %4724 = vmatprep.mubr.msk.f32.mxu0 %vm5137_vm13, %v6604_v23  ;;  %4729 = vmatprep.mubr.msk.f32.mxu1 %vm5137_vm13, %v6604_v23 }
0x1501   : > { %4732 = vmatprep.subr.mxu0 %v6604_v23  ;;  %4737 = vmatprep.subr.mxu1 %v6604_v23 }
0x1502   : > { %4725 = vmatmul.mubr.msk.f32.vlgmr.msra.gmra.mrb[16].mxu0 %vm923_vm3, %v3247_v17  ;;  %4730 = vmatmul.mubr.msk.f32.vlgmr.msra.gmra.mrb[28].mxu1 %vm923_vm3, %v3248_v25 }
0x1503   : > { %4733 = vmatpush3.msra.mxu0 %v2626_v20  ;;  %4738 = vmatpush3.msra.mxu1 %v2627_v28 }
0x1504   : > { %4734 = vmatprep.mubr.msk.f32.mxu0 %vm5137_vm13, %v6604_v23  ;;  %4739 = vmatprep.mubr.msk.f32.mxu1 %vm5137_vm13, %v6604_v23 }
0x1505   : > { %4742 = vmatprep.subr.bf16.mxu0 %v6604_v23  ;;  %4754 = vmatprep.subr.bf16.mxu1 %v6604_v23 }
0x1506   : > { %4735 = vmatmul.mubr.msk.f32.vlgmr.msra.gmra.mrb[18].mxu0 %vm923_vm3, %v3249_v29  ;;  %4740 = vmatmul.mubr.msk.f32.vlgmr.msra.gmra.mrb[30].mxu1 %vm923_vm3, %v3250_v55 }
0x1507   : > { %4743 = vmatpush3.bf16.msra.mxu0 %v5757_v36  ;;  %4750 = vmatprep.mubr.msk.bf16.mxu0 %vm5137_vm13, %v6604_v23  ;;  %v6626_v36 = vld [vmem:[#allocation40_spill] sm:$0xff] (%p2439_p8) }
0x1508   : > { %4744 = vmatprep.subr.bf16.mxu0 %v6604_v23  ;;  %4755 = vmatpush3.bf16.msra.mxu1 %v5835_v27 }
0x1509   : > { %4756 = vmatprep.subr.bf16.mxu1 %v6604_v23  ;;  %4762 = vmatprep.mubr.msk.bf16.mxu1 %vm5137_vm13, %v6604_v23 }
0x150b   : > { %4745 = vmatpush3.bf16.msra.mxu0 %v5763_v7 }
0x150c   : > { %4746 = vmatprep.subr.bf16.mxu0 %v6604_v23  ;;  %4757 = vmatpush3.bf16.msra.mxu1 %v5841_v42 }
0x150d   : > { %4758 = vmatprep.subr.bf16.mxu1 %v6604_v23 }
0x150f   : > { %4747 = vmatpush3.bf16.msra.mxu0 %v5770_v2 }
0x1510   : > { %4748 = vmatprep.subr.bf16.mxu0 %v6604_v23  ;;  %4759 = vmatpush3.bf16.msra.mxu1 %v5848_v45 }
0x1511   : > { %4760 = vmatprep.subr.bf16.mxu1 %v6604_v23 }
0x1513   : > { %4749 = vmatpush3.bf16.msra.mxu0 %v5777_v47 }
0x1514   : > { %4761 = vmatpush3.bf16.msra.mxu1 %v5855_v34  ;;  %4766 = vmatprep.subr.bf16.mxu0 %v6604_v23 }
0x15cd   : > { %v6268_v41 = vpop.f32.mrb[12].mxu0  ;;  %v6270_v5 = vpop.f32.mrb[24].mxu1 }
0x15ce   : > { %v4706_v16 = vpop.f32.mrb[13].mxu0  ;;  %v4711_v57 = vpop.f32.mrb[25].mxu1  ;;  %v3836_v48 = vrot.slane %v6268_v41, 1  ;;  %v3900_v60 = vrot.slane %v6270_v5, 1  ;;  %v3840_v15 = vrot.slane %v6268_v41, 2  ;;  %v3904_v6 = vrot.slane %v6270_v5, 2 }
0x15cf   : > { %v3844_v51 = vrot.slane %v6268_v41, 3  ;;  %v3908_v0 = vrot.slane %v6270_v5, 3 }
0x15d0   : > { %3837 = vrot.lane.b32.xlu0 %v3836_v48, %s5142_s5  ;;  %3901 = vrot.lane.b32.xlu1 %v3900_v60, %s5142_s5 }
0x15d1   : > { %v6276_v12 = vpop.f32.mrb[14].mxu0  ;;  %v6278_v63 = vpop.f32.mrb[26].mxu1 }
0x15d2   : > { %v4716_v54 = vpop.f32.mrb[15].mxu0  ;;  %v4721_v18 = vpop.f32.mrb[27].mxu1  ;;  %v3852_v37 = vrot.slane %v6276_v12, 1  ;;  %v3916_v3 = vrot.slane %v6278_v63, 1  ;;  %v3856_v19 = vrot.slane %v6276_v12, 2  ;;  %v3920_v13 = vrot.slane %v6278_v63, 2 }
0x15d3   : > { %v3860_v35 = vrot.slane %v6276_v12, 3  ;;  %v3924_v32 = vrot.slane %v6278_v63, 3 }
0x15d4   : > { %3841 = vrot.lane.b32.xlu0 %v3840_v15, %s5143_s10  ;;  %3853 = vrot.lane.b32.xlu1 %v3852_v37, %s5142_s5 }
0x15d5   : > { %v6284_v40 = vpop.f32.mrb[16].mxu0  ;;  %v6286_v9 = vpop.f32.mrb[28].mxu1 }
0x15d6   : > { %v4726_v11 = vpop.f32.mrb[17].mxu0  ;;  %v4731_v30 = vpop.f32.mrb[29].mxu1  ;;  %v3868_v59 = vrot.slane %v6284_v40, 1  ;;  %v3932_v31 = vrot.slane %v6286_v9, 1  ;;  %v3872_v38 = vrot.slane %v6284_v40, 2  ;;  %v3936_v24 = vrot.slane %v6286_v9, 2 }
0x15d7   : > { %v3876_v22 = vrot.slane %v6284_v40, 3  ;;  %v3940_v61 = vrot.slane %v6286_v9, 3 }
0x15d8   : > { %3905 = vrot.lane.b32.xlu0 %v3904_v6, %s5143_s10  ;;  %3917 = vrot.lane.b32.xlu1 %v3916_v3, %s5142_s5 }
0x15d9   : > { %v6292_v44 = vpop.f32.mrb[18].mxu0  ;;  %v6294_v52 = vpop.f32.mrb[30].mxu1 }
0x15da   : > { %v4736_v50 = vpop.f32.mrb[19].mxu0  ;;  %v4741_v58 = vpop.f32.mrb[31].mxu1  ;;  %v3884_v26 = vrot.slane %v6292_v44, 1  ;;  %v3948_v17 = vrot.slane %v6294_v52, 1  ;;  %v3888_v25 = vrot.slane %v6292_v44, 2  ;;  %v3952_v21 = vrot.slane %v6294_v52, 2 }
0x15db   : > { %v3892_v20 = vrot.slane %v6292_v44, 3  ;;  %v3956_v28 = vrot.slane %v6294_v52, 3 }
0x15dc   : > { %3845 = vrot.lane.b32.xlu0 %v3844_v51, %s5144_s14  ;;  %3857 = vrot.lane.b32.xlu1 %v3856_v19, %s5143_s10 }
0x15e0   : > { %3909 = vrot.lane.b32.xlu0 %v3908_v0, %s5144_s14  ;;  %3921 = vrot.lane.b32.xlu1 %v3920_v13, %s5143_s10 }
0x15e4   : > { %3861 = vrot.lane.b32.xlu0 %v3860_v35, %s5144_s14  ;;  %3869 = vrot.lane.b32.xlu1 %v3868_v59, %s5142_s5 }
0x15e8   : > { %3925 = vrot.lane.b32.xlu0 %v3924_v32, %s5144_s14  ;;  %3933 = vrot.lane.b32.xlu1 %v3932_v31, %s5142_s5 }
0x15ec   : > { %3873 = vrot.lane.b32.xlu0 %v3872_v38, %s5143_s10  ;;  %3937 = vrot.lane.b32.xlu1 %v3936_v24, %s5143_s10 }
0x15f0   : > { %3877 = vrot.lane.b32.xlu0 %v3876_v22, %s5144_s14  ;;  %3885 = vrot.lane.b32.xlu1 %v3884_v26, %s5142_s5 }
0x15f4   : > { %3941 = vrot.lane.b32.xlu0 %v3940_v61, %s5144_s14  ;;  %3949 = vrot.lane.b32.xlu1 %v3948_v17, %s5142_s5 }
0x15f8   : > { %3889 = vrot.lane.b32.xlu0 %v3888_v25, %s5143_s10  ;;  %3953 = vrot.lane.b32.xlu1 %v3952_v21, %s5143_s10 }
0x15fc   : > { %3893 = vrot.lane.b32.xlu0 %v3892_v20, %s5144_s14  ;;  %3957 = vrot.lane.b32.xlu1 %v3956_v28, %s5144_s14 }
0x1642   : > { %v3838_v29 = vpop.permute.xlu0 %3837  ;;  %v3902_v55 = vpop.permute.xlu1 %3901 }
0x1643   : > { %v3848_v15 = vsel %vm97_vm0, %v6268_v41, %v3838_v29  ;;  %v3912_v3 = vsel %vm97_vm0, %v6270_v5, %v3902_v55 }
0x1646   : > { %v3842_v16 = vpop.permute.xlu0 %3841  ;;  %v3854_v57 = vpop.permute.xlu1 %3853 }
0x1647   : > { %v3849_v37 = vsel %vm1839_vm4, %v3848_v15, %v3842_v16  ;;  %v3864_v50 = vsel %vm97_vm0, %v6276_v12, %v3854_v57 }
0x164a   : > { %v3906_v48 = vpop.permute.xlu0 %3905  ;;  %v3918_v60 = vpop.permute.xlu1 %3917 }
0x164b   : > { %v3913_v58 = vsel %vm1839_vm4, %v3912_v3, %v3906_v48  ;;  %v3928_v31 = vsel %vm97_vm0, %v6278_v63, %v3918_v60 }
0x164e   : > { %v3846_v54 = vpop.permute.xlu0 %3845  ;;  %v3858_v18 = vpop.permute.xlu1 %3857 }
0x164f   : > { %v3850_v11 = vsel %vm1841_vm5, %v3849_v37, %v3846_v54  ;;  %v3865_v19 = vsel %vm1839_vm4, %v3864_v50, %v3858_v18 }
0x1650   : > { %v3964_v51 = vrot.slane %v3850_v11, 3 }
0x1652   : > { %v3910_v30 = vpop.permute.xlu0 %3909  ;;  %v3922_v6 = vpop.permute.xlu1 %3921  ;;  %v3999_v5 = vsel %vm1991_vm6, %v3850_v11, %v3964_v51 }
0x1653   : > { %v3914_v0 = vsel %vm1841_vm5, %v3913_v58, %v3910_v30  ;;  %v3929_v12 = vsel %vm1839_vm4, %v3928_v31, %v3922_v6 }
0x1654   : > { %v3982_v38 = vrot.slane %v3914_v0, 3 }
0x1656   : > { %v3862_v41 = vpop.permute.xlu0 %3861  ;;  %v3870_v13 = vpop.permute.xlu1 %3869  ;;  %v4006_v20 = vsel %vm1991_vm6, %v3914_v0, %v3982_v38  ;;  %vm4277_vm6 = vcmask (%p2439_p8), 457728  }
0x1657   : > { %v3866_v35 = vsel %vm1841_vm5, %v3865_v19, %v3862_v41  ;;  %v3880_v16 = vsel %vm97_vm0, %v6284_v40, %v3870_v13 }
0x1658   : > { %v3967_v59 = vrot.slane %v3866_v35, 6  ;;  %v3969_v32 = vrot.slane %v3866_v35, 1 }
0x165a   : > { %v4000_v24 = vsel %vm1993_vm7, %v3999_v5, %v3967_v59  ;;  %v3926_v22 = vpop.permute.xlu0 %3925  ;;  %v3934_v26 = vpop.permute.xlu1 %3933 }
0x165b   : > { %v4001_v61 = vsel %vm1995_vm8, %v4000_v24, %v3969_v32  ;;  %v3930_v17 = vsel %vm1841_vm5, %v3929_v12, %v3926_v22  ;;  %v3944_v37 = vsel %vm97_vm0, %v6286_v9, %v3934_v26 }
0x165c   : > { %v3985_v25 = vrot.slane %v3930_v17, 6  ;;  %v3987_v21 = vrot.slane %v3930_v17, 1 }
0x165e   : > { %v4007_v28 = vsel %vm1993_vm7, %v4006_v20, %v3985_v25  ;;  %v3874_v63 = vpop.permute.xlu0 %3873  ;;  %v3938_v29 = vpop.permute.xlu1 %3937 }
0x165f   : > { %v4008_v55 = vsel %vm1995_vm8, %v4007_v28, %v3987_v21  ;;  %v3881_v57 = vsel %vm1839_vm4, %v3880_v16, %v3874_v63  ;;  %v3945_v11 = vsel %vm1839_vm4, %v3944_v37, %v3938_v29 }
0x1662   : > { %v3878_v48 = vpop.permute.xlu0 %3877  ;;  %v3886_v60 = vpop.permute.xlu1 %3885 }
0x1663   : > { %v3882_v54 = vsel %vm1841_vm5, %v3881_v57, %v3878_v48  ;;  %v3896_v9 = vsel %vm97_vm0, %v6292_v44, %v3886_v60 }
0x1664   : > { %v3972_v18 = vrot.slane %v3882_v54, 4  ;;  %v3974_v15 = vrot.slane %v3882_v54, 7 }
0x1666   : > { %v4002_v30 = vsel %vm1997_vm9, %v4001_v61, %v3972_v18  ;;  %v3942_v6 = vpop.permute.xlu0 %3941  ;;  %v3950_v3 = vpop.permute.xlu1 %3949 }
0x1667   : > { %v4003_v50 = vsel %vm1999_vm10, %v4002_v30, %v3974_v15  ;;  %v3946_v40 = vsel %vm1841_vm5, %v3945_v11, %v3942_v6  ;;  %v3960_v35 = vsel %vm97_vm0, %v6294_v52, %v3950_v3  ;;  %v6605_v30 = vld [vmem:[#allocation36_spill] sm:$0xff] }
0x1668   : > { %v3990_v58 = vrot.slane %v3946_v40, 4  ;;  %v3992_v51 = vrot.slane %v3946_v40, 7 }
0x166a   : > { %v4009_v19 = vsel %vm1997_vm9, %v4008_v55, %v3990_v58  ;;  %v3890_v0 = vpop.permute.xlu0 %3889  ;;  %v3954_v41 = vpop.permute.xlu1 %3953 }
0x166b   : > { %v4010_v13 = vsel %vm1999_vm10, %v4009_v19, %v3992_v51  ;;  %v3897_v59 = vsel %vm1839_vm4, %v3896_v9, %v3890_v0  ;;  %v3961_v32 = vsel %vm1839_vm4, %v3960_v35, %v3954_v41 }
0x166e   : > { %v3894_v31 = vpop.permute.xlu0 %3893  ;;  %v3958_v5 = vpop.permute.xlu1 %3957 }
0x166f   : > { %v3898_v38 = vsel %vm1841_vm5, %v3897_v59, %v3894_v31  ;;  %v3962_v12 = vsel %vm1841_vm5, %v3961_v32, %v3958_v5 }
0x1670   : > { %v3977_v24 = vrot.slane %v3898_v38, 2  ;;  %v3979_v22 = vrot.slane %v3898_v38, 5  ;;  %v3995_v26 = vrot.slane %v3962_v12, 2  ;;  %v3997_v61 = vrot.slane %v3962_v12, 5 }
0x1672   : > { %v4004_v17 = vsel %vm2001_vm11, %v4003_v50, %v3977_v24  ;;  %v4011_v44 = vsel %vm2001_vm11, %v4010_v13, %v3995_v26  ;;  %v6606_v50 = vld [vmem:[#allocation35_spill] sm:$0xff] }
0x1673   : > { %v4005_v52 = vsel %vm2003_vm12, %v4004_v17, %v3979_v22  ;;  %v4012_v25 = vsel %vm2003_vm12, %v4011_v44, %v3997_v61  ;;  %v6607_v17 = vld [vmem:[#allocation27_spill] sm:$0xff] }
0x1674   : > { %v4013_v21 = vmul.f32 %v5788_v53, %v4005_v52  ;;  %v4014_v20 = vmul.f32 %v5788_v53, %v4012_v25 }
0x1676   : > { %v4840_v28 = vround.rtne.f32 %v4013_v21  ;;  %v4841_v63 = vround.rtne.f32 %v4014_v20  ;;  %v6608_v21 = vld [vmem:[#allocation28_spill] sm:$0xff] }
0x1678   : > { %v4017_v29 = vmax.f32 %v4840_v28, -128.0  ;;  %v4018_v55 = vmax.f32 %v4841_v63, -128.0  ;;  %v6609_v63 = vld [vmem:[#allocation29_spill] sm:$0xff] }
0x167a   : > { %v4019_v16 = vmin.f32 %v4017_v29, 127.0  ;;  %v4020_v57 = vmin.f32 %v4018_v55, 127.0 }
0x167c   : > { %v4021_v48 = vpack.c.bf16 %v4020_v57, %v4019_v16 }
0x167e   : > { %4751 = vmatmul.mubr.msk.bf16.vlgmr.msra.gmra.mrb[20].mxu0 %vm183_vm1, %v4021_v48 }
0x167f   : > { %4767 = vmatpush3.bf16.msra.mxu0 %v5874_v8  ;;  %4782 = vmatprep.mubr.msk.bf16.mxu0 %vm5137_vm13, %v6604_v23 }
0x1680   : > { %4768 = vmatprep.subr.bf16.mxu0 %v6604_v23 }
0x1683   : > { %4769 = vmatpush3.bf16.msra.mxu0 %v5881_v62 }
0x1684   : > { %4770 = vmatprep.subr.bf16.mxu0 %v6604_v23 }
0x1687   : > { %4771 = vmatpush3.bf16.msra.mxu0 %v5888_v10  ;;  %v6629_v10 = vld [vmem:[#allocation37_spill] sm:$0xff] (%p2439_p8) }
0x1688   : > { %4772 = vmatprep.subr.bf16.mxu0 %v6604_v23 }
0x168b   : > { %4773 = vmatpush3.bf16.msra.mxu0 %v5894_v4 }
0x168c   : > { %4774 = vmatprep.subr.bf16.mxu0 %v6604_v23 }
0x168f   : > { %4775 = vmatpush3.bf16.msra.mxu0 %v5901_v39 }
0x1690   : > { %4776 = vmatprep.subr.bf16.mxu0 %v6604_v23 }
0x1693   : > { %4777 = vmatpush3.bf16.msra.mxu0 %v5908_v1 }
0x1694   : > { %4778 = vmatprep.subr.bf16.mxu0 %v6604_v23 }
0x1697   : > { %4779 = vmatpush3.bf16.msra.mxu0 %v5915_v43 }
0x1698   : > { %4780 = vmatprep.subr.bf16.mxu0 %v6604_v23 }
0x169b   : > { %4781 = vmatpush3.bf16.msra.mxu0 %v5922_v56 }
0x1751   : > { %v4059_v60 = vpop.f32.mrb[20].mxu0 }
0x1752   : > { %v4066_v54 = vmul.f32 %v4059_v60, %v5795_v14  ;;  %v4752_v18 = vpop.f32.mrb[21].mxu0 }
0x1753   : > { %v4062_v15 = vpop.f32.mrb[22].mxu0 }
0x1754   : > { %v4067_v37 = vmul.f32 %v4062_v15, %v5795_v14  ;;  %v4753_v11 = vpop.f32.mrb[23].mxu0  ;;  %v4068_v6 = vadd.f32 %v6605_v30, %v4066_v54  ;;  %v6610_v30 = vld [vmem:[#allocation30_spill] sm:$0xff]  ;;  %v6628_v14 = vld [vmem:[#allocation15_spill] sm:$0xff] (%p2439_p8) }
0x1756   : > { %v4070_v3 = vsel %vm183_vm1, %v4068_v6, 0.0  ;;  %v4069_v40 = vadd.f32 %v6606_v50, %v4067_v37 }
0x1757   : > { %4071 = vadd.xlane.f32.xlu0 %v4070_v3 }
0x1758   : > { %v4073_v58 = vsel %vm183_vm1, %v4069_v40, 0.0 }
0x1759   : > { %4074 = vadd.xlane.f32.xlu1 %v4073_v58 }
0x17e4   : > { %v4072_v23 = vpop.xlane.xlu0 %4071 }
0x17e5   : > { %v4076_v51 = vmul.f32 0.015625, %v4072_v23 }
0x17e6   : > { %v4075_v19 = vpop.xlane.xlu1 %4074 }
0x17e7   : > { %v4078_v0 = vsub.f32 %v4068_v6, %v4076_v51  ;;  %v4077_v41 = vmul.f32 0.015625, %v4075_v19  ;;  %v6611_v51 = vld [vmem:[#allocation31_spill] sm:$0xff] }
0x17e9   : > { %v4079_v13 = vsub.f32 %v4069_v40, %v4077_v41  ;;  %v4080_v9 = vmul.f32 %v4078_v0, %v4078_v0 }
0x17eb   : > { %v4082_v35 = vsel %vm183_vm1, %v4080_v9, 0.0  ;;  %v4081_v59 = vmul.f32 %v4079_v13, %v4079_v13 }
0x17ec   : > { %4083 = vadd.xlane.f32.xlu0 %v4082_v35 }
0x17ed   : > { %v4085_v32 = vsel %vm183_vm1, %v4081_v59, 0.0 }
0x17f0   : > { %4086 = vadd.xlane.f32.xlu0 %v4085_v32 }
0x1879   : > { %v4084_v31 = vpop.xlane.xlu0 %4083 }
0x187a   : > { %v4088_v5 = vmul.f32 0.015625, %v4084_v31 }
0x187c   : > { %v4090_v38 = vadd.f32 1e-05, %v4088_v5 }
0x187d   : > { %v4087_v12 = vpop.xlane.xlu0 %4086 }
0x187e   : > { %5060 = vrsqrt.f32 %v4090_v38  ;;  %v4089_v24 = vmul.f32 0.015625, %v4087_v12  ;;  %v6612_v12 = vld [vmem:[#allocation32_spill] sm:$0xff] }
0x1880   : > { %v4091_v22 = vadd.f32 1e-05, %v4089_v24 }
0x1882   : > { %5062 = vrsqrt.f32 %v4091_v22 }
0x1888   : > { %v5061_v26 = vpop.eup %5060 }
0x1889   : > { %v4094_v61 = vmul.f32 %v5061_v26, %v4078_v0 }
0x188b   : > { %v4096_v44 = vmul.f32 %v4094_v61, %v6607_v17 }
0x188c   : > { %v5063_v52 = vpop.eup %5062 }
0x188d   : > { %v4095_v25 = vmul.f32 %v5063_v52, %v4079_v13  ;;  %v4098_v20 = vadd.f32 %v4096_v44, %v6608_v21 }
0x188f   : > { %v4097_v28 = vmul.f32 %v4095_v25, %v6607_v17  ;;  %v4100_v29 = vmul.f32 %v6609_v63, %v4098_v20 }
0x1891   : > { %v4099_v55 = vadd.f32 %v4097_v28, %v6608_v21  ;;  %v4842_v16 = vround.rtne.f32 %v4100_v29 }
0x1893   : > { %v4101_v57 = vmul.f32 %v6609_v63, %v4099_v55  ;;  %v4104_v60 = vmax.f32 %v4842_v16, -128.0 }
0x1895   : > { %v4843_v48 = vround.rtne.f32 %v4101_v57  ;;  %v4106_v18 = vmin.f32 %v4104_v60, 127.0 }
0x1897   : > { %v4105_v54 = vmax.f32 %v4843_v48, -128.0 }
0x1899   : > { %v4107_v15 = vmin.f32 %v4105_v54, 127.0 }
0x189b   : > { %v4108_v37 = vpack.c.bf16 %v4107_v15, %v4106_v18 }
0x189d   : > { %4763 = vmatmul.mubr.msk.bf16.vlgmr.msra.gmra.mrb[32].mxu1 %vm183_vm1, %v4108_v37 }
0x1970   : > { %v4146_v11 = vpop.f32.mrb[32].mxu1 }
0x1971   : > { %v4153_v6 = vmul.f32 %v4146_v11, %v6610_v30  ;;  %v4764_v3 = vpop.f32.mrb[33].mxu1 }
0x1972   : > { %v4149_v50 = vpop.f32.mrb[34].mxu1 }
0x1973   : > { %v4155_v40 = vmax.f32 %v4153_v6, 0.0  ;;  %v4154_v58 = vmul.f32 %v4149_v50, %v6610_v30  ;;  %v4765_v23 = vpop.f32.mrb[35].mxu1 }
0x1975   : > { %v4157_v19 = vmul.f32 %v6611_v51, %v4155_v40  ;;  %v4156_v0 = vmax.f32 %v4154_v58, 0.0 }
0x1977   : > { %v4844_v41 = vround.rtne.f32 %v4157_v19  ;;  %v4158_v13 = vmul.f32 %v6611_v51, %v4156_v0 }
0x1979   : > { %v4161_v9 = vmax.f32 %v4844_v41, -128.0  ;;  %v4845_v35 = vround.rtne.f32 %v4158_v13  ;;  %v6613_v41 = vld [vmem:[#allocation33_spill] sm:$0xff] }
0x197a   : > { %v6614_v13 = vmov %v6613_v41 }
0x197b   : > { %v4162_v59 = vmax.f32 %v4845_v35, -128.0  ;;  %v4163_v32 = vmin.f32 %v4161_v9, 127.0 }
0x197d   : > { %v4164_v31 = vmin.f32 %v4162_v59, 127.0  ;;  %v6615_v59 = vld [vmem:[#allocation34_spill] sm:$0xff] }
0x197f   : > { %v4165_v5 = vpack.c.bf16 %v4164_v31, %v4163_v32 }
0x1981   : > { %4783 = vmatmul.mubr.bf16.vlgmr.msra.gmra.mrb[24].mxu0 %v4165_v5 }
0x1a54   : > { %v4200_v38 = vpop.f32.mrb[24].mxu0 }
0x1a55   : > { %v4207_v24 = vmul.f32 %v4200_v38, %v6612_v12  ;;  %v4784_v22 = vpop.f32.mrb[25].mxu0  ;;  %v6618_v38 = vld [vmem:[#allocation5_spill] sm:$0xff] (%p2439_p8) }
0x1a56   : > { %v4203_v26 = vpop.f32.mrb[26].mxu0  ;;  %v6619_v22 = vld [vmem:[#allocation38_spill] sm:$0xff] (%p2439_p8)  ;;  %v6627_v53 = vsub.s32 (%p2439_p8), 1, %v6618_v38 }
0x1a57   : > { %v4208_v61 = vmul.f32 %v4203_v26, %v6612_v12  ;;  %v4785_v44 = vpop.f32.mrb[27].mxu0  ;;  %v4209_v52 = vadd.f32 %v4207_v24, %v4098_v20  ;;  %v4282_v24 = vsub.s32 (%p2439_p8), 5, %v6618_v38  ;;  %v6620_v26 = vld [vmem:[#allocation6_spill] sm:$0xff] (%p2439_p8) }
0x1a58   :  { %v4295_v27 = vrot.slane (%p2439_p8), %v6628_v14, %v6627_v53 }
0x1a59   : > { %v4211_v25 = vsel %vm183_vm1, %v4209_v52, 0.0  ;;  %v4210_v28 = vadd.f32 %v4208_v61, %v4099_v55  ;;  %v4283_v61 = vrot.slane (%p2439_p8), %v6620_v26, %v4282_v24 }
0x1a5a   : > { %4212 = vadd.xlane.f32.xlu1 %v4211_v25  ;;  %v6621_v25 = vld [vmem:[#allocation39_spill] sm:$0xff] (%p2439_p8) }
0x1a5b   : > { %v4214_v29 = vsel %vm183_vm1, %v4210_v28, 0.0 }
0x1a5c   : > { %4215 = vadd.xlane.f32.xlu0 %v4214_v29 }
0x1ae7   : > { %v4213_v16 = vpop.xlane.xlu1 %4212 }
0x1ae8   : > { %v4217_v57 = vmul.f32 0.015625, %v4213_v16  ;;  %v6622_v16 = vld [vmem:[#allocation41_spill] sm:$0xff] (%p2439_p8) }
0x1ae9   : > { %v4216_v48 = vpop.xlane.xlu0 %4215 }
0x1aea   : > { %v4219_v60 = vsub.f32 %v4209_v52, %v4217_v57  ;;  %v4218_v54 = vmul.f32 0.015625, %v4216_v48 }
0x1aec   : > { %v4220_v18 = vsub.f32 %v4210_v28, %v4218_v54  ;;  %v4221_v15 = vmul.f32 %v4219_v60, %v4219_v60 }
0x1aee   : > { %v4223_v37 = vsel %vm183_vm1, %v4221_v15, 0.0  ;;  %v4222_v11 = vmul.f32 %v4220_v18, %v4220_v18 }
0x1aef   : > { %4224 = vadd.xlane.f32.xlu1 %v4223_v37 }
0x1af0   : > { %v4226_v20 = vsel %vm183_vm1, %v4222_v11, 0.0 }
0x1af1   : > { %4227 = vadd.xlane.f32.xlu0 %v4226_v20 }
0x1b00   :  { %4242 = vrot.lane.b32.xlu1 (%p2439_p8), %v6619_v22, %s5118_s20  ;;  %s5146_s20 = smov (%p2439_p8), 56  }
0x1b04   :  { %4246 = vrot.lane.b32.xlu1 (%p2439_p8), %v6621_v25, %s5129_s11 }
0x1b08   :  { %4254 = vrot.lane.b32.xlu1 (%p2439_p8), %v6622_v16, %s5130_s12 }
0x1b0c   :  { %4258 = vrot.lane.b32.xlu1 (%p2439_p8), %v6623_v33, %s5145_s15 }
0x1b10   :  { %4262 = vrot.lane.b32.xlu1 (%p2439_p8), %v6624_v49, %s5131_s13 }
0x1b14   :  { %4266 = vrot.lane.b32.xlu1 (%p2439_p8), %v6625_v46, %s5146_s20 }
0x1b7c   : > { %v4225_v6 = vpop.xlane.xlu1 %4224 }
0x1b7d   : > { %v4229_v55 = vmul.f32 0.015625, %v4225_v6 }
0x1b7e   : > { %v4228_v3 = vpop.xlane.xlu0 %4227 }
0x1b7f   : > { %v4231_v50 = vadd.f32 1e-05, %v4229_v55  ;;  %v4230_v40 = vmul.f32 0.015625, %v4228_v3 }
0x1b80   :  { %v4243_v7 = vpop.permute.xlu1 (%p2439_p8), %4242 }
0x1b81   : > { %5064 = vrsqrt.f32 %v4231_v50  ;;  %v4232_v58 = vadd.f32 1e-05, %v4230_v40  ;;  %v4269_v4 = vsel (%p2439_p8), %vm923_vm3, %v6629_v10, %v4243_v7 }
0x1b83   : > { %5066 = vrsqrt.f32 %v4232_v58 }
0x1b84   :  { %v4247_v2 = vpop.permute.xlu1 (%p2439_p8), %4246 }
0x1b85   :  { %v4270_v1 = vsel (%p2439_p8), %vm97_vm0, %v4269_v4, %v4247_v2 }
0x1b88   :  { %v4255_v47 = vpop.permute.xlu1 (%p2439_p8), %4254 }
0x1b8b   : > { %v5065_v23 = vpop.eup %5064 }
0x1b8c   : > { %v4235_v19 = vmul.f32 %v5065_v23, %v4219_v60  ;;  %v4259_v42 = vpop.permute.xlu1 (%p2439_p8), %4258 }
0x1b8d   : > { %v5067_v0 = vpop.eup %5066 }
0x1b8e   : > { %v4237_v9 = vmul.f32 %v4235_v19, %v6613_v41  ;;  %v4236_v35 = vmul.f32 %v5067_v0, %v4220_v18  ;;  %2441 = sbr.rel (!%p2439_p8) target bundleno = 4160 (0x1040), region = 71 }
0x1b90   : > { %v4239_v32 = vadd.f32 %v4237_v9, %v6615_v59   ;;  %v4238_v31 = vmul.f32 %v4236_v35, %v6614_v13  ;;  %v4263_v62 = vpop.permute.xlu1 (%p2439_p8), %4262 }
0x1b92   : > { %v4240_v5 = vadd.f32 %v4238_v31, %v6615_v59   ;;  %v6617_v41 = vmov %v4239_v32  ;;  %v4284_v44 = vmul.f32 (%p2439_p8), %v4283_v61, %v4239_v32 }
0x1b94   : > { %v6616_v58 = vmov %v4240_v5  ;;  %v4285_v52 = vmul.f32 (%p2439_p8), %v4283_v61, %v4240_v5  ;;  %v4286_v28 = vsel (%p2439_p8), %vm183_vm1, %v4284_v44, 0.0  ;;  %v4267_v21 = vpop.permute.xlu1 (%p2439_p8), %4266 }
0x1b95   :  { %4287 = vadd.xlane.f32.xlu0 %v4286_v28 }
0x1b96   :  { %v4289_v29 = vsel %vm183_vm1, %v4285_v52, 0.0 }
0x1b99   :  { %4290 = vadd.xlane.f32.xlu0 %v4289_v29 }
0x1baf   :  { %4250 = vrot.lane.b32.xlu0 %v6626_v36, %s5147_s16 }
0x1c22   :  { %v4288_v45 = vpop.xlane.xlu0 %4287 }
0x1c23   :  { %v4296_v34 = vadd.f32 %v4295_v27, %v4288_v45 }
0x1c25   :  { %4299 = vst.msk [vmem:[%s6475_s8] sm:$0xff] %vm4298_vm14, %v4296_v34 }
0x1c26   :  { %v4291_v8 = vpop.xlane.xlu0 %4290 }
0x1c27   :  { %v4297_v39 = vadd.f32 %v4295_v27, %v4291_v8 }
0x1c29   :  { %4300 = vst.msk [vmem:[%s6475_s8 + $0x8] sm:$0xff] %vm4298_vm14, %v4297_v39 }
0x1c2a   :  { %v4251_v43 = vpop.permute.xlu0 %4250 }
0x1c2b   :  { %v4272_v56 = vsel %vm4271_vm15, %v4270_v1, %v4251_v43 }
0x1c2c   :  { %v4273_v17 = vsel %vm1839_vm4, %v4272_v56, %v4255_v47 }
0x1c2d   :  { %v4275_v63 = vsel %vm4274_vm2, %v4273_v17, %v4259_v42 }
0x1c2e   :  { %v4276_v30 = vsel %vm1841_vm5, %v4275_v63, %v4263_v62 }
0x1c2f   :  { %v4278_v51 = vsel %vm4277_vm6, %v4276_v30, %v4267_v21 }
0x1c30   :  { %4279 = vst.msk [vmem:[%s6476_s9] sm:$0xff] %vm183_vm1, %v4278_v51 }
0x1c31   :  { %4309 = vsyncpa [#allocation3], 1 }

</bundles_post_ra>
